<compile_context>
chip_gen: v5e
topology: v5e:2x2
jax: 0.10.0
libtpu: 0.0.40
codegen_flags: <defaults>
</compile_context>

<pallas_src>
import functools

import jax
import jax.numpy as jnp
from jax.experimental import pallas as pl
from jax.experimental.pallas import tpu as pltpu

_VMEM_LIMIT = 32 * 1024 * 1024  # fits v7x's 64 MiB physical / 32 MiB scoped VMEM


def _round_up(x, m):
    return ((x + m - 1) // m) * m


# --------------------------------------------------------------------------
# Tiled linear kernel: out = act(a @ w + b), a tiled over M, bf16 MXU operands
# --------------------------------------------------------------------------
def _linear_kernel(a_ref, w_ref, b_ref, o_ref, *, activation):
    acc = jnp.dot(a_ref[...], w_ref[...], preferred_element_type=jnp.float32)
    acc = acc + b_ref[...]                       # bias (1, N) broadcasts (f32)
    if activation == "relu":
        acc = jnp.maximum(acc, 0.0)
    o_ref[...] = acc.astype(o_ref.dtype)


def linear(a, w, b, activation="none", tm=512):
    """out = activation(a @ w + b).  a: (M, K), w: (K, N), b: (N,)."""
    M, K = a.shape
    _, N = w.shape
    tm = min(tm, _round_up(M, 8))
    Mp = _round_up(M, tm)
    a = a.astype(jnp.bfloat16)
    if Mp != M:
        a = jnp.pad(a, ((0, Mp - M), (0, 0)))
    out = pl.pallas_call(
        functools.partial(_linear_kernel, activation=activation),
        out_shape=jax.ShapeDtypeStruct((Mp, N), jnp.float32),
        grid=(Mp // tm,),
        in_specs=[
            pl.BlockSpec((tm, K), lambda i: (i, 0)),
            pl.BlockSpec((K, N), lambda i: (0, 0)),     # weight stays resident
            pl.BlockSpec((1, N), lambda i: (0, 0)),
        ],
        out_specs=pl.BlockSpec((tm, N), lambda i: (i, 0)),
        compiler_params=pltpu.CompilerParams(
            dimension_semantics=("parallel",),
            vmem_limit_bytes=_VMEM_LIMIT,
        ),
    )(a, w.astype(jnp.bfloat16), b.reshape(1, N).astype(jnp.float32))
    return out[:M] if Mp != M else out


# --------------------------------------------------------------------------
# Fused MultiViewCrossAttention kernel (per-batch grid, parallel)
#   Q proj -> [K|V] proj -> attention -> zo proj -> residual -> /num_views
#   -> adaptive avg pool (sublane reduce, lane-dense) -> fc1
# --------------------------------------------------------------------------
def _mca_kernel(xb_ref, xn_ref, wq_ref, bq_ref, wkv_ref, bkv_ref,
                wo_ref, bo_ref, wfc1_ref, bfc1_ref, o_ref, *,
                ch, num_views, scale):
    xb = xb_ref[0]                                                    # (A, C) bf16
    q = jnp.dot(xb, wq_ref[...], preferred_element_type=jnp.float32) + bq_ref[...]
    acc = xb.astype(jnp.float32)                                      # residual accumulator

    for n in range(xn_ref.shape[0]):                                  # static unroll over neighbor views
        xn = xn_ref[n, 0]                                             # (A, C) bf16
        kv = jnp.dot(xn, wkv_ref[...],
                     preferred_element_type=jnp.float32) + bkv_ref[...]   # (A, 2*Ch)
        k = kv[:, :ch]
        v = kv[:, ch:]
        # Q @ K^T contracting on D (no transpose of K needed), bf16 MXU / f32 acc.
        s = jax.lax.dot_general(
            q.astype(jnp.bfloat16), k.astype(jnp.bfloat16),
            dimension_numbers=(((1,), (1,)), ((), ())),
            preferred_element_type=jnp.float32) * scale               # (A, A)
        s = s - jnp.max(s, axis=-1, keepdims=True)
        p = jnp.exp(s)
        p = p * pl.reciprocal(jnp.sum(p, axis=-1, keepdims=True), approx=True)
        z = jnp.dot(p.astype(jnp.bfloat16), v.astype(jnp.bfloat16),
                    preferred_element_type=jnp.float32)               # (A, Ch)
        out = jnp.dot(z.astype(jnp.bfloat16), wo_ref[...],
                      preferred_element_type=jnp.float32) + bo_ref[...]  # (A, C)
        acc = acc + out

    acc = acc * (1.0 / num_views)
    pooled = jnp.mean(acc, axis=0, keepdims=True)                     # (1, C), sublane reduce
    fc = jnp.dot(pooled, wfc1_ref[...],
                 preferred_element_type=jnp.float32) + bfc1_ref[...]  # fc1 (f32, outside autocast)
    o_ref[0] = fc


def fused_mca(p, xb, xnbrs, num_views):
    """xb: (B, A, C) base view (channel-last), xnbrs: (Nn, B, A, C) neighbors."""
    B, A, C = xb.shape
    Nn = xnbrs.shape[0]
    Ch = p["wq"].shape[1]
    scale = 1.0 / (Ch ** 0.5)                     # d_k = Q.size(-1) in torch
    wkv = jnp.concatenate([p["wk"], p["wv"]], axis=1)      # fused K|V projection
    bkv = jnp.concatenate([p["bk"], p["bv"]])
    out = pl.pallas_call(
        functools.partial(_mca_kernel, ch=Ch, num_views=num_views, scale=scale),
        out_shape=jax.ShapeDtypeStruct((B, 1, C), jnp.float32),
        grid=(B,),
        in_specs=[
            pl.BlockSpec((1, A, C), lambda b: (b, 0, 0)),
            pl.BlockSpec((Nn, 1, A, C), lambda b: (0, b, 0, 0)),
            pl.BlockSpec((C, Ch), lambda b: (0, 0)),
            pl.BlockSpec((1, Ch), lambda b: (0, 0)),
            pl.BlockSpec((C, 2 * Ch), lambda b: (0, 0)),
            pl.BlockSpec((1, 2 * Ch), lambda b: (0, 0)),
            pl.BlockSpec((Ch, C), lambda b: (0, 0)),
            pl.BlockSpec((1, C), lambda b: (0, 0)),
            pl.BlockSpec((C, C), lambda b: (0, 0)),
            pl.BlockSpec((1, C), lambda b: (0, 0)),
        ],
        out_specs=pl.BlockSpec((1, 1, C), lambda b: (b, 0, 0)),
        compiler_params=pltpu.CompilerParams(
            dimension_semantics=("parallel",),
            vmem_limit_bytes=_VMEM_LIMIT,
        ),
    )(
        xb.astype(jnp.bfloat16),
        xnbrs.astype(jnp.bfloat16),
        p["wq"].astype(jnp.bfloat16), p["bq"].reshape(1, Ch).astype(jnp.float32),
        wkv.astype(jnp.bfloat16), bkv.reshape(1, 2 * Ch).astype(jnp.float32),
        p["wo"].astype(jnp.bfloat16), p["bo"].reshape(1, C).astype(jnp.float32),
        p["wfc1"].astype(jnp.float32), p["bfc1"].reshape(1, C).astype(jnp.float32),
    )
    return out.reshape(B, C)


# --------------------------------------------------------------------------
# Fused classifier head kernel: mean(a1,a2) -> fc1 -> fc2 -> {l,r} -> softmax
# --------------------------------------------------------------------------
def _head_kernel(a1_ref, a2_ref, wfc1, bfc1, wfc2, bfc2,
                 wl1, bl1, wl2, bl2, wr1, br1, wr2, br2, l_ref, r_ref):
    def _mm(x, w, b):
        return jnp.dot(x, w[...], preferred_element_type=jnp.float32) + b[...]

    def _softmax(s):
        s = s - jnp.max(s, axis=-1, keepdims=True)
        e = jnp.exp(s)
        return e / jnp.sum(e, axis=-1, keepdims=True)   # exact divide (final probs)

    x = (a1_ref[...] + a2_ref[...]) * 0.5               # torch.mean(stack, 0)
    x = jnp.maximum(_mm(x, wfc1, bfc1), 0.0)
    x = jnp.maximum(_mm(x, wfc2, bfc2), 0.0)
    lx = jnp.maximum(_mm(x, wl1, bl1), 0.0)
    rx = jnp.maximum(_mm(x, wr1, br1), 0.0)
    l_ref[...] = _softmax(_mm(lx, wl2, bl2))
    r_ref[...] = _softmax(_mm(rx, wr2, br2))


def fused_head(p, a1, a2):
    B = a1.shape[0]
    r1 = lambda b: b.reshape(1, -1).astype(jnp.float32)
    return pl.pallas_call(
        _head_kernel,
        out_shape=(jax.ShapeDtypeStruct((B, 5), jnp.float32),
                   jax.ShapeDtypeStruct((B, 5), jnp.float32)),
    )(
        a1.astype(jnp.float32), a2.astype(jnp.float32),
        p["wfc1"].astype(jnp.float32), r1(p["bfc1"]),
        p["wfc2"].astype(jnp.float32), r1(p["bfc2"]),
        p["wl1"].astype(jnp.float32), r1(p["bl1"]),
        p["wl2"].astype(jnp.float32), r1(p["bl2"]),
        p["wr1"].astype(jnp.float32), r1(p["br1"]),
        p["wr2"].astype(jnp.float32), r1(p["br2"]),
    )


# --------------------------------------------------------------------------
# im2col glue (channel-last directly; plain JAX layout plumbing)
# --------------------------------------------------------------------------
def im2col_spatial_cl(x, k, stride, pad):
    # x: (B, H, W, C) channel-last -> (B, Ho, Wo, k*k*C)
    B, H, W, C = x.shape
    xp = jnp.pad(x, ((0, 0), (pad, pad), (pad, pad), (0, 0)))
    Ho = (H + 2 * pad - k) // stride + 1
    Wo = (W + 2 * pad - k) // stride + 1
    cols = [xp[:, i:i + stride * Ho:stride, j:j + stride * Wo:stride, :]
            for i in range(k) for j in range(k)]
    return jnp.concatenate(cols, axis=-1), Ho, Wo


def im2col_temporal_cl(x, k, stride, pad):
    # x: (N, T, H, W, C) channel-last -> (N, To, H, W, k*C)
    N, T, H, W, C = x.shape
    xp = jnp.pad(x, ((0, 0), (pad, pad), (0, 0), (0, 0), (0, 0)))
    To = (T + 2 * pad - k) // stride + 1
    cols = [xp[:, i:i + stride * To:stride] for i in range(k)]
    return jnp.concatenate(cols, axis=-1), To


# --------------------------------------------------------------------------
# Backbone stand-in (see TODO(synk) at the top) -- convs run in the Pallas
# tiled linear kernel over channel-last im2col patches.
# --------------------------------------------------------------------------
def backbone_r2p1d(p, v):
    # v: (N, 3, T, H, W) -> (N, 256, T', H', W')
    N, C, T, H, W = v.shape
    mid = p["w_spatial"].shape[1]
    cout = p["w_temporal"].shape[1]
    # channel-last once; spatial (1,3,3) conv, stride (1,2,2), pad 1
    x = jnp.transpose(v, (0, 2, 3, 4, 1)).reshape(N * T, H, W, C)
    patches, Ho, Wo = im2col_spatial_cl(x, 3, 2, 1)            # (N*T, Ho, Wo, 9*C)
    y = linear(patches.reshape(-1, patches.shape[-1]),
               p["w_spatial"], p["b_spatial"], "relu")
    y = y.reshape(N, T, Ho, Wo, mid)                           # already channel-last
    # temporal (3,1,1) conv, stride (2,1,1), pad 1
    tpatches, To = im2col_temporal_cl(y, 3, 2, 1)              # (N, To, Ho, Wo, 3*mid)
    z = linear(tpatches.reshape(-1, tpatches.shape[-1]),
               p["w_temporal"], p["b_temporal"], "relu")
    z = z.reshape(N, To, Ho, Wo, cout)
    return jnp.transpose(z, (0, 4, 1, 2, 3))                   # (N, 256, To, Ho, Wo)


# --------------------------------------------------------------------------
# FeetNet forward
# --------------------------------------------------------------------------
def feetnet_forward(params, v1, v2):
    # Batch the two backbone passes into one call (same weights in the stand-in).
    N = v1.shape[0]
    feats = backbone_r2p1d(params["backbone"], jnp.concatenate([v1, v2], axis=0))
    pov1_maps, pov2_maps = feats[:N], feats[N:]
    Cc, To, Hp, Wp = pov1_maps.shape[1:]
    # Raw reshape (-1, C, H, W), exactly like torch.reshape (row-major).
    pov1 = pov1_maps.reshape(-1, Cc, Hp, Wp)
    pov2 = pov2_maps.reshape(-1, Cc, Hp, Wp)
    B = pov1.shape[0]
    area = Hp * Wp
    # Channel-last flattened views for the fused MCA kernels (small tensors).
    x1 = jnp.transpose(pov1, (0, 2, 3, 1)).reshape(B, area, Cc)
    x2 = jnp.transpose(pov2, (0, 2, 3, 1)).reshape(B, area, Cc)

    a1 = fused_mca(params["mca1"], x1, x2[None], 2)            # base view 0
    a2 = fused_mca(params["mca2"], x2, x1[None], 2)            # base view 1

    l_scores, r_scores = fused_head(params, a1, a2)
    return l_scores.reshape(1, B, 5), r_scores.reshape(1, B, 5)


# --------------------------------------------------------------------------
# Deterministic synthetic parameters
# --------------------------------------------------------------------------
def init_params(key):
    keys = iter(jax.random.split(key, 64))

    def lin(kin, kout):
        s = 1.0 / (kin ** 0.5)
        w = jax.random.normal(next(keys), (kin, kout), jnp.float32) * s
        b = jax.random.normal(next(keys), (kout,), jnp.float32) * 0.01
        return w, b

    mid = 128                                   # lane-dense spatial-conv output
    ws, bs = lin(3 * 9, mid)
    wt, bt = lin(mid * 3, 256)
    backbone = dict(w_spatial=ws, b_spatial=bs, w_temporal=wt, b_temporal=bt)

    def mca():
        wq, bq = lin(256, 128)
        wk, bk = lin(256, 128)
        wv, bv = lin(256, 128)
        wo, bo = lin(128, 256)
        wf, bf = lin(256, 256)
        return dict(wq=wq, bq=bq, wk=wk, bk=bk, wv=wv, bv=bv,
                    wo=wo, bo=bo, wfc1=wf, bfc1=bf)

    params = dict(backbone=backbone, mca1=mca(), mca2=mca())
    params["wfc1"], params["bfc1"] = lin(256, 256)
    params["wfc2"], params["bfc2"] = lin(256, 128)
    params["wl1"], params["bl1"] = lin(128, 32)
    params["wl2"], params["bl2"] = lin(32, 5)
    params["wr1"], params["br1"] = lin(128, 32)
    params["wr2"], params["br2"] = lin(32, 5)
    return params


if __name__ == "__main__":
    key = jax.random.PRNGKey(0)
    kp, k1, k2 = jax.random.split(key, 3)
    params = init_params(kp)
    # Small video inputs: (N=1, C=3, T=4, H=16, W=16) -> features (1, 256, 2, 8, 8)
    v1 = jax.random.normal(k1, (1, 3, 4, 16, 16), jnp.float32)
    v2 = jax.random.normal(k2, (1, 3, 4, 16, 16), jnp.float32)

    l_scores, r_scores = jax.jit(feetnet_forward)(params, v1, v2)
    jax.block_until_ready((l_scores, r_scores))

    assert l_scores.shape == (1, 2, 5) and r_scores.shape == (1, 2, 5)
    assert jnp.allclose(jnp.sum(l_scores, axis=-1), 1.0, atol=1e-4)
    assert jnp.allclose(jnp.sum(r_scores, axis=-1), 1.0, atol=1e-4)
    print("KERNEL_OK")
</pallas_src>

<mosaic_0001>
module attributes {stable_mosaic.version = 11 : i64} {
  func.func @_linear_kernel(%arg0: i32, %arg1: memref<512x27xbf16, #tpu.memory_space<vmem>>, %arg2: memref<27x128xbf16, #tpu.memory_space<vmem>>, %arg3: memref<1x128xf32, #tpu.memory_space<vmem>>, %arg4: memref<512x128xf32, #tpu.memory_space<vmem>>) attributes {dimension_semantics = [#tpu.dimension_semantics<parallel>], iteration_bounds = array<i64: 1>, scalar_prefetch = 0 : i64, scratch_operands = 0 : i64, tpu.core_type = #tpu.core_type<tc>, window_params = [{transform_indices = @transform_0, window_bounds = array<i64: 512, 27>}, {pipeline_mode = #tpu.pipeline_mode<synchronous>, transform_indices = @transform_1, window_bounds = array<i64: 27, 128>}, {pipeline_mode = #tpu.pipeline_mode<synchronous>, transform_indices = @transform_2, window_bounds = array<i64: 1, 128>}, {transform_indices = @transform_3, window_bounds = array<i64: 512, 128>}]} {
    %c0 = arith.constant 0 : index
    %c0_0 = arith.constant 0 : index
    %0 = vector.load %arg1[%c0, %c0_0] : memref<512x27xbf16, #tpu.memory_space<vmem>>, vector<512x27xbf16>
    %c0_1 = arith.constant 0 : index
    %c0_2 = arith.constant 0 : index
    %1 = vector.load %arg2[%c0_1, %c0_2] : memref<27x128xbf16, #tpu.memory_space<vmem>>, vector<27x128xbf16>
    %cst = arith.constant dense<0.000000e+00> : vector<512x128xf32>
    %2 = tpu.matmul %0, %1, %cst {dimension_numbers = #tpu.dot_dimension_numbers<[1], [0], [0], [1], [0, 0, 1, 1], [], []>} : vector<512x27xbf16>, vector<27x128xbf16>, vector<512x128xf32> -> vector<512x128xf32>
    %c0_3 = arith.constant 0 : index
    %c0_4 = arith.constant 0 : index
    %3 = vector.load %arg3[%c0_3, %c0_4] : memref<1x128xf32, #tpu.memory_space<vmem>>, vector<1x128xf32>
    %4 = vector.broadcast %3 : vector<1x128xf32> to vector<512x128xf32>
    %5 = arith.addf %2, %4 : vector<512x128xf32>
    %cst_5 = arith.constant 0.000000e+00 : f32
    %6 = vector.broadcast %cst_5 : f32 to vector<512x128xf32>
    %7 = arith.maximumf %5, %6 : vector<512x128xf32>
    %c0_6 = arith.constant 0 : index
    %c0_7 = arith.constant 0 : index
    %8 = vector.load %arg4[%c0_6, %c0_7] : memref<512x128xf32, #tpu.memory_space<vmem>>, vector<512x128xf32>
    tpu.vector_store %arg4[%c0_6, %c0_7], %7 {strides = array<i32>} : memref<512x128xf32, #tpu.memory_space<vmem>>, vector<512x128xf32>,
    return
  }
  func.func @transform_0(%arg0: i32) -> (i32, i32) {
    %c0_i32 = arith.constant 0 : i32
    %c0_i32_0 = arith.constant 0 : i32
    return %arg0, %c0_i32 : i32, i32
  }
  func.func @transform_1(%arg0: i32) -> (i32, i32) {
    %c0_i32 = arith.constant 0 : i32
    %c0_i32_0 = arith.constant 0 : i32
    %c0_i32_1 = arith.constant 0 : i32
    return %c0_i32, %c0_i32_0 : i32, i32
  }
  func.func @transform_2(%arg0: i32) -> (i32, i32) {
    %c0_i32 = arith.constant 0 : i32
    %c0_i32_0 = arith.constant 0 : i32
    %c0_i32_1 = arith.constant 0 : i32
    return %c0_i32, %c0_i32_0 : i32, i32
  }
  func.func @transform_3(%arg0: i32) -> (i32, i32) {
    %c0_i32 = arith.constant 0 : i32
    %c0_i32_0 = arith.constant 0 : i32
    return %arg0, %c0_i32 : i32, i32
  }
}

module attributes {stable_mosaic.version = 11 : i64} {
  func.func @_linear_kernel(%arg0: i32, %arg1: memref<256x384xbf16, #tpu.memory_space<vmem>>, %arg2: memref<384x256xbf16, #tpu.memory_space<vmem>>, %arg3: memref<1x256xf32, #tpu.memory_space<vmem>>, %arg4: memref<256x256xf32, #tpu.memory_space<vmem>>) attributes {dimension_semantics = [#tpu.dimension_semantics<parallel>], iteration_bounds = array<i64: 1>, scalar_prefetch = 0 : i64, scratch_operands = 0 : i64, tpu.core_type = #tpu.core_type<tc>, window_params = [{transform_indices = @transform_0, window_bounds = array<i64: 256, 384>}, {pipeline_mode = #tpu.pipeline_mode<synchronous>, transform_indices = @transform_1, window_bounds = array<i64: 384, 256>}, {pipeline_mode = #tpu.pipeline_mode<synchronous>, transform_indices = @transform_2, window_bounds = array<i64: 1, 256>}, {transform_indices = @transform_3, window_bounds = array<i64: 256, 256>}]} {
    %c0 = arith.constant 0 : index
    %c0_0 = arith.constant 0 : index
    %0 = vector.load %arg1[%c0, %c0_0] : memref<256x384xbf16, #tpu.memory_space<vmem>>, vector<256x384xbf16>
    %c0_1 = arith.constant 0 : index
    %c0_2 = arith.constant 0 : index
    %1 = vector.load %arg2[%c0_1, %c0_2] : memref<384x256xbf16, #tpu.memory_space<vmem>>, vector<384x256xbf16>
    %cst = arith.constant dense<0.000000e+00> : vector<256x256xf32>
    %2 = tpu.matmul %0, %1, %cst {dimension_numbers = #tpu.dot_dimension_numbers<[1], [0], [0], [1], [0, 0, 1, 1], [], []>} : vector<256x384xbf16>, vector<384x256xbf16>, vector<256x256xf32> -> vector<256x256xf32>
    %c0_3 = arith.constant 0 : index
    %c0_4 = arith.constant 0 : index
    %3 = vector.load %arg3[%c0_3, %c0_4] : memref<1x256xf32, #tpu.memory_space<vmem>>, vector<1x256xf32>
    %4 = vector.broadcast %3 : vector<1x256xf32> to vector<256x256xf32>
    %5 = arith.addf %2, %4 : vector<256x256xf32>
    %cst_5 = arith.constant 0.000000e+00 : f32
    %6 = vector.broadcast %cst_5 : f32 to vector<256x256xf32>
    %7 = arith.maximumf %5, %6 : vector<256x256xf32>
    %c0_6 = arith.constant 0 : index
    %c0_7 = arith.constant 0 : index
    %8 = vector.load %arg4[%c0_6, %c0_7] : memref<256x256xf32, #tpu.memory_space<vmem>>, vector<256x256xf32>
    tpu.vector_store %arg4[%c0_6, %c0_7], %7 {strides = array<i32>} : memref<256x256xf32, #tpu.memory_space<vmem>>, vector<256x256xf32>,
    return
  }
  func.func @transform_0(%arg0: i32) -> (i32, i32) {
    %c0_i32 = arith.constant 0 : i32
    %c0_i32_0 = arith.constant 0 : i32
    return %arg0, %c0_i32 : i32, i32
  }
  func.func @transform_1(%arg0: i32) -> (i32, i32) {
    %c0_i32 = arith.constant 0 : i32
    %c0_i32_0 = arith.constant 0 : i32
    %c0_i32_1 = arith.constant 0 : i32
    return %c0_i32, %c0_i32_0 : i32, i32
  }
  func.func @transform_2(%arg0: i32) -> (i32, i32) {
    %c0_i32 = arith.constant 0 : i32
    %c0_i32_0 = arith.constant 0 : i32
    %c0_i32_1 = arith.constant 0 : i32
    return %c0_i32, %c0_i32_0 : i32, i32
  }
  func.func @transform_3(%arg0: i32) -> (i32, i32) {
    %c0_i32 = arith.constant 0 : i32
    %c0_i32_0 = arith.constant 0 : i32
    return %arg0, %c0_i32 : i32, i32
  }
}

module attributes {stable_mosaic.version = 11 : i64} {
  func.func @_mca_kernel(%arg0: i32, %arg1: memref<1x64x256xbf16, #tpu.memory_space<vmem>>, %arg2: memref<1x1x64x256xbf16, #tpu.memory_space<vmem>>, %arg3: memref<256x128xbf16, #tpu.memory_space<vmem>>, %arg4: memref<1x128xf32, #tpu.memory_space<vmem>>, %arg5: memref<256x256xbf16, #tpu.memory_space<vmem>>, %arg6: memref<1x256xf32, #tpu.memory_space<vmem>>, %arg7: memref<128x256xbf16, #tpu.memory_space<vmem>>, %arg8: memref<1x256xf32, #tpu.memory_space<vmem>>, %arg9: memref<256x256xf32, #tpu.memory_space<vmem>>, %arg10: memref<1x256xf32, #tpu.memory_space<vmem>>, %arg11: memref<1x1x256xf32, #tpu.memory_space<vmem>>) attributes {dimension_semantics = [#tpu.dimension_semantics<parallel>], iteration_bounds = array<i64: 2>, scalar_prefetch = 0 : i64, scratch_operands = 0 : i64, tpu.core_type = #tpu.core_type<tc>, window_params = [{transform_indices = @transform_0, window_bounds = array<i64: 1, 64, 256>}, {transform_indices = @transform_1, window_bounds = array<i64: 1, 1, 64, 256>}, {pipeline_mode = #tpu.pipeline_mode<synchronous>, transform_indices = @transform_2, window_bounds = array<i64: 256, 128>}, {pipeline_mode = #tpu.pipeline_mode<synchronous>, transform_indices = @transform_3, window_bounds = array<i64: 1, 128>}, {pipeline_mode = #tpu.pipeline_mode<synchronous>, transform_indices = @transform_4, window_bounds = array<i64: 256, 256>}, {pipeline_mode = #tpu.pipeline_mode<synchronous>, transform_indices = @transform_5, window_bounds = array<i64: 1, 256>}, {pipeline_mode = #tpu.pipeline_mode<synchronous>, transform_indices = @transform_6, window_bounds = array<i64: 128, 256>}, {pipeline_mode = #tpu.pipeline_mode<synchronous>, transform_indices = @transform_7, window_bounds = array<i64: 1, 256>}, {pipeline_mode = #tpu.pipeline_mode<synchronous>, transform_indices = @transform_8, window_bounds = array<i64: 256, 256>}, {pipeline_mode = #tpu.pipeline_mode<synchronous>, transform_indices = @transform_9, window_bounds = array<i64: 1, 256>}, {transform_indices = @transform_10, window_bounds = array<i64: 1, 1, 256>}]} {
    %c0 = arith.constant 0 : index
    %c0_0 = arith.constant 0 : index
    %c0_1 = arith.constant 0 : index
    %0 = vector.load %arg1[%c0, %c0_0, %c0_1] : memref<1x64x256xbf16, #tpu.memory_space<vmem>>, vector<1x64x256xbf16>
    %1 = vector.shape_cast %0 : vector<1x64x256xbf16> to vector<64x256xbf16>
    %c0_2 = arith.constant 0 : index
    %c0_3 = arith.constant 0 : index
    %2 = vector.load %arg3[%c0_2, %c0_3] : memref<256x128xbf16, #tpu.memory_space<vmem>>, vector<256x128xbf16>
    %cst = arith.constant dense<0.000000e+00> : vector<64x128xf32>
    %3 = tpu.matmul %1, %2, %cst {dimension_numbers = #tpu.dot_dimension_numbers<[1], [0], [0], [1], [0, 0, 1, 1], [], []>} : vector<64x256xbf16>, vector<256x128xbf16>, vector<64x128xf32> -> vector<64x128xf32>
    %c0_4 = arith.constant 0 : index
    %c0_5 = arith.constant 0 : index
    %4 = vector.load %arg4[%c0_4, %c0_5] : memref<1x128xf32, #tpu.memory_space<vmem>>, vector<1x128xf32>
    %5 = vector.broadcast %4 : vector<1x128xf32> to vector<64x128xf32>
    %6 = arith.addf %3, %5 : vector<64x128xf32>
    %7 = arith.extf %1 : vector<64x256xbf16> to vector<64x256xf32>
    %c0_6 = arith.constant 0 : index
    %c0_7 = arith.constant 0 : index
    %c0_8 = arith.constant 0 : index
    %c0_9 = arith.constant 0 : index
    %8 = vector.load %arg2[%c0_6, %c0_7, %c0_8, %c0_9] : memref<1x1x64x256xbf16, #tpu.memory_space<vmem>>, vector<1x1x64x256xbf16>
    %9 = vector.shape_cast %8 : vector<1x1x64x256xbf16> to vector<64x256xbf16>
    %c0_10 = arith.constant 0 : index
    %c0_11 = arith.constant 0 : index
    %10 = vector.load %arg5[%c0_10, %c0_11] : memref<256x256xbf16, #tpu.memory_space<vmem>>, vector<256x256xbf16>
    %cst_12 = arith.constant dense<0.000000e+00> : vector<64x256xf32>
    %11 = tpu.matmul %9, %10, %cst_12 {dimension_numbers = #tpu.dot_dimension_numbers<[1], [0], [0], [1], [0, 0, 1, 1], [], []>} : vector<64x256xbf16>, vector<256x256xbf16>, vector<64x256xf32> -> vector<64x256xf32>
    %c0_13 = arith.constant 0 : index
    %c0_14 = arith.constant 0 : index
    %12 = vector.load %arg6[%c0_13, %c0_14] : memref<1x256xf32, #tpu.memory_space<vmem>>, vector<1x256xf32>
    %13 = vector.broadcast %12 : vector<1x256xf32> to vector<64x256xf32>
    %14 = arith.addf %11, %13 : vector<64x256xf32>
    %15 = vector.extract_strided_slice %14 {offsets = [0, 0], sizes = [64, 128], strides = [1, 1]} : vector<64x256xf32> to vector<64x128xf32>
    %16 = vector.extract_strided_slice %14 {offsets = [0, 128], sizes = [64, 128], strides = [1, 1]} : vector<64x256xf32> to vector<64x128xf32>
    %17 = arith.truncf %6 : vector<64x128xf32> to vector<64x128xbf16>
    %18 = arith.truncf %15 : vector<64x128xf32> to vector<64x128xbf16>
    %cst_15 = arith.constant dense<0.000000e+00> : vector<64x64xf32>
    %19 = tpu.matmul %17, %18, %cst_15 {dimension_numbers = #tpu.dot_dimension_numbers<[1], [1], [0], [0], [0, 0, 1, 0], [], []>} : vector<64x128xbf16>, vector<64x128xbf16>, vector<64x64xf32> -> vector<64x64xf32>
    %cst_16 = arith.constant 0.0883883461 : f32
    %20 = vector.broadcast %cst_16 : f32 to vector<64x64xf32>
    %21 = arith.mulf %19, %20 : vector<64x64xf32>
    %cst_17 = arith.constant dense<0xFF800000> : vector<64xf32>
    %22 = vector.multi_reduction <maximumf>, %21, %cst_17 [1] : vector<64x64xf32> to vector<64xf32>
    %23 = vector.shape_cast %22 : vector<64xf32> to vector<64x1xf32>
    %24 = vector.broadcast %23 : vector<64x1xf32> to vector<64x64xf32>
    %25 = arith.subf %21, %24 : vector<64x64xf32>
    %26 = math.exp %25 : vector<64x64xf32>
    %cst_18 = arith.constant dense<0.000000e+00> : vector<64xf32>
    %27 = vector.multi_reduction <add>, %26, %cst_18 [1] : vector<64x64xf32> to vector<64xf32>
    %28 = vector.shape_cast %27 : vector<64xf32> to vector<64x1xf32>
    %29 = tpu.reciprocal %28 {approx = true} : vector<64x1xf32> -> vector<64x1xf32>
    %30 = vector.broadcast %29 : vector<64x1xf32> to vector<64x64xf32>
    %31 = arith.mulf %26, %30 : vector<64x64xf32>
    %32 = arith.truncf %31 : vector<64x64xf32> to vector<64x64xbf16>
    %33 = arith.truncf %16 : vector<64x128xf32> to vector<64x128xbf16>
    %cst_19 = arith.constant dense<0.000000e+00> : vector<64x128xf32>
    %34 = tpu.matmul %32, %33, %cst_19 {dimension_numbers = #tpu.dot_dimension_numbers<[1], [0], [0], [1], [0, 0, 1, 1], [], []>} : vector<64x64xbf16>, vector<64x128xbf16>, vector<64x128xf32> -> vector<64x128xf32>
    %35 = arith.truncf %34 : vector<64x128xf32> to vector<64x128xbf16>
    %c0_20 = arith.constant 0 : index
    %c0_21 = arith.constant 0 : index
    %36 = vector.load %arg7[%c0_20, %c0_21] : memref<128x256xbf16, #tpu.memory_space<vmem>>, vector<128x256xbf16>
    %cst_22 = arith.constant dense<0.000000e+00> : vector<64x256xf32>
    %37 = tpu.matmul %35, %36, %cst_22 {dimension_numbers = #tpu.dot_dimension_numbers<[1], [0], [0], [1], [0, 0, 1, 1], [], []>} : vector<64x128xbf16>, vector<128x256xbf16>, vector<64x256xf32> -> vector<64x256xf32>
    %c0_23 = arith.constant 0 : index
    %c0_24 = arith.constant 0 : index
    %38 = vector.load %arg8[%c0_23, %c0_24] : memref<1x256xf32, #tpu.memory_space<vmem>>, vector<1x256xf32>
    %39 = vector.broadcast %38 : vector<1x256xf32> to vector<64x256xf32>
    %40 = arith.addf %37, %39 : vector<64x256xf32>
    %41 = arith.addf %7, %40 : vector<64x256xf32>
    %cst_25 = arith.constant 5.000000e-01 : f32
    %42 = vector.broadcast %cst_25 : f32 to vector<64x256xf32>
    %43 = arith.mulf %41, %42 : vector<64x256xf32>
    %cst_26 = arith.constant dense<0.000000e+00> : vector<256xf32>
    %44 = vector.multi_reduction <add>, %43, %cst_26 [0] : vector<64x256xf32> to vector<256xf32>
    %45 = vector.shape_cast %44 : vector<256xf32> to vector<1x256xf32>
    %cst_27 = arith.constant 6.400000e+01 : f32
    %46 = vector.broadcast %cst_27 : f32 to vector<1x256xf32>
    %47 = arith.divf %45, %46 : vector<1x256xf32>
    %c0_28 = arith.constant 0 : index
    %c0_29 = arith.constant 0 : index
    %48 = vector.load %arg9[%c0_28, %c0_29] : memref<256x256xf32, #tpu.memory_space<vmem>>, vector<256x256xf32>
    %cst_30 = arith.constant dense<0.000000e+00> : vector<1x256xf32>
    %49 = tpu.matmul %47, %48, %cst_30 {dimension_numbers = #tpu.dot_dimension_numbers<[1], [0], [0], [1], [0, 0, 1, 1], [], []>} : vector<1x256xf32>, vector<256x256xf32>, vector<1x256xf32> -> vector<1x256xf32>
    %c0_31 = arith.constant 0 : index
    %c0_32 = arith.constant 0 : index
    %50 = vector.load %arg10[%c0_31, %c0_32] : memref<1x256xf32, #tpu.memory_space<vmem>>, vector<1x256xf32>
    %51 = arith.addf %49, %50 : vector<1x256xf32>
    %c0_33 = arith.constant 0 : index
    %c0_34 = arith.constant 0 : index
    %c0_35 = arith.constant 0 : index
    %52 = vector.load %arg11[%c0_33, %c0_34, %c0_35] : memref<1x1x256xf32, #tpu.memory_space<vmem>>, vector<1x1x256xf32>
    %53 = vector.shape_cast %52 : vector<1x1x256xf32> to vector<1x256xf32>
    %54 = vector.shape_cast %51 : vector<1x256xf32> to vector<1x1x256xf32>
    tpu.vector_store %arg11[%c0_33, %c0_34, %c0_35], %54 {strides = array<i32>} : memref<1x1x256xf32, #tpu.memory_space<vmem>>, vector<1x1x256xf32>,
    return
  }
  func.func @transform_0(%arg0: i32) -> (i32, i32, i32) {
    %c0_i32 = arith.constant 0 : i32
    %c0_i32_0 = arith.constant 0 : i32
    %c0_i32_1 = arith.constant 0 : i32
    return %arg0, %c0_i32, %c0_i32_0 : i32, i32, i32
  }
  func.func @transform_1(%arg0: i32) -> (i32, i32, i32, i32) {
    %c0_i32 = arith.constant 0 : i32
    %c0_i32_0 = arith.constant 0 : i32
    %c0_i32_1 = arith.constant 0 : i32
    %c0_i32_2 = arith.constant 0 : i32
    return %c0_i32, %arg0, %c0_i32_0, %c0_i32_1 : i32, i32, i32, i32
  }
  func.func @transform_2(%arg0: i32) -> (i32, i32) {
    %c0_i32 = arith.constant 0 : i32
    %c0_i32_0 = arith.constant 0 : i32
    %c0_i32_1 = arith.constant 0 : i32
    return %c0_i32, %c0_i32_0 : i32, i32
  }
  func.func @transform_3(%arg0: i32) -> (i32, i32) {
    %c0_i32 = arith.constant 0 : i32
    %c0_i32_0 = arith.constant 0 : i32
    %c0_i32_1 = arith.constant 0 : i32
    return %c0_i32, %c0_i32_0 : i32, i32
  }
  func.func @transform_4(%arg0: i32) -> (i32, i32) {
    %c0_i32 = arith.constant 0 : i32
    %c0_i32_0 = arith.constant 0 : i32
    %c0_i32_1 = arith.constant 0 : i32
    return %c0_i32, %c0_i32_0 : i32, i32
  }
  func.func @transform_5(%arg0: i32) -> (i32, i32) {
    %c0_i32 = arith.constant 0 : i32
    %c0_i32_0 = arith.constant 0 : i32
    %c0_i32_1 = arith.constant 0 : i32
    return %c0_i32, %c0_i32_0 : i32, i32
  }
  func.func @transform_6(%arg0: i32) -> (i32, i32) {
    %c0_i32 = arith.constant 0 : i32
    %c0_i32_0 = arith.constant 0 : i32
    %c0_i32_1 = arith.constant 0 : i32
    return %c0_i32, %c0_i32_0 : i32, i32
  }
  func.func @transform_7(%arg0: i32) -> (i32, i32) {
    %c0_i32 = arith.constant 0 : i32
    %c0_i32_0 = arith.constant 0 : i32
    %c0_i32_1 = arith.constant 0 : i32
    return %c0_i32, %c0_i32_0 : i32, i32
  }
  func.func @transform_8(%arg0: i32) -> (i32, i32) {
    %c0_i32 = arith.constant 0 : i32
    %c0_i32_0 = arith.constant 0 : i32
    %c0_i32_1 = arith.constant 0 : i32
    return %c0_i32, %c0_i32_0 : i32, i32
  }
  func.func @transform_9(%arg0: i32) -> (i32, i32) {
    %c0_i32 = arith.constant 0 : i32
    %c0_i32_0 = arith.constant 0 : i32
    %c0_i32_1 = arith.constant 0 : i32
    return %c0_i32, %c0_i32_0 : i32, i32
  }
  func.func @transform_10(%arg0: i32) -> (i32, i32, i32) {
    %c0_i32 = arith.constant 0 : i32
    %c0_i32_0 = arith.constant 0 : i32
    %c0_i32_1 = arith.constant 0 : i32
    return %arg0, %c0_i32, %c0_i32_0 : i32, i32, i32
  }
}

module attributes {stable_mosaic.version = 11 : i64} {
  func.func @_head_kernel(%arg0: memref<2x256xf32, #tpu.memory_space<vmem>>, %arg1: memref<2x256xf32, #tpu.memory_space<vmem>>, %arg2: memref<256x256xf32, #tpu.memory_space<vmem>>, %arg3: memref<1x256xf32, #tpu.memory_space<vmem>>, %arg4: memref<256x128xf32, #tpu.memory_space<vmem>>, %arg5: memref<1x128xf32, #tpu.memory_space<vmem>>, %arg6: memref<128x32xf32, #tpu.memory_space<vmem>>, %arg7: memref<1x32xf32, #tpu.memory_space<vmem>>, %arg8: memref<32x5xf32, #tpu.memory_space<vmem>>, %arg9: memref<1x5xf32, #tpu.memory_space<vmem>>, %arg10: memref<128x32xf32, #tpu.memory_space<vmem>>, %arg11: memref<1x32xf32, #tpu.memory_space<vmem>>, %arg12: memref<32x5xf32, #tpu.memory_space<vmem>>, %arg13: memref<1x5xf32, #tpu.memory_space<vmem>>, %arg14: memref<2x5xf32, #tpu.memory_space<vmem>>, %arg15: memref<2x5xf32, #tpu.memory_space<vmem>>) attributes {dimension_semantics = [], scalar_prefetch = 0 : i64, scratch_operands = 0 : i64, tpu.core_type = #tpu.core_type<tc>} {
    %c0 = arith.constant 0 : index
    %c0_0 = arith.constant 0 : index
    %0 = vector.load %arg0[%c0, %c0_0] : memref<2x256xf32, #tpu.memory_space<vmem>>, vector<2x256xf32>
    %c0_1 = arith.constant 0 : index
    %c0_2 = arith.constant 0 : index
    %1 = vector.load %arg1[%c0_1, %c0_2] : memref<2x256xf32, #tpu.memory_space<vmem>>, vector<2x256xf32>
    %2 = arith.addf %0, %1 : vector<2x256xf32>
    %cst = arith.constant 5.000000e-01 : f32
    %3 = vector.broadcast %cst : f32 to vector<2x256xf32>
    %4 = arith.mulf %2, %3 : vector<2x256xf32>
    %c0_3 = arith.constant 0 : index
    %c0_4 = arith.constant 0 : index
    %5 = vector.load %arg2[%c0_3, %c0_4] : memref<256x256xf32, #tpu.memory_space<vmem>>, vector<256x256xf32>
    %cst_5 = arith.constant dense<0.000000e+00> : vector<2x256xf32>
    %6 = tpu.matmul %4, %5, %cst_5 {dimension_numbers = #tpu.dot_dimension_numbers<[1], [0], [0], [1], [0, 0, 1, 1], [], []>} : vector<2x256xf32>, vector<256x256xf32>, vector<2x256xf32> -> vector<2x256xf32>
    %c0_6 = arith.constant 0 : index
    %c0_7 = arith.constant 0 : index
    %7 = vector.load %arg3[%c0_6, %c0_7] : memref<1x256xf32, #tpu.memory_space<vmem>>, vector<1x256xf32>
    %8 = vector.broadcast %7 : vector<1x256xf32> to vector<2x256xf32>
    %9 = arith.addf %6, %8 : vector<2x256xf32>
    %cst_8 = arith.constant 0.000000e+00 : f32
    %10 = vector.broadcast %cst_8 : f32 to vector<2x256xf32>
    %11 = arith.maximumf %9, %10 : vector<2x256xf32>
    %c0_9 = arith.constant 0 : index
    %c0_10 = arith.constant 0 : index
    %12 = vector.load %arg4[%c0_9, %c0_10] : memref<256x128xf32, #tpu.memory_space<vmem>>, vector<256x128xf32>
    %cst_11 = arith.constant dense<0.000000e+00> : vector<2x128xf32>
    %13 = tpu.matmul %11, %12, %cst_11 {dimension_numbers = #tpu.dot_dimension_numbers<[1], [0], [0], [1], [0, 0, 1, 1], [], []>} : vector<2x256xf32>, vector<256x128xf32>, vector<2x128xf32> -> vector<2x128xf32>
    %c0_12 = arith.constant 0 : index
    %c0_13 = arith.constant 0 : index
    %14 = vector.load %arg5[%c0_12, %c0_13] : memref<1x128xf32, #tpu.memory_space<vmem>>, vector<1x128xf32>
    %15 = vector.broadcast %14 : vector<1x128xf32> to vector<2x128xf32>
    %16 = arith.addf %13, %15 : vector<2x128xf32>
    %cst_14 = arith.constant 0.000000e+00 : f32
    %17 = vector.broadcast %cst_14 : f32 to vector<2x128xf32>
    %18 = arith.maximumf %16, %17 : vector<2x128xf32>
    %c0_15 = arith.constant 0 : index
    %c0_16 = arith.constant 0 : index
    %19 = vector.load %arg6[%c0_15, %c0_16] : memref<128x32xf32, #tpu.memory_space<vmem>>, vector<128x32xf32>
    %cst_17 = arith.constant dense<0.000000e+00> : vector<2x32xf32>
    %20 = tpu.matmul %18, %19, %cst_17 {dimension_numbers = #tpu.dot_dimension_numbers<[1], [0], [0], [1], [0, 0, 1, 1], [], []>} : vector<2x128xf32>, vector<128x32xf32>, vector<2x32xf32> -> vector<2x32xf32>
    %c0_18 = arith.constant 0 : index
    %c0_19 = arith.constant 0 : index
    %21 = vector.load %arg7[%c0_18, %c0_19] : memref<1x32xf32, #tpu.memory_space<vmem>>, vector<1x32xf32>
    %22 = vector.broadcast %21 : vector<1x32xf32> to vector<2x32xf32>
    %23 = arith.addf %20, %22 : vector<2x32xf32>
    %cst_20 = arith.constant 0.000000e+00 : f32
    %24 = vector.broadcast %cst_20 : f32 to vector<2x32xf32>
    %25 = arith.maximumf %23, %24 : vector<2x32xf32>
    %c0_21 = arith.constant 0 : index
    %c0_22 = arith.constant 0 : index
    %26 = vector.load %arg10[%c0_21, %c0_22] : memref<128x32xf32, #tpu.memory_space<vmem>>, vector<128x32xf32>
    %cst_23 = arith.constant dense<0.000000e+00> : vector<2x32xf32>
    %27 = tpu.matmul %18, %26, %cst_23 {dimension_numbers = #tpu.dot_dimension_numbers<[1], [0], [0], [1], [0, 0, 1, 1], [], []>} : vector<2x128xf32>, vector<128x32xf32>, vector<2x32xf32> -> vector<2x32xf32>
    %c0_24 = arith.constant 0 : index
    %c0_25 = arith.constant 0 : index
    %28 = vector.load %arg11[%c0_24, %c0_25] : memref<1x32xf32, #tpu.memory_space<vmem>>, vector<1x32xf32>
    %29 = vector.broadcast %28 : vector<1x32xf32> to vector<2x32xf32>
    %30 = arith.addf %27, %29 : vector<2x32xf32>
    %cst_26 = arith.constant 0.000000e+00 : f32
    %31 = vector.broadcast %cst_26 : f32 to vector<2x32xf32>
    %32 = arith.maximumf %30, %31 : vector<2x32xf32>
    %c0_27 = arith.constant 0 : index
    %c0_28 = arith.constant 0 : index
    %33 = vector.load %arg8[%c0_27, %c0_28] : memref<32x5xf32, #tpu.memory_space<vmem>>, vector<32x5xf32>
    %cst_29 = arith.constant dense<0.000000e+00> : vector<2x5xf32>
    %34 = tpu.matmul %25, %33, %cst_29 {dimension_numbers = #tpu.dot_dimension_numbers<[1], [0], [0], [1], [0, 0, 1, 1], [], []>} : vector<2x32xf32>, vector<32x5xf32>, vector<2x5xf32> -> vector<2x5xf32>
    %c0_30 = arith.constant 0 : index
    %c0_31 = arith.constant 0 : index
    %35 = vector.load %arg9[%c0_30, %c0_31] : memref<1x5xf32, #tpu.memory_space<vmem>>, vector<1x5xf32>
    %36 = vector.broadcast %35 : vector<1x5xf32> to vector<2x5xf32>
    %37 = arith.addf %34, %36 : vector<2x5xf32>
    %cst_32 = arith.constant dense<0xFF800000> : vector<2xf32>
    %38 = vector.multi_reduction <maximumf>, %37, %cst_32 [1] : vector<2x5xf32> to vector<2xf32>
    %39 = vector.shape_cast %38 : vector<2xf32> to vector<2x1xf32>
    %40 = vector.broadcast %39 : vector<2x1xf32> to vector<2x5xf32>
    %41 = arith.subf %37, %40 : vector<2x5xf32>
    %42 = math.exp %41 : vector<2x5xf32>
    %cst_33 = arith.constant dense<0.000000e+00> : vector<2xf32>
    %43 = vector.multi_reduction <add>, %42, %cst_33 [1] : vector<2x5xf32> to vector<2xf32>
    %44 = vector.shape_cast %43 : vector<2xf32> to vector<2x1xf32>
    %45 = vector.broadcast %44 : vector<2x1xf32> to vector<2x5xf32>
    %46 = arith.divf %42, %45 : vector<2x5xf32>
    %c0_34 = arith.constant 0 : index
    %c0_35 = arith.constant 0 : index
    %47 = vector.load %arg14[%c0_34, %c0_35] : memref<2x5xf32, #tpu.memory_space<vmem>>, vector<2x5xf32>
    tpu.vector_store %arg14[%c0_34, %c0_35], %46 {strides = array<i32>} : memref<2x5xf32, #tpu.memory_space<vmem>>, vector<2x5xf32>,
    %c0_36 = arith.constant 0 : index
    %c0_37 = arith.constant 0 : index
    %48 = vector.load %arg12[%c0_36, %c0_37] : memref<32x5xf32, #tpu.memory_space<vmem>>, vector<32x5xf32>
    %cst_38 = arith.constant dense<0.000000e+00> : vector<2x5xf32>
    %49 = tpu.matmul %32, %48, %cst_38 {dimension_numbers = #tpu.dot_dimension_numbers<[1], [0], [0], [1], [0, 0, 1, 1], [], []>} : vector<2x32xf32>, vector<32x5xf32>, vector<2x5xf32> -> vector<2x5xf32>
    %c0_39 = arith.constant 0 : index
    %c0_40 = arith.constant 0 : index
    %50 = vector.load %arg13[%c0_39, %c0_40] : memref<1x5xf32, #tpu.memory_space<vmem>>, vector<1x5xf32>
    %51 = vector.broadcast %50 : vector<1x5xf32> to vector<2x5xf32>
    %52 = arith.addf %49, %51 : vector<2x5xf32>
    %cst_41 = arith.constant dense<0xFF800000> : vector<2xf32>
    %53 = vector.multi_reduction <maximumf>, %52, %cst_41 [1] : vector<2x5xf32> to vector<2xf32>
    %54 = vector.shape_cast %53 : vector<2xf32> to vector<2x1xf32>
    %55 = vector.broadcast %54 : vector<2x1xf32> to vector<2x5xf32>
    %56 = arith.subf %52, %55 : vector<2x5xf32>
    %57 = math.exp %56 : vector<2x5xf32>
    %cst_42 = arith.constant dense<0.000000e+00> : vector<2xf32>
    %58 = vector.multi_reduction <add>, %57, %cst_42 [1] : vector<2x5xf32> to vector<2xf32>
    %59 = vector.shape_cast %58 : vector<2xf32> to vector<2x1xf32>
    %60 = vector.broadcast %59 : vector<2x1xf32> to vector<2x5xf32>
    %61 = arith.divf %57, %60 : vector<2x5xf32>
    %c0_43 = arith.constant 0 : index
    %c0_44 = arith.constant 0 : index
    %62 = vector.load %arg15[%c0_43, %c0_44] : memref<2x5xf32, #tpu.memory_space<vmem>>, vector<2x5xf32>
    tpu.vector_store %arg15[%c0_43, %c0_44], %61 {strides = array<i32>} : memref<2x5xf32, #tpu.memory_space<vmem>>, vector<2x5xf32>,
    return
  }
}

</mosaic_0001>

<bundles_post_ra>
// kernel: feetnet_forward.5
= control target key start
LH: loop header
LB: loop body
LE: loop exit
PB: predicated region body
PF: predicated region fallthrough
CT: control target
= control target key end

     0   :  { %vm355_vm0 = vcmask 1044480   ;;  %vm356_vm1 = vcmask 1045504   ;;  %v873_v2 = vmov 65535   ;;  %vm258_vm2 = vcmask 220160   ;;  %s1292_s1 = inlined_call_operand.vmem [shape: bf16[27,128], index: 1, kind: input, shape index: {}]   ;;  %s1293_s2 = inlined_call_operand.vmem [shape: f32[1,128], index: 2, kind: input, shape index: {}]   ;;  %s1294_s0 = inlined_call_operand.vmem [shape: bf16[512,27], index: 0, kind: input, shape index: {}]   ;;  %s1295_s3 = inlined_call_operand.vmem [shape: f32[512,128], index: 3, kind: output, shape index: {}]  }
   0x1   :  { %v797_v0 = vld [vmem:[%s1292_s1 + $0x8] sm:$0xf]  ;;  %v864_v1 = vld [vmem:[%s1292_s1 + $0x8] sm:$0x30]  ;;  %v357_v3 = vsel %vm355_vm0, 4294967295, %v873_v2  ;;  %v863_v7 = vld [vmem:[%s1292_s1] sm:$0xff] }
   0x2   :  { %v798_v4 = vor.u32 %v864_v1, %v797_v0  ;;  %v358_v5 = vsel %vm356_vm1, %v357_v3, 0  ;;  %v831_v8 = vld [vmem:[%s1294_s0] sm:$0xff]  ;;  %v832_v12 = vld [vmem:[%s1294_s0 + $0x8] sm:$0xff]  ;;  %v833_v16 = vld [vmem:[%s1294_s0 + $0x10] sm:$0xff] }
   0x3   :  { %v839_v9 = vld [vmem:[%s1294_s0 + $0x40] sm:$0xff]  ;;  %v840_v13 = vld [vmem:[%s1294_s0 + $0x48] sm:$0xff]  ;;  %v841_v17 = vld [vmem:[%s1294_s0 + $0x50] sm:$0xff] }
   0x4   :  { %v360_v6 = vand.u32 %v798_v4, %v358_v5  ;;  %v847_v10 = vld [vmem:[%s1294_s0 + $0x80] sm:$0xff]  ;;  %v848_v14 = vld [vmem:[%s1294_s0 + $0x88] sm:$0xff]  ;;  %v849_v18 = vld [vmem:[%s1294_s0 + $0x90] sm:$0xff] }
   0x5   :  { %v855_v11 = vld [vmem:[%s1294_s0 + $0xc0] sm:$0xff]  ;;  %v856_v15 = vld [vmem:[%s1294_s0 + $0xc8] sm:$0xff]  ;;  %v857_v19 = vld [vmem:[%s1294_s0 + $0xd0] sm:$0xff] }
   0x6   :  { %368 = vmatpush.bf16.msra.mxu0 %v360_v6  ;;  %865 = vmatpush.bf16.msra.mxu1 %v360_v6  ;;  %v834_v20 = vld [vmem:[%s1294_s0 + $0x18] sm:$0xff]  ;;  %v835_v24 = vld [vmem:[%s1294_s0 + $0x20] sm:$0xff]  ;;  %v836_v28 = vld [vmem:[%s1294_s0 + $0x28] sm:$0xff] }
   0x7   :  { %866 = vmatpush.bf16.msra.mxu2 %v360_v6  ;;  %867 = vmatpush.bf16.msra.mxu3 %v360_v6  ;;  %v842_v21 = vld [vmem:[%s1294_s0 + $0x58] sm:$0xff]  ;;  %v843_v25 = vld [vmem:[%s1294_s0 + $0x60] sm:$0xff]  ;;  %v844_v29 = vld [vmem:[%s1294_s0 + $0x68] sm:$0xff] }
   0x8   :  { %v850_v22 = vld [vmem:[%s1294_s0 + $0x98] sm:$0xff]  ;;  %v851_v26 = vld [vmem:[%s1294_s0 + $0xa0] sm:$0xff]  ;;  %v852_v30 = vld [vmem:[%s1294_s0 + $0xa8] sm:$0xff] }
   0x9   :  { %v858_v23 = vld [vmem:[%s1294_s0 + $0xd8] sm:$0xff]  ;;  %v859_v27 = vld [vmem:[%s1294_s0 + $0xe0] sm:$0xff]  ;;  %v860_v31 = vld [vmem:[%s1294_s0 + $0xe8] sm:$0xff] }
   0xa   :  { %369 = vmatpush.bf16.msra.mxu0 %v863_v7  ;;  %868 = vmatpush.bf16.msra.mxu1 %v863_v7  ;;  %v837_v32 = vld [vmem:[%s1294_s0 + $0x30] sm:$0xff]  ;;  %v838_v36 = vld [vmem:[%s1294_s0 + $0x38] sm:$0xff]  ;;  %v1034_v40 = vld [vmem:[%s1293_s2] ss:$0 sm:$0xff] }
   0xb   :  { %869 = vmatpush.bf16.msra.mxu2 %v863_v7  ;;  %870 = vmatpush.bf16.msra.mxu3 %v863_v7  ;;  %v845_v33 = vld [vmem:[%s1294_s0 + $0x70] sm:$0xff]  ;;  %v846_v37 = vld [vmem:[%s1294_s0 + $0x78] sm:$0xff] }
   0xc   :  { %v853_v34 = vld [vmem:[%s1294_s0 + $0xb0] sm:$0xff]  ;;  %v854_v38 = vld [vmem:[%s1294_s0 + $0xb8] sm:$0xff] }
   0xd   :  { %799 = vmatmul.msk.bf16.vlgmr.msra.gmra.mxu0 %vm258_vm2, %v831_v8  ;;  %807 = vmatmul.msk.bf16.vlgmr.msra.gmra.mxu1 %vm258_vm2, %v839_v9  ;;  %v861_v35 = vld [vmem:[%s1294_s0 + $0xf0] sm:$0xff]  ;;  %v862_v39 = vld [vmem:[%s1294_s0 + $0xf8] sm:$0xff] }
   0xe   :  { %815 = vmatmul.msk.bf16.vlgmr.msra.gmra.mxu2 %vm258_vm2, %v847_v10  ;;  %823 = vmatmul.msk.bf16.vlgmr.msra.gmra.mxu3 %vm258_vm2, %v855_v11 }
  0x1d   :  { %800 = vmatmul.msk.bf16.gmra.mxu0 %vm258_vm2, %v832_v12  ;;  %808 = vmatmul.msk.bf16.gmra.mxu1 %vm258_vm2, %v840_v13 }
  0x1e   :  { %816 = vmatmul.msk.bf16.gmra.mxu2 %vm258_vm2, %v848_v14  ;;  %824 = vmatmul.msk.bf16.gmra.mxu3 %vm258_vm2, %v856_v15 }
  0x2d   :  { %801 = vmatmul.msk.bf16.gmra.mxu0 %vm258_vm2, %v833_v16  ;;  %809 = vmatmul.msk.bf16.gmra.mxu1 %vm258_vm2, %v841_v17 }
  0x2e   :  { %817 = vmatmul.msk.bf16.gmra.mxu2 %vm258_vm2, %v849_v18  ;;  %825 = vmatmul.msk.bf16.gmra.mxu3 %vm258_vm2, %v857_v19 }
  0x3d   :  { %802 = vmatmul.msk.bf16.gmra.mxu0 %vm258_vm2, %v834_v20  ;;  %810 = vmatmul.msk.bf16.gmra.mxu1 %vm258_vm2, %v842_v21 }
  0x3e   :  { %818 = vmatmul.msk.bf16.gmra.mxu2 %vm258_vm2, %v850_v22  ;;  %826 = vmatmul.msk.bf16.gmra.mxu3 %vm258_vm2, %v858_v23 }
  0x4d   :  { %803 = vmatmul.msk.bf16.gmra.mxu0 %vm258_vm2, %v835_v24  ;;  %811 = vmatmul.msk.bf16.gmra.mxu1 %vm258_vm2, %v843_v25 }
  0x4e   :  { %819 = vmatmul.msk.bf16.gmra.mxu2 %vm258_vm2, %v851_v26  ;;  %827 = vmatmul.msk.bf16.gmra.mxu3 %vm258_vm2, %v859_v27 }
  0x5d   :  { %804 = vmatmul.msk.bf16.gmra.mxu0 %vm258_vm2, %v836_v28  ;;  %812 = vmatmul.msk.bf16.gmra.mxu1 %vm258_vm2, %v844_v29 }
  0x5e   :  { %820 = vmatmul.msk.bf16.gmra.mxu2 %vm258_vm2, %v852_v30  ;;  %828 = vmatmul.msk.bf16.gmra.mxu3 %vm258_vm2, %v860_v31 }
  0x6d   :  { %805 = vmatmul.msk.bf16.gmra.mxu0 %vm258_vm2, %v837_v32  ;;  %813 = vmatmul.msk.bf16.gmra.mxu1 %vm258_vm2, %v845_v33 }
  0x6e   :  { %821 = vmatmul.msk.bf16.gmra.mxu2 %vm258_vm2, %v853_v34  ;;  %829 = vmatmul.msk.bf16.gmra.mxu3 %vm258_vm2, %v861_v35 }
  0x7d   :  { %806 = vmatmul.msk.bf16.gmra.mxu0 %vm258_vm2, %v838_v36  ;;  %814 = vmatmul.msk.bf16.gmra.mxu1 %vm258_vm2, %v846_v37 }
  0x7e   :  { %822 = vmatmul.msk.bf16.gmra.mxu2 %vm258_vm2, %v854_v38  ;;  %830 = vmatmul.msk.bf16.gmra.mxu3 %vm258_vm2, %v862_v39 }
  0x8a   :  { %v371_v41 = vpop.f32.mrf.mxu0  ;;  %v411_v42 = vpop.f32.mrf.mxu1 }
  0x8b   :  { %v372_v43 = vadd.f32 %v1034_v40, %v371_v41  ;;  %v412_v44 = vadd.f32 %v1034_v40, %v411_v42 }
  0x8d   :  { %v531_v45 = vmax.f32 %v372_v43, 0.0  ;;  %v547_v46 = vmax.f32 %v412_v44, 0.0 }
  0x8f   :  { %595 = vst [vmem:[%s1295_s3] sm:$0xff] %v531_v45 }
  0x90   :  { %611 = vst [vmem:[%s1295_s3 + $0x80] sm:$0xff] %v547_v46 }
  0x91   :  { %v451_v47 = vpop.f32.mrf.mxu2  ;;  %v491_v48 = vpop.f32.mrf.mxu3 }
  0x92   :  { %v452_v49 = vadd.f32 %v1034_v40, %v451_v47  ;;  %v492_v50 = vadd.f32 %v1034_v40, %v491_v48  ;;  %v373_v51 = vpop.f32.mrf.mxu0  ;;  %v413_v52 = vpop.f32.mrf.mxu1 }
  0x93   :  { %v374_v53 = vadd.f32 %v1034_v40, %v373_v51  ;;  %v414_v54 = vadd.f32 %v1034_v40, %v413_v52 }
  0x94   :  { %v563_v55 = vmax.f32 %v452_v49, 0.0  ;;  %v579_v56 = vmax.f32 %v492_v50, 0.0 }
  0x95   :  { %v532_v57 = vmax.f32 %v374_v53, 0.0  ;;  %v548_v58 = vmax.f32 %v414_v54, 0.0 }
  0x96   :  { %627 = vst [vmem:[%s1295_s3 + $0x100] sm:$0xff] %v563_v55 }
  0x97   :  { %643 = vst [vmem:[%s1295_s3 + $0x180] sm:$0xff] %v579_v56 }
  0x98   :  { %596 = vst [vmem:[%s1295_s3 + $0x8] sm:$0xff] %v532_v57 }
  0x99   :  { %612 = vst [vmem:[%s1295_s3 + $0x88] sm:$0xff] %v548_v58  ;;  %v453_v59 = vpop.f32.mrf.mxu2  ;;  %v493_v60 = vpop.f32.mrf.mxu3 }
  0x9a   :  { %v454_v61 = vadd.f32 %v1034_v40, %v453_v59  ;;  %v494_v62 = vadd.f32 %v1034_v40, %v493_v60  ;;  %v376_v63 = vpop.f32.mrf.mxu0  ;;  %v416_v0 = vpop.f32.mrf.mxu1 }
  0x9b   :  { %v377_v1 = vadd.f32 %v1034_v40, %v376_v63  ;;  %v417_v2 = vadd.f32 %v1034_v40, %v416_v0 }
  0x9c   :  { %v564_v3 = vmax.f32 %v454_v61, 0.0  ;;  %v580_v4 = vmax.f32 %v494_v62, 0.0 }
  0x9d   :  { %v533_v5 = vmax.f32 %v377_v1, 0.0  ;;  %v549_v6 = vmax.f32 %v417_v2, 0.0 }
  0x9e   :  { %628 = vst [vmem:[%s1295_s3 + $0x108] sm:$0xff] %v564_v3 }
  0x9f   :  { %644 = vst [vmem:[%s1295_s3 + $0x188] sm:$0xff] %v580_v4 }
  0xa0   :  { %597 = vst [vmem:[%s1295_s3 + $0x10] sm:$0xff] %v533_v5 }
  0xa1   :  { %613 = vst [vmem:[%s1295_s3 + $0x90] sm:$0xff] %v549_v6  ;;  %v456_v7 = vpop.f32.mrf.mxu2  ;;  %v496_v8 = vpop.f32.mrf.mxu3 }
  0xa2   :  { %v457_v9 = vadd.f32 %v1034_v40, %v456_v7  ;;  %v497_v10 = vadd.f32 %v1034_v40, %v496_v8  ;;  %v378_v11 = vpop.f32.mrf.mxu0  ;;  %v418_v12 = vpop.f32.mrf.mxu1 }
  0xa3   :  { %v379_v13 = vadd.f32 %v1034_v40, %v378_v11  ;;  %v419_v14 = vadd.f32 %v1034_v40, %v418_v12 }
  0xa4   :  { %v565_v15 = vmax.f32 %v457_v9, 0.0  ;;  %v581_v16 = vmax.f32 %v497_v10, 0.0 }
  0xa5   :  { %v534_v17 = vmax.f32 %v379_v13, 0.0  ;;  %v550_v18 = vmax.f32 %v419_v14, 0.0 }
  0xa6   :  { %629 = vst [vmem:[%s1295_s3 + $0x110] sm:$0xff] %v565_v15 }
  0xa7   :  { %645 = vst [vmem:[%s1295_s3 + $0x190] sm:$0xff] %v581_v16 }
  0xa8   :  { %598 = vst [vmem:[%s1295_s3 + $0x18] sm:$0xff] %v534_v17 }
  0xa9   :  { %614 = vst [vmem:[%s1295_s3 + $0x98] sm:$0xff] %v550_v18  ;;  %v458_v19 = vpop.f32.mrf.mxu2  ;;  %v498_v20 = vpop.f32.mrf.mxu3 }
  0xaa   :  { %v459_v21 = vadd.f32 %v1034_v40, %v458_v19  ;;  %v499_v22 = vadd.f32 %v1034_v40, %v498_v20  ;;  %v381_v23 = vpop.f32.mrf.mxu0  ;;  %v421_v24 = vpop.f32.mrf.mxu1 }
  0xab   :  { %v382_v25 = vadd.f32 %v1034_v40, %v381_v23  ;;  %v422_v26 = vadd.f32 %v1034_v40, %v421_v24 }
  0xac   :  { %v566_v27 = vmax.f32 %v459_v21, 0.0  ;;  %v582_v28 = vmax.f32 %v499_v22, 0.0 }
  0xad   :  { %v535_v29 = vmax.f32 %v382_v25, 0.0  ;;  %v551_v30 = vmax.f32 %v422_v26, 0.0 }
  0xae   :  { %630 = vst [vmem:[%s1295_s3 + $0x118] sm:$0xff] %v566_v27 }
  0xaf   :  { %646 = vst [vmem:[%s1295_s3 + $0x198] sm:$0xff] %v582_v28 }
  0xb0   :  { %599 = vst [vmem:[%s1295_s3 + $0x20] sm:$0xff] %v535_v29 }
  0xb1   :  { %615 = vst [vmem:[%s1295_s3 + $0xa0] sm:$0xff] %v551_v30  ;;  %v461_v31 = vpop.f32.mrf.mxu2  ;;  %v501_v32 = vpop.f32.mrf.mxu3 }
  0xb2   :  { %v462_v33 = vadd.f32 %v1034_v40, %v461_v31  ;;  %v502_v34 = vadd.f32 %v1034_v40, %v501_v32  ;;  %v383_v35 = vpop.f32.mrf.mxu0  ;;  %v423_v36 = vpop.f32.mrf.mxu1 }
  0xb3   :  { %v384_v37 = vadd.f32 %v1034_v40, %v383_v35  ;;  %v424_v38 = vadd.f32 %v1034_v40, %v423_v36 }
  0xb4   :  { %v567_v39 = vmax.f32 %v462_v33, 0.0  ;;  %v583_v41 = vmax.f32 %v502_v34, 0.0 }
  0xb5   :  { %v536_v42 = vmax.f32 %v384_v37, 0.0  ;;  %v552_v43 = vmax.f32 %v424_v38, 0.0 }
  0xb6   :  { %631 = vst [vmem:[%s1295_s3 + $0x120] sm:$0xff] %v567_v39 }
  0xb7   :  { %647 = vst [vmem:[%s1295_s3 + $0x1a0] sm:$0xff] %v583_v41 }
  0xb8   :  { %600 = vst [vmem:[%s1295_s3 + $0x28] sm:$0xff] %v536_v42 }
  0xb9   :  { %616 = vst [vmem:[%s1295_s3 + $0xa8] sm:$0xff] %v552_v43  ;;  %v463_v44 = vpop.f32.mrf.mxu2  ;;  %v503_v45 = vpop.f32.mrf.mxu3 }
  0xba   :  { %v464_v46 = vadd.f32 %v1034_v40, %v463_v44  ;;  %v504_v47 = vadd.f32 %v1034_v40, %v503_v45  ;;  %v386_v48 = vpop.f32.mrf.mxu0  ;;  %v426_v49 = vpop.f32.mrf.mxu1 }
  0xbb   :  { %v387_v50 = vadd.f32 %v1034_v40, %v386_v48  ;;  %v427_v51 = vadd.f32 %v1034_v40, %v426_v49 }
  0xbc   :  { %v568_v52 = vmax.f32 %v464_v46, 0.0  ;;  %v584_v53 = vmax.f32 %v504_v47, 0.0 }
  0xbd   :  { %v537_v54 = vmax.f32 %v387_v50, 0.0  ;;  %v553_v55 = vmax.f32 %v427_v51, 0.0 }
  0xbe   :  { %632 = vst [vmem:[%s1295_s3 + $0x128] sm:$0xff] %v568_v52 }
  0xbf   :  { %648 = vst [vmem:[%s1295_s3 + $0x1a8] sm:$0xff] %v584_v53 }
  0xc0   :  { %601 = vst [vmem:[%s1295_s3 + $0x30] sm:$0xff] %v537_v54 }
  0xc1   :  { %617 = vst [vmem:[%s1295_s3 + $0xb0] sm:$0xff] %v553_v55  ;;  %v466_v56 = vpop.f32.mrf.mxu2  ;;  %v506_v57 = vpop.f32.mrf.mxu3 }
  0xc2   :  { %v467_v58 = vadd.f32 %v1034_v40, %v466_v56  ;;  %v507_v59 = vadd.f32 %v1034_v40, %v506_v57  ;;  %v388_v60 = vpop.f32.mrf.mxu0  ;;  %v428_v61 = vpop.f32.mrf.mxu1 }
  0xc3   :  { %v389_v62 = vadd.f32 %v1034_v40, %v388_v60  ;;  %v429_v63 = vadd.f32 %v1034_v40, %v428_v61 }
  0xc4   :  { %v569_v0 = vmax.f32 %v467_v58, 0.0  ;;  %v585_v1 = vmax.f32 %v507_v59, 0.0 }
  0xc5   :  { %v538_v2 = vmax.f32 %v389_v62, 0.0  ;;  %v554_v3 = vmax.f32 %v429_v63, 0.0 }
  0xc6   :  { %633 = vst [vmem:[%s1295_s3 + $0x130] sm:$0xff] %v569_v0 }
  0xc7   :  { %649 = vst [vmem:[%s1295_s3 + $0x1b0] sm:$0xff] %v585_v1 }
  0xc8   :  { %602 = vst [vmem:[%s1295_s3 + $0x38] sm:$0xff] %v538_v2 }
  0xc9   :  { %618 = vst [vmem:[%s1295_s3 + $0xb8] sm:$0xff] %v554_v3  ;;  %v468_v4 = vpop.f32.mrf.mxu2  ;;  %v508_v5 = vpop.f32.mrf.mxu3 }
  0xca   :  { %v469_v6 = vadd.f32 %v1034_v40, %v468_v4  ;;  %v509_v7 = vadd.f32 %v1034_v40, %v508_v5  ;;  %v391_v8 = vpop.f32.mrf.mxu0  ;;  %v431_v9 = vpop.f32.mrf.mxu1 }
  0xcb   :  { %v392_v10 = vadd.f32 %v1034_v40, %v391_v8  ;;  %v432_v11 = vadd.f32 %v1034_v40, %v431_v9 }
  0xcc   :  { %v570_v12 = vmax.f32 %v469_v6, 0.0  ;;  %v586_v13 = vmax.f32 %v509_v7, 0.0 }
  0xcd   :  { %v539_v14 = vmax.f32 %v392_v10, 0.0  ;;  %v555_v15 = vmax.f32 %v432_v11, 0.0 }
  0xce   :  { %634 = vst [vmem:[%s1295_s3 + $0x138] sm:$0xff] %v570_v12 }
  0xcf   :  { %650 = vst [vmem:[%s1295_s3 + $0x1b8] sm:$0xff] %v586_v13 }
  0xd0   :  { %603 = vst [vmem:[%s1295_s3 + $0x40] sm:$0xff] %v539_v14 }
  0xd1   :  { %619 = vst [vmem:[%s1295_s3 + $0xc0] sm:$0xff] %v555_v15  ;;  %v471_v16 = vpop.f32.mrf.mxu2  ;;  %v511_v17 = vpop.f32.mrf.mxu3 }
  0xd2   :  { %v472_v18 = vadd.f32 %v1034_v40, %v471_v16  ;;  %v512_v19 = vadd.f32 %v1034_v40, %v511_v17  ;;  %v393_v20 = vpop.f32.mrf.mxu0  ;;  %v433_v21 = vpop.f32.mrf.mxu1 }
  0xd3   :  { %v394_v22 = vadd.f32 %v1034_v40, %v393_v20  ;;  %v434_v23 = vadd.f32 %v1034_v40, %v433_v21 }
  0xd4   :  { %v571_v24 = vmax.f32 %v472_v18, 0.0  ;;  %v587_v25 = vmax.f32 %v512_v19, 0.0 }
  0xd5   :  { %v540_v26 = vmax.f32 %v394_v22, 0.0  ;;  %v556_v27 = vmax.f32 %v434_v23, 0.0 }
  0xd6   :  { %635 = vst [vmem:[%s1295_s3 + $0x140] sm:$0xff] %v571_v24 }
  0xd7   :  { %651 = vst [vmem:[%s1295_s3 + $0x1c0] sm:$0xff] %v587_v25 }
  0xd8   :  { %604 = vst [vmem:[%s1295_s3 + $0x48] sm:$0xff] %v540_v26 }
  0xd9   :  { %620 = vst [vmem:[%s1295_s3 + $0xc8] sm:$0xff] %v556_v27  ;;  %v473_v28 = vpop.f32.mrf.mxu2  ;;  %v513_v29 = vpop.f32.mrf.mxu3 }
  0xda   :  { %v474_v30 = vadd.f32 %v1034_v40, %v473_v28  ;;  %v514_v31 = vadd.f32 %v1034_v40, %v513_v29  ;;  %v396_v32 = vpop.f32.mrf.mxu0  ;;  %v436_v33 = vpop.f32.mrf.mxu1 }
  0xdb   :  { %v397_v34 = vadd.f32 %v1034_v40, %v396_v32  ;;  %v437_v35 = vadd.f32 %v1034_v40, %v436_v33 }
  0xdc   :  { %v572_v36 = vmax.f32 %v474_v30, 0.0  ;;  %v588_v37 = vmax.f32 %v514_v31, 0.0 }
  0xdd   :  { %v541_v38 = vmax.f32 %v397_v34, 0.0  ;;  %v557_v39 = vmax.f32 %v437_v35, 0.0 }
  0xde   :  { %636 = vst [vmem:[%s1295_s3 + $0x148] sm:$0xff] %v572_v36 }
  0xdf   :  { %652 = vst [vmem:[%s1295_s3 + $0x1c8] sm:$0xff] %v588_v37 }
  0xe0   :  { %605 = vst [vmem:[%s1295_s3 + $0x50] sm:$0xff] %v541_v38 }
  0xe1   :  { %621 = vst [vmem:[%s1295_s3 + $0xd0] sm:$0xff] %v557_v39  ;;  %v476_v41 = vpop.f32.mrf.mxu2  ;;  %v516_v42 = vpop.f32.mrf.mxu3 }
  0xe2   :  { %v477_v43 = vadd.f32 %v1034_v40, %v476_v41  ;;  %v517_v44 = vadd.f32 %v1034_v40, %v516_v42  ;;  %v398_v45 = vpop.f32.mrf.mxu0  ;;  %v438_v46 = vpop.f32.mrf.mxu1 }
  0xe3   :  { %v399_v47 = vadd.f32 %v1034_v40, %v398_v45  ;;  %v439_v48 = vadd.f32 %v1034_v40, %v438_v46 }
  0xe4   :  { %v573_v49 = vmax.f32 %v477_v43, 0.0  ;;  %v589_v50 = vmax.f32 %v517_v44, 0.0 }
  0xe5   :  { %v542_v51 = vmax.f32 %v399_v47, 0.0  ;;  %v558_v52 = vmax.f32 %v439_v48, 0.0 }
  0xe6   :  { %637 = vst [vmem:[%s1295_s3 + $0x150] sm:$0xff] %v573_v49 }
  0xe7   :  { %653 = vst [vmem:[%s1295_s3 + $0x1d0] sm:$0xff] %v589_v50 }
  0xe8   :  { %606 = vst [vmem:[%s1295_s3 + $0x58] sm:$0xff] %v542_v51 }
  0xe9   :  { %622 = vst [vmem:[%s1295_s3 + $0xd8] sm:$0xff] %v558_v52  ;;  %v478_v53 = vpop.f32.mrf.mxu2  ;;  %v518_v54 = vpop.f32.mrf.mxu3 }
  0xea   :  { %v479_v55 = vadd.f32 %v1034_v40, %v478_v53  ;;  %v519_v56 = vadd.f32 %v1034_v40, %v518_v54  ;;  %v401_v57 = vpop.f32.mrf.mxu0  ;;  %v441_v58 = vpop.f32.mrf.mxu1 }
  0xeb   :  { %v402_v59 = vadd.f32 %v1034_v40, %v401_v57  ;;  %v442_v60 = vadd.f32 %v1034_v40, %v441_v58 }
  0xec   :  { %v574_v61 = vmax.f32 %v479_v55, 0.0  ;;  %v590_v62 = vmax.f32 %v519_v56, 0.0 }
  0xed   :  { %v543_v63 = vmax.f32 %v402_v59, 0.0  ;;  %v559_v0 = vmax.f32 %v442_v60, 0.0 }
  0xee   :  { %638 = vst [vmem:[%s1295_s3 + $0x158] sm:$0xff] %v574_v61 }
  0xef   :  { %654 = vst [vmem:[%s1295_s3 + $0x1d8] sm:$0xff] %v590_v62 }
  0xf0   :  { %607 = vst [vmem:[%s1295_s3 + $0x60] sm:$0xff] %v543_v63 }
  0xf1   :  { %623 = vst [vmem:[%s1295_s3 + $0xe0] sm:$0xff] %v559_v0  ;;  %v481_v1 = vpop.f32.mrf.mxu2  ;;  %v521_v2 = vpop.f32.mrf.mxu3 }
  0xf2   :  { %v482_v3 = vadd.f32 %v1034_v40, %v481_v1  ;;  %v522_v4 = vadd.f32 %v1034_v40, %v521_v2  ;;  %v403_v5 = vpop.f32.mrf.mxu0  ;;  %v443_v6 = vpop.f32.mrf.mxu1 }
  0xf3   :  { %v404_v7 = vadd.f32 %v1034_v40, %v403_v5  ;;  %v444_v8 = vadd.f32 %v1034_v40, %v443_v6 }
  0xf4   :  { %v575_v9 = vmax.f32 %v482_v3, 0.0  ;;  %v591_v10 = vmax.f32 %v522_v4, 0.0 }
  0xf5   :  { %v544_v11 = vmax.f32 %v404_v7, 0.0  ;;  %v560_v12 = vmax.f32 %v444_v8, 0.0 }
  0xf6   :  { %639 = vst [vmem:[%s1295_s3 + $0x160] sm:$0xff] %v575_v9 }
  0xf7   :  { %655 = vst [vmem:[%s1295_s3 + $0x1e0] sm:$0xff] %v591_v10 }
  0xf8   :  { %608 = vst [vmem:[%s1295_s3 + $0x68] sm:$0xff] %v544_v11 }
  0xf9   :  { %624 = vst [vmem:[%s1295_s3 + $0xe8] sm:$0xff] %v560_v12  ;;  %v483_v13 = vpop.f32.mrf.mxu2  ;;  %v523_v14 = vpop.f32.mrf.mxu3 }
  0xfa   :  { %v484_v15 = vadd.f32 %v1034_v40, %v483_v13  ;;  %v524_v16 = vadd.f32 %v1034_v40, %v523_v14  ;;  %v406_v17 = vpop.f32.mrf.mxu0  ;;  %v446_v18 = vpop.f32.mrf.mxu1 }
  0xfb   :  { %v407_v19 = vadd.f32 %v1034_v40, %v406_v17  ;;  %v447_v20 = vadd.f32 %v1034_v40, %v446_v18 }
  0xfc   :  { %v576_v21 = vmax.f32 %v484_v15, 0.0  ;;  %v592_v22 = vmax.f32 %v524_v16, 0.0 }
  0xfd   :  { %v545_v23 = vmax.f32 %v407_v19, 0.0  ;;  %v561_v24 = vmax.f32 %v447_v20, 0.0 }
  0xfe   :  { %640 = vst [vmem:[%s1295_s3 + $0x168] sm:$0xff] %v576_v21 }
  0xff   :  { %656 = vst [vmem:[%s1295_s3 + $0x1e8] sm:$0xff] %v592_v22 }
 0x100   :  { %609 = vst [vmem:[%s1295_s3 + $0x70] sm:$0xff] %v545_v23 }
 0x101   :  { %625 = vst [vmem:[%s1295_s3 + $0xf0] sm:$0xff] %v561_v24  ;;  %v486_v25 = vpop.f32.mrf.mxu2  ;;  %v526_v26 = vpop.f32.mrf.mxu3 }
 0x102   :  { %v487_v27 = vadd.f32 %v1034_v40, %v486_v25  ;;  %v527_v28 = vadd.f32 %v1034_v40, %v526_v26  ;;  %v408_v29 = vpop.f32.mrf.mxu0  ;;  %v448_v30 = vpop.f32.mrf.mxu1 }
 0x103   :  { %v409_v31 = vadd.f32 %v1034_v40, %v408_v29  ;;  %v449_v32 = vadd.f32 %v1034_v40, %v448_v30 }
 0x104   :  { %v577_v33 = vmax.f32 %v487_v27, 0.0  ;;  %v593_v34 = vmax.f32 %v527_v28, 0.0 }
 0x105   :  { %v546_v35 = vmax.f32 %v409_v31, 0.0  ;;  %v562_v36 = vmax.f32 %v449_v32, 0.0 }
 0x106   :  { %641 = vst [vmem:[%s1295_s3 + $0x170] sm:$0xff] %v577_v33 }
 0x107   :  { %657 = vst [vmem:[%s1295_s3 + $0x1f0] sm:$0xff] %v593_v34 }
 0x108   :  { %610 = vst [vmem:[%s1295_s3 + $0x78] sm:$0xff] %v546_v35 }
 0x109   :  { %626 = vst [vmem:[%s1295_s3 + $0xf8] sm:$0xff] %v562_v36  ;;  %v488_v37 = vpop.f32.mrf.mxu2  ;;  %v528_v38 = vpop.f32.mrf.mxu3 }
 0x10a   :  { %v489_v39 = vadd.f32 %v1034_v40, %v488_v37  ;;  %v529_v41 = vadd.f32 %v1034_v40, %v528_v38 }
 0x10c   :  { %v578_v42 = vmax.f32 %v489_v39, 0.0  ;;  %v594_v43 = vmax.f32 %v529_v41, 0.0 }
 0x10e   :  { %642 = vst [vmem:[%s1295_s3 + $0x178] sm:$0xff] %v578_v42 }
 0x10f   :  { %658 = vst [vmem:[%s1295_s3 + $0x1f8] sm:$0xff] %v594_v43 }

// kernel: feetnet_forward.6
= control target key start
LH: loop header
LB: loop body
LE: loop exit
PB: predicated region body
PF: predicated region fallthrough
CT: control target
= control target key end

     0   :  { %s2877_s1 = inlined_call_operand.vmem [shape: bf16[384,256], index: 1, kind: input, shape index: {}]   ;;  %s2878_s0 = inlined_call_operand.vmem [shape: bf16[256,384], index: 0, kind: input, shape index: {}]   ;;  %s2879_s2 = inlined_call_operand.vmem [shape: f32[1,256], index: 2, kind: input, shape index: {}]   ;;  %s2880_s3 = inlined_call_operand.vmem [shape: f32[256,256], index: 3, kind: output, shape index: {}]  }
   0x1   :  { %v1544_v0 = vld [vmem:[%s2877_s1 + $0x70] sm:$0xf]  ;;  %v1741_v1 = vld [vmem:[%s2877_s1 + $0x74] sm:$0xf0]  ;;  %v1536_v5 = vld [vmem:[%s2877_s1 + $0x60] sm:$0xf] }
   0x2   :  { %v1608_v2 = vld [vmem:[%s2877_s1 + $0xf0] sm:$0xf]  ;;  %v1545_v3 = vor.u32 %v1741_v1, %v1544_v0  ;;  %v1757_v4 = vld [vmem:[%s2877_s1 + $0xf4] sm:$0xf0]  ;;  %v1739_v6 = vld [vmem:[%s2877_s1 + $0x64] sm:$0xf0] }
   0x3   :  { %v1609_v7 = vor.u32 %v1757_v4, %v1608_v2  ;;  %v1600_v8 = vld [vmem:[%s2877_s1 + $0xe0] sm:$0xf]  ;;  %v1755_v9 = vld [vmem:[%s2877_s1 + $0xe4] sm:$0xf0]  ;;  %v1537_v10 = vor.u32 %v1739_v6, %v1536_v5  ;;  %v1528_v12 = vld [vmem:[%s2877_s1 + $0x50] sm:$0xf] }
   0x4   :  { %628 = vmatpush.bf16.msra.mxu0 %v1545_v3  ;;  %1774 = vmatpush.bf16.msra.mxu2 %v1545_v3  ;;  %v1601_v11 = vor.u32 %v1755_v9, %v1600_v8  ;;  %v1737_v13 = vld [vmem:[%s2877_s1 + $0x54] sm:$0xf0]  ;;  %v1592_v14 = vld [vmem:[%s2877_s1 + $0xd0] sm:$0xf]  ;;  %v1520_v18 = vld [vmem:[%s2877_s1 + $0x40] sm:$0xf] }
   0x5   :  { %1782 = vmatpush.bf16.msra.mxu3 %v1609_v7  ;;  %717 = vmatpush.bf16.msra.mxu1 %v1609_v7  ;;  %v1753_v15 = vld [vmem:[%s2877_s1 + $0xd4] sm:$0xf0]  ;;  %v1529_v16 = vor.u32 %v1737_v13, %v1528_v12  ;;  %v1735_v19 = vld [vmem:[%s2877_s1 + $0x44] sm:$0xf0]  ;;  %v1584_v20 = vld [vmem:[%s2877_s1 + $0xc0] sm:$0xf] }
   0x6   :  { %v1593_v17 = vor.u32 %v1753_v15, %v1592_v14  ;;  %v1751_v21 = vld [vmem:[%s2877_s1 + $0xc4] sm:$0xf0]  ;;  %v1521_v22 = vor.u32 %v1735_v19, %v1520_v18  ;;  %v1512_v24 = vld [vmem:[%s2877_s1 + $0x30] sm:$0xf]  ;;  %v1733_v25 = vld [vmem:[%s2877_s1 + $0x34] sm:$0xf0] }
   0x7   :  { %v1585_v23 = vor.u32 %v1751_v21, %v1584_v20  ;;  %v1576_v26 = vld [vmem:[%s2877_s1 + $0xb0] sm:$0xf]  ;;  %v1749_v27 = vld [vmem:[%s2877_s1 + $0xb4] sm:$0xf0]  ;;  %v1513_v28 = vor.u32 %v1733_v25, %v1512_v24  ;;  %v1504_v30 = vld [vmem:[%s2877_s1 + $0x20] sm:$0xf] }
   0x8   :  { %629 = vmatpush.bf16.msra.mxu0 %v1537_v10  ;;  %1775 = vmatpush.bf16.msra.mxu2 %v1537_v10  ;;  %v1577_v29 = vor.u32 %v1749_v27, %v1576_v26  ;;  %v1731_v31 = vld [vmem:[%s2877_s1 + $0x24] sm:$0xf0]  ;;  %v1568_v32 = vld [vmem:[%s2877_s1 + $0xa0] sm:$0xf]  ;;  %v1496_v36 = vld [vmem:[%s2877_s1 + $0x10] sm:$0xf] }
   0x9   :  { %1783 = vmatpush.bf16.msra.mxu3 %v1601_v11  ;;  %718 = vmatpush.bf16.msra.mxu1 %v1601_v11  ;;  %v1747_v33 = vld [vmem:[%s2877_s1 + $0xa4] sm:$0xf0]  ;;  %v1505_v34 = vor.u32 %v1731_v31, %v1504_v30  ;;  %v1729_v37 = vld [vmem:[%s2877_s1 + $0x14] sm:$0xf0]  ;;  %v1560_v38 = vld [vmem:[%s2877_s1 + $0x90] sm:$0xf] }
   0xa   :  { %v1569_v35 = vor.u32 %v1747_v33, %v1568_v32  ;;  %v1745_v39 = vld [vmem:[%s2877_s1 + $0x94] sm:$0xf0]  ;;  %v1497_v40 = vor.u32 %v1729_v37, %v1496_v36  ;;  %v1488_v41 = vld [vmem:[%s2877_s1] sm:$0xf]  ;;  %v1727_v43 = vld [vmem:[%s2877_s1 + $0x4] sm:$0xf0] }
   0xb   :  { %v1561_v42 = vor.u32 %v1745_v39, %v1560_v38  ;;  %v1552_v44 = vld [vmem:[%s2877_s1 + $0x80] sm:$0xf]  ;;  %v1743_v45 = vld [vmem:[%s2877_s1 + $0x84] sm:$0xf0]  ;;  %v1679_v47 = vld [vmem:[%s2878_s0 + $0x8] sm:$0xf0]  ;;  %v1489_v54 = vor.u32 %v1727_v43, %v1488_v41 }
   0xc   :  { %630 = vmatpush.bf16.msra.mxu0 %v1529_v16  ;;  %1776 = vmatpush.bf16.msra.mxu2 %v1529_v16  ;;  %v1296_v46 = vld [vmem:[%s2878_s0] sm:$0xf]  ;;  %v1703_v49 = vld [vmem:[%s2878_s0 + $0xc8] sm:$0xf0]  ;;  %v1740_v50 = vld [vmem:[%s2877_s1 + $0x74] sm:$0xf]  ;;  %v1553_v58 = vor.u32 %v1743_v45, %v1552_v44 }
   0xd   :  { %1784 = vmatpush.bf16.msra.mxu3 %v1593_v17  ;;  %719 = vmatpush.bf16.msra.mxu1 %v1593_v17  ;;  %v1392_v48 = vld [vmem:[%s2878_s0 + $0xc0] sm:$0xf]  ;;  %v1546_v51 = vld [vmem:[%s2877_s1 + $0x78] sm:$0xf0]  ;;  %v1672_v52 = vld [vmem:[%s2877_s1 + $0x170] sm:$0xf]  ;;  %v1957_v3 = vor.u32 %v1679_v47, %v1296_v46 }
   0xe   :  { %v1773_v53 = vld [vmem:[%s2877_s1 + $0x174] sm:$0xf0]  ;;  %v1702_v55 = vld [vmem:[%s2878_s0 + $0xc4] sm:$0xf]  ;;  %v1394_v56 = vld [vmem:[%s2878_s0 + $0xcc] sm:$0xf0]  ;;  %v1549_v62 = vor.u32 %v1740_v50, %v1546_v51  ;;  %v1959_v4 = vor.u32 %v1703_v49, %v1392_v48 }
   0xf   :  { %v1678_v57 = vld [vmem:[%s2878_s0 + $0x4] sm:$0xf]  ;;  %v1298_v59 = vld [vmem:[%s2878_s0 + $0xc] sm:$0xf0]  ;;  %v1756_v60 = vld [vmem:[%s2877_s1 + $0xf4] sm:$0xf]  ;;  %v1673_v63 = vor.u32 %v1773_v53, %v1672_v52  ;;  %v1970_v8 = vor.u32 %v1702_v55, %v1394_v56 }
  0x10   :  { %631 = vmatpush.bf16.msra.mxu0 %v1521_v22  ;;  %1777 = vmatpush.bf16.msra.mxu2 %v1521_v22  ;;  %v1610_v61 = vld [vmem:[%s2877_s1 + $0xf8] sm:$0xf0]  ;;  %v1772_v0 = vld [vmem:[%s2877_s1 + $0x174] sm:$0xf]  ;;  %v1738_v2 = vld [vmem:[%s2877_s1 + $0x64] sm:$0xf]  ;;  %v1972_v9 = vor.u32 %v1678_v57, %v1298_v59 }
  0x11   :  { %1785 = vmatpush.bf16.msra.mxu3 %v1585_v23  ;;  %720 = vmatpush.bf16.msra.mxu1 %v1585_v23  ;;  %v1674_v1 = vld [vmem:[%s2877_s1 + $0x178] sm:$0xf0]  ;;  %v1538_v5 = vld [vmem:[%s2877_s1 + $0x68] sm:$0xf0]  ;;  %v1664_v6 = vld [vmem:[%s2877_s1 + $0x160] sm:$0xf]  ;;  %v1613_v10 = vor.u32 %v1756_v60, %v1610_v61 }
  0x12   :  { %v1771_v7 = vld [vmem:[%s2877_s1 + $0x164] sm:$0xf0]  ;;  %v1677_v11 = vor.u32 %v1772_v0, %v1674_v1  ;;  %v1754_v12 = vld [vmem:[%s2877_s1 + $0xe4] sm:$0xf]  ;;  %v1541_v13 = vor.u32 %v1738_v2, %v1538_v5  ;;  %v1602_v15 = vld [vmem:[%s2877_s1 + $0xe8] sm:$0xf0] }
  0x13   :  { %v1665_v14 = vor.u32 %v1771_v7, %v1664_v6  ;;  %v1770_v16 = vld [vmem:[%s2877_s1 + $0x164] sm:$0xf]  ;;  %v1666_v17 = vld [vmem:[%s2877_s1 + $0x168] sm:$0xf0]  ;;  %v1736_v18 = vld [vmem:[%s2877_s1 + $0x54] sm:$0xf]  ;;  %v1605_v21 = vor.u32 %v1754_v12, %v1602_v15 }
  0x14   :  { %632 = vmatpush.bf16.msra.mxu0 %v1513_v28  ;;  %1778 = vmatpush.bf16.msra.mxu2 %v1513_v28  ;;  %v1530_v19 = vld [vmem:[%s2877_s1 + $0x58] sm:$0xf0]  ;;  %v1656_v20 = vld [vmem:[%s2877_s1 + $0x150] sm:$0xf]  ;;  %v1669_v22 = vor.u32 %v1770_v16, %v1666_v17  ;;  %v1769_v23 = vld [vmem:[%s2877_s1 + $0x154] sm:$0xf0] }
  0x15   :  { %1786 = vmatpush.bf16.msra.mxu3 %v1577_v29  ;;  %721 = vmatpush.bf16.msra.mxu1 %v1577_v29  ;;  %v1752_v24 = vld [vmem:[%s2877_s1 + $0xd4] sm:$0xf]  ;;  %v1533_v25 = vor.u32 %v1736_v18, %v1530_v19  ;;  %v1657_v26 = vor.u32 %v1769_v23, %v1656_v20  ;;  %v1594_v27 = vld [vmem:[%s2877_s1 + $0xd8] sm:$0xf0]  ;;  %v1308_v32 = vld [vmem:[%s2878_s0 + $0x18] sm:$0xf] }
  0x16   :  { %v1768_v28 = vld [vmem:[%s2877_s1 + $0x154] sm:$0xf]  ;;  %v1658_v29 = vld [vmem:[%s2877_s1 + $0x158] sm:$0xf0]  ;;  %v1597_v30 = vor.u32 %v1752_v24, %v1594_v27  ;;  %v1682_v33 = vld [vmem:[%s2878_s0 + $0x20] sm:$0xf0] }
  0x17   :  { %v1661_v31 = vor.u32 %v1768_v28, %v1658_v29  ;;  %v1705_v36 = vld [vmem:[%s2878_s0 + $0xdc] sm:$0xf]  ;;  %v1406_v37 = vld [vmem:[%s2878_s0 + $0xe4] sm:$0xf0]  ;;  %v1734_v44 = vld [vmem:[%s2877_s1 + $0x44] sm:$0xf] }
  0x18   :  { %633 = vmatpush.bf16.msra.mxu0 %v1505_v34  ;;  %1779 = vmatpush.bf16.msra.mxu2 %v1505_v34  ;;  %v1404_v34 = vld [vmem:[%s2878_s0 + $0xd8] sm:$0xf]  ;;  %v1681_v38 = vld [vmem:[%s2878_s0 + $0x1c] sm:$0xf]  ;;  %v1310_v39 = vld [vmem:[%s2878_s0 + $0x24] sm:$0xf0] }
  0x19   :  { %1787 = vmatpush.bf16.msra.mxu3 %v1569_v35  ;;  %722 = vmatpush.bf16.msra.mxu1 %v1569_v35  ;;  %v1706_v35 = vld [vmem:[%s2878_s0 + $0xe0] sm:$0xf0]  ;;  %v2044_v43 = vor.u32 %v1681_v38, %v1310_v39  ;;  %v1522_v45 = vld [vmem:[%s2877_s1 + $0x48] sm:$0xf0]  ;;  %v1648_v46 = vld [vmem:[%s2877_s1 + $0x140] sm:$0xf] }
  0x1a   :  { %v2040_v41 = vor.u32 %v1706_v35, %v1404_v34  ;;  %v1525_v47 = vor.u32 %v1734_v44, %v1522_v45  ;;  %v1767_v48 = vld [vmem:[%s2877_s1 + $0x144] sm:$0xf0]  ;;  %v1750_v49 = vld [vmem:[%s2877_s1 + $0xc4] sm:$0xf]  ;;  %v1586_v50 = vld [vmem:[%s2877_s1 + $0xc8] sm:$0xf0] }
  0x1b   :  { %v1649_v51 = vor.u32 %v1767_v48, %v1648_v46  ;;  %v1589_v52 = vor.u32 %v1750_v49, %v1586_v50  ;;  %v1766_v53 = vld [vmem:[%s2877_s1 + $0x144] sm:$0xf]  ;;  %v1320_v56 = vld [vmem:[%s2878_s0 + $0x30] sm:$0xf]  ;;  %v1685_v57 = vld [vmem:[%s2878_s0 + $0x38] sm:$0xf0] }
  0x1c   :  { %634 = vmatpush.bf16.msra.mxu0 %v1497_v40  ;;  %1780 = vmatpush.bf16.msra.mxu2 %v1497_v40  ;;  %v2038_v40 = vor.u32 %v1682_v33, %v1308_v32  ;;  %v1709_v59 = vld [vmem:[%s2878_s0 + $0xf8] sm:$0xf0]  ;;  %v1708_v60 = vld [vmem:[%s2878_s0 + $0xf4] sm:$0xf]  ;;  %v1418_v61 = vld [vmem:[%s2878_s0 + $0xfc] sm:$0xf0]  ;;  %v2098_v0 = vor.u32 %v1685_v57, %v1320_v56 }
  0x1d   :  { %1788 = vmatpush.bf16.msra.mxu3 %v1561_v42  ;;  %723 = vmatpush.bf16.msra.mxu1 %v1561_v42  ;;  %v2042_v42 = vor.u32 %v1705_v36, %v1406_v37  ;;  %v2102_v2 = vor.u32 %v1708_v60, %v1418_v61  ;;  %v1732_v6 = vld [vmem:[%s2877_s1 + $0x34] sm:$0xf]  ;;  %v1514_v7 = vld [vmem:[%s2877_s1 + $0x38] sm:$0xf0]  ;;  %v1765_v12 = vld [vmem:[%s2877_s1 + $0x134] sm:$0xf0] }
  0x1e   :  { %v1764_v17 = vld [vmem:[%s2877_s1 + $0x134] sm:$0xf]  ;;  %v1642_v18 = vld [vmem:[%s2877_s1 + $0x138] sm:$0xf0]  ;;  %v1332_v20 = vld [vmem:[%s2878_s0 + $0x48] sm:$0xf] }
  0x1f   :  { %v1645_v19 = vor.u32 %v1764_v17, %v1642_v18  ;;  %v1712_v23 = vld [vmem:[%s2878_s0 + $0x110] sm:$0xf0]  ;;  %v1711_v24 = vld [vmem:[%s2878_s0 + $0x10c] sm:$0xf]  ;;  %v1334_v27 = vld [vmem:[%s2878_s0 + $0x54] sm:$0xf0] }
  0x20   :  { %635 = vmatpush.bf16.msra.mxu0 %v1489_v54  ;;  %1781 = vmatpush.bf16.msra.mxu2 %v1489_v54  ;;  %v1650_v54 = vld [vmem:[%s2877_s1 + $0x148] sm:$0xf0]  ;;  %v1730_v32 = vld [vmem:[%s2877_s1 + $0x24] sm:$0xf]  ;;  %v1632_v34 = vld [vmem:[%s2877_s1 + $0x120] sm:$0xf] }
  0x21   :  { %1789 = vmatpush.bf16.msra.mxu3 %v1553_v58  ;;  %724 = vmatpush.bf16.msra.mxu1 %v1553_v58  ;;  %v1653_v55 = vor.u32 %v1766_v53, %v1650_v54  ;;  %v1416_v58 = vld [vmem:[%s2878_s0 + $0xf0] sm:$0xf]  ;;  %v1506_v33 = vld [vmem:[%s2877_s1 + $0x28] sm:$0xf0]  ;;  %v1763_v36 = vld [vmem:[%s2877_s1 + $0x124] sm:$0xf0] }
  0x22   :  { %v2100_v1 = vor.u32 %v1709_v59, %v1416_v58  ;;  %v1509_v35 = vor.u32 %v1730_v32, %v1506_v33  ;;  %v1746_v37 = vld [vmem:[%s2877_s1 + $0xa4] sm:$0xf]  ;;  %v1570_v38 = vld [vmem:[%s2877_s1 + $0xa8] sm:$0xf0]  ;;  %v1633_v39 = vor.u32 %v1763_v36, %v1632_v34  ;;  %v1344_v48 = vld [vmem:[%s2878_s0 + $0x60] sm:$0xf] }
  0x23   :  { %636 = vmatmul.bf16.vlgmr.msra.gmra.mxu0 %v1957_v3  ;;  %676 = vmatmul.bf16.vlgmr.msra.gmra.mxu2 %v1959_v4  ;;  %v1573_v44 = vor.u32 %v1746_v37, %v1570_v38  ;;  %v1762_v45 = vld [vmem:[%s2877_s1 + $0x124] sm:$0xf]  ;;  %v1634_v46 = vld [vmem:[%s2877_s1 + $0x128] sm:$0xf0]  ;;  %v1440_v50 = vld [vmem:[%s2878_s0 + $0x120] sm:$0xf] }
  0x24   :  { %806 = vmatpush.bf16.msrb.mxu2 %v1673_v63  ;;  %765 = vmatmul.bf16.vlgmr.msra.gmra.mxu3 %v1970_v8  ;;  %v1322_v63 = vld [vmem:[%s2878_s0 + $0x3c] sm:$0xf0]  ;;  %v1691_v49 = vld [vmem:[%s2878_s0 + $0x68] sm:$0xf0]  ;;  %v1442_v53 = vld [vmem:[%s2878_s0 + $0x12c] sm:$0xf0] }
  0x25   :  { %895 = vmatpush.bf16.msrb.mxu3 %v1549_v62  ;;  %725 = vmatmul.bf16.vlgmr.msra.gmra.mxu1 %v1972_v9  ;;  %v1684_v62 = vld [vmem:[%s2878_s0 + $0x34] sm:$0xf]  ;;  %v1690_v54 = vld [vmem:[%s2878_s0 + $0x64] sm:$0xf]  ;;  %v2218_v56 = vor.u32 %v1691_v49, %v1344_v48  ;;  %v1498_v61 = vld [vmem:[%s2877_s1 + $0x18] sm:$0xf0] }
  0x26   :  { %984 = vmatpush.bf16.msrb.mxu0 %v1613_v10  ;;  %1073 = vmatpush.bf16.msrb.mxu1 %v1677_v11  ;;  %v2104_v5 = vor.u32 %v1684_v62, %v1322_v63  ;;  %v1640_v10 = vld [vmem:[%s2877_s1 + $0x130] sm:$0xf]  ;;  %v1517_v11 = vor.u32 %v1732_v6, %v1514_v7  ;;  %v1728_v60 = vld [vmem:[%s2877_s1 + $0x14] sm:$0xf]  ;;  %v1761_v6 = vld [vmem:[%s2877_s1 + $0x114] sm:$0xf0] }
  0x27   :  { %v1641_v15 = vor.u32 %v1765_v12, %v1640_v10  ;;  %v1624_v62 = vld [vmem:[%s2877_s1 + $0x110] sm:$0xf]  ;;  %v1501_v63 = vor.u32 %v1728_v60, %v1498_v61  ;;  %v1744_v7 = vld [vmem:[%s2877_s1 + $0x94] sm:$0xf]  ;;  %v1562_v10 = vld [vmem:[%s2877_s1 + $0x98] sm:$0xf0] }
  0x28   :  { %807 = vmatpush.bf16.msrb.mxu2 %v1665_v14  ;;  %v1578_v14 = vld [vmem:[%s2877_s1 + $0xb8] sm:$0xf0]  ;;  %v1565_v12 = vor.u32 %v1744_v7, %v1562_v10  ;;  %v1694_v17 = vld [vmem:[%s2878_s0 + $0x80] sm:$0xf0]  ;;  %v1452_v18 = vld [vmem:[%s2878_s0 + $0x138] sm:$0xf] }
  0x29   :  { %896 = vmatpush.bf16.msrb.mxu3 %v1541_v13  ;;  %v1748_v13 = vld [vmem:[%s2877_s1 + $0xb4] sm:$0xf]  ;;  %v1726_v32 = vld [vmem:[%s2877_s1 + $0x4] sm:$0xf]  ;;  %v1490_v33 = vld [vmem:[%s2877_s1 + $0x8] sm:$0xf0] }
  0x2a   :  { %985 = vmatpush.bf16.msrb.mxu0 %v1605_v21  ;;  %1074 = vmatpush.bf16.msrb.mxu1 %v1669_v22  ;;  %v1581_v16 = vor.u32 %v1748_v13, %v1578_v14  ;;  %v1688_v21 = vld [vmem:[%s2878_s0 + $0x50] sm:$0xf0]  ;;  %v1428_v22 = vld [vmem:[%s2878_s0 + $0x108] sm:$0xf]  ;;  %v1626_v14 = vld [vmem:[%s2877_s1 + $0x118] sm:$0xf0] }
  0x2b   :  { %v2158_v28 = vor.u32 %v1688_v21, %v1332_v20  ;;  %v2160_v29 = vor.u32 %v1712_v23, %v1428_v22  ;;  %v1760_v13 = vld [vmem:[%s2877_s1 + $0x114] sm:$0xf]  ;;  %v1717_v20 = vld [vmem:[%s2878_s0 + $0x13c] sm:$0xf]  ;;  %v1454_v21 = vld [vmem:[%s2878_s0 + $0x144] sm:$0xf0] }
  0x2c   :  { %808 = vmatpush.bf16.msrb.mxu2 %v1657_v26  ;;  %v1687_v26 = vld [vmem:[%s2878_s0 + $0x4c] sm:$0xf]  ;;  %v1693_v22 = vld [vmem:[%s2878_s0 + $0x7c] sm:$0xf]  ;;  %v1358_v23 = vld [vmem:[%s2878_s0 + $0x84] sm:$0xf0] }
  0x2d   :  { %897 = vmatpush.bf16.msrb.mxu3 %v1533_v25  ;;  %v1430_v25 = vld [vmem:[%s2878_s0 + $0x114] sm:$0xf0]  ;;  %v1616_v34 = vld [vmem:[%s2877_s1 + $0x100] sm:$0xf]  ;;  %v1759_v36 = vld [vmem:[%s2877_s1 + $0x104] sm:$0xf0] }
  0x2e   :  { %986 = vmatpush.bf16.msrb.mxu0 %v1597_v30  ;;  %1075 = vmatpush.bf16.msrb.mxu1 %v1661_v31  ;;  %v2162_v30 = vor.u32 %v1711_v24, %v1430_v25  ;;  %v2164_v31 = vor.u32 %v1687_v26, %v1334_v27  ;;  %v2282_v26 = vor.u32 %v1717_v20, %v1454_v21  ;;  %v1742_v37 = vld [vmem:[%s2877_s1 + $0x84] sm:$0xf]  ;;  %v1554_v38 = vld [vmem:[%s2877_s1 + $0x88] sm:$0xf0]  ;;  %v1368_v48 = vld [vmem:[%s2878_s0 + $0x90] sm:$0xf] }
  0x2f   :  { %v2284_v27 = vor.u32 %v1693_v22, %v1358_v23  ;;  %v1697_v49 = vld [vmem:[%s2878_s0 + $0x98] sm:$0xf0]  ;;  %v1700_v7 = vld [vmem:[%s2878_s0 + $0xb0] sm:$0xf0]  ;;  %v1476_v10 = vld [vmem:[%s2878_s0 + $0x168] sm:$0xf] }
  0x30   :  { %809 = vmatpush.bf16.msrb.mxu2 %v1649_v51  ;;  %v1715_v51 = vld [vmem:[%s2878_s0 + $0x128] sm:$0xf0]  ;;  %v2338_v60 = vor.u32 %v1697_v49, %v1368_v48  ;;  %v2389_v20 = vld [vmem:[%s2879_s2] sm:$0x3]  ;;  %v1304_v21 = vld [vmem:[%s2878_s0 + $0x8] sm:$0xf] }
  0x31   :  { %898 = vmatpush.bf16.msrb.mxu3 %v1525_v47  ;;  %v1637_v47 = vor.u32 %v1762_v45, %v1634_v46  ;;  %v2220_v57 = vor.u32 %v1715_v51, %v1440_v50  ;;  %v1758_v45 = vld [vmem:[%s2877_s1 + $0x104] sm:$0xf]  ;;  %v1618_v46 = vld [vmem:[%s2877_s1 + $0x108] sm:$0xf0]  ;;  %v1464_v50 = vld [vmem:[%s2878_s0 + $0x150] sm:$0xf] }
  0x32   :  { %987 = vmatpush.bf16.msrb.mxu0 %v1589_v52  ;;  %1076 = vmatpush.bf16.msrb.mxu1 %v1653_v55  ;;  %v1714_v52 = vld [vmem:[%s2878_s0 + $0x124] sm:$0xf]  ;;  %v1346_v55 = vld [vmem:[%s2878_s0 + $0x6c] sm:$0xf0]  ;;  %v1721_v51 = vld [vmem:[%s2878_s0 + $0x158] sm:$0xf0] }
  0x33   :  { %641 = vmatmul.bf16.gmra.mxu0 %v2038_v40  ;;  %681 = vmatmul.bf16.gmra.mxu2 %v2040_v41  ;;  %v2222_v58 = vor.u32 %v1714_v52, %v1442_v53  ;;  %v2224_v59 = vor.u32 %v1690_v54, %v1346_v55  ;;  %v1720_v52 = vld [vmem:[%s2878_s0 + $0x154] sm:$0xf]  ;;  %v1466_v53 = vld [vmem:[%s2878_s0 + $0x15c] sm:$0xf0]  ;;  %v2340_v61 = vor.u32 %v1721_v51, %v1464_v50  ;;  %v2398_v23 = vperm.slane %v2389_v20, 0 }
  0x34   :  { %770 = vmatmul.bf16.gmra.mxu3 %v2042_v42  ;;  %810 = vmatpush.bf16.msrb.mxu2 %v1641_v15  ;;  %v1629_v15 = vor.u32 %v1760_v13, %v1626_v14  ;;  %v1696_v54 = vld [vmem:[%s2878_s0 + $0x94] sm:$0xf]  ;;  %v1370_v55 = vld [vmem:[%s2878_s0 + $0x9c] sm:$0xf0]  ;;  %v1478_v13 = vld [vmem:[%s2878_s0 + $0x174] sm:$0xf0] }
  0x35   :  { %730 = vmatmul.bf16.gmra.mxu1 %v2044_v43  ;;  %899 = vmatpush.bf16.msrb.mxu3 %v1517_v11  ;;  %v1625_v11 = vor.u32 %v1761_v6, %v1624_v62  ;;  %v2342_v62 = vor.u32 %v1720_v52, %v1466_v53  ;;  %v1380_v6 = vld [vmem:[%s2878_s0 + $0xa8] sm:$0xf]  ;;  %v1699_v14 = vld [vmem:[%s2878_s0 + $0xac] sm:$0xf]  ;;  %v1680_v22 = vld [vmem:[%s2878_s0 + $0x10] sm:$0xf0] }
  0x36   :  { %988 = vmatpush.bf16.msrb.mxu0 %v1581_v16  ;;  %1077 = vmatpush.bf16.msrb.mxu1 %v1645_v19  ;;  %v1356_v16 = vld [vmem:[%s2878_s0 + $0x78] sm:$0xf]  ;;  %v1718_v19 = vld [vmem:[%s2878_s0 + $0x140] sm:$0xf0]  ;;  %v1316_v49 = vld [vmem:[%s2878_s0 + $0x20] sm:$0xf] }
  0x37   :  { %v2278_v24 = vor.u32 %v1694_v17, %v1356_v16  ;;  %v2280_v25 = vor.u32 %v1718_v19, %v1452_v18  ;;  %v2374_v16 = vor.u32 %v1700_v7, %v1380_v6 }
  0x38   :  { %811 = vmatpush.bf16.msrb.mxu2 %v1633_v39  ;;  %v1617_v39 = vor.u32 %v1759_v36, %v1616_v34 }
  0x39   :  { %900 = vmatpush.bf16.msrb.mxu3 %v1509_v35  ;;  %v1493_v35 = vor.u32 %v1726_v32, %v1490_v33  ;;  %v1305_v32 = vor.u32 %v1680_v22, %v1304_v21 }
  0x3a   :  { %989 = vmatpush.bf16.msrb.mxu0 %v1573_v44  ;;  %1078 = vmatpush.bf16.msrb.mxu1 %v1637_v47  ;;  %v1557_v44 = vor.u32 %v1742_v37, %v1554_v38  ;;  %v1621_v47 = vor.u32 %v1758_v45, %v1618_v46 }
  0x3c   :  { %812 = vmatpush.bf16.msrb.mxu2 %v1625_v11  ;;  %v1724_v11 = vld [vmem:[%s2878_s0 + $0x170] sm:$0xf0] }
  0x3d   :  { %901 = vmatpush.bf16.msrb.mxu3 %v1501_v63  ;;  %v2344_v63 = vor.u32 %v1696_v54, %v1370_v55  ;;  %v2376_v17 = vor.u32 %v1724_v11, %v1476_v10 }
  0x3e   :  { %990 = vmatpush.bf16.msrb.mxu0 %v1565_v12  ;;  %1079 = vmatpush.bf16.msrb.mxu1 %v1629_v15  ;;  %v1723_v12 = vld [vmem:[%s2878_s0 + $0x16c] sm:$0xf]  ;;  %v1382_v15 = vld [vmem:[%s2878_s0 + $0xb4] sm:$0xf0] }
  0x3f   :  { %v2378_v18 = vor.u32 %v1723_v12, %v1478_v13  ;;  %v2380_v19 = vor.u32 %v1699_v14, %v1382_v15 }
  0x40   :  { %813 = vmatpush.bf16.msrb.mxu2 %v1617_v39 }
  0x41   :  { %902 = vmatpush.bf16.msrb.mxu3 %v1493_v35 }
  0x42   :  { %991 = vmatpush.bf16.msrb.mxu0 %v1557_v44  ;;  %1080 = vmatpush.bf16.msrb.mxu1 %v1621_v47 }
  0x43   :  { %646 = vmatmul.bf16.gmra.mxu0 %v2098_v0  ;;  %686 = vmatmul.bf16.gmra.mxu2 %v2100_v1 }
  0x44   :  { %775 = vmatmul.bf16.gmra.mxu3 %v2102_v2 }
  0x45   :  { %735 = vmatmul.bf16.gmra.mxu1 %v2104_v5 }
  0x53   :  { %651 = vmatmul.bf16.gmra.mxu0 %v2158_v28  ;;  %691 = vmatmul.bf16.gmra.mxu2 %v2160_v29 }
  0x54   :  { %780 = vmatmul.bf16.gmra.mxu3 %v2162_v30 }
  0x55   :  { %740 = vmatmul.bf16.gmra.mxu1 %v2164_v31 }
  0x63   :  { %656 = vmatmul.bf16.gmra.mxu0 %v2218_v56  ;;  %696 = vmatmul.bf16.gmra.mxu2 %v2220_v57 }
  0x64   :  { %785 = vmatmul.bf16.gmra.mxu3 %v2222_v58 }
  0x65   :  { %745 = vmatmul.bf16.gmra.mxu1 %v2224_v59 }
  0x73   :  { %661 = vmatmul.bf16.gmra.mxu0 %v2278_v24  ;;  %701 = vmatmul.bf16.gmra.mxu2 %v2280_v25 }
  0x74   :  { %790 = vmatmul.bf16.gmra.mxu3 %v2282_v26 }
  0x75   :  { %750 = vmatmul.bf16.gmra.mxu1 %v2284_v27 }
  0x83   :  { %666 = vmatmul.bf16.gmra.mxu0 %v2338_v60  ;;  %706 = vmatmul.bf16.gmra.mxu2 %v2340_v61 }
  0x84   :  { %795 = vmatmul.bf16.gmra.mxu3 %v2342_v62 }
  0x85   :  { %755 = vmatmul.bf16.gmra.mxu1 %v2344_v63 }
  0x93   :  { %671 = vmatmul.bf16.gmra.mxu0 %v2374_v16  ;;  %711 = vmatmul.bf16.gmra.mxu2 %v2376_v17 }
  0x94   :  { %800 = vmatmul.bf16.gmra.mxu3 %v2378_v18 }
  0x95   :  { %760 = vmatmul.bf16.gmra.mxu1 %v2380_v19 }
  0xa0   :  { %v637_v33 = vpop.f32.mrf.mxu0 }
  0xa1   :  { %v638_v34 = vadd.f32 %v637_v33, %v2398_v23 }
  0xa2   :  { %v726_v35 = vpop.f32.mrf.mxu1 }
  0xa3   :  { %v2401_v36 = vadd.f32 %v726_v35, %v638_v34  ;;  %814 = vmatmul.bf16.vlgmr.msrb.gmra.mxu2 %v1305_v32  ;;  %992 = vmatmul.bf16.vlgmr.msrb.gmra.mxu0 %v1972_v9 }
  0xa4   :  { %903 = vmatmul.bf16.vlgmr.msrb.gmra.mxu3 %v1957_v3  ;;  %v1683_v3 = vld [vmem:[%s2878_s0 + $0x28] sm:$0xf0] }
  0xa5   :  { %1081 = vmatmul.bf16.vlgmr.msrb.gmra.mxu1 %v1305_v32  ;;  %v1317_v52 = vor.u32 %v1683_v3, %v1316_v49  ;;  %v1328_v32 = vld [vmem:[%s2878_s0 + $0x38] sm:$0xf] }
  0xa6   :  { %v677_v37 = vpop.f32.mrf.mxu2 }
  0xa7   :  { %v678_v38 = vadd.f32 %v677_v37, %v2398_v23  ;;  %v766_v39 = vpop.f32.mrf.mxu3 }
  0xa8   :  { %v639_v44 = vpop.f32.mrf.mxu0 }
  0xa9   :  { %v2406_v45 = vadd.f32 %v766_v39, %v678_v38  ;;  %v640_v46 = vadd.f32 %v639_v44, %v2398_v23 }
  0xaa   :  { %v728_v47 = vpop.f32.mrf.mxu1 }
  0xab   :  { %v2409_v48 = vadd.f32 %v728_v47, %v640_v46 }
  0xae   :  { %v679_v9 = vpop.f32.mrf.mxu2 }
  0xaf   :  { %v680_v50 = vadd.f32 %v679_v9, %v2398_v23  ;;  %v768_v51 = vpop.f32.mrf.mxu3 }
  0xb0   :  { %v642_v53 = vpop.f32.mrf.mxu0 }
  0xb1   :  { %v2418_v54 = vadd.f32 %v768_v51, %v680_v50  ;;  %v643_v55 = vadd.f32 %v642_v53, %v2398_v23 }
  0xb2   :  { %v731_v6 = vpop.f32.mrf.mxu1 }
  0xb3   :  { %v2421_v7 = vadd.f32 %v731_v6, %v643_v55  ;;  %819 = vmatmul.bf16.gmra.mxu2 %v1317_v52  ;;  %997 = vmatmul.bf16.gmra.mxu0 %v2044_v43  ;;  %v1340_v55 = vld [vmem:[%s2878_s0 + $0x50] sm:$0xf] }
  0xb4   :  { %908 = vmatmul.bf16.gmra.mxu3 %v2038_v40  ;;  %v1686_v40 = vld [vmem:[%s2878_s0 + $0x40] sm:$0xf0] }
  0xb5   :  { %1086 = vmatmul.bf16.gmra.mxu1 %v1317_v52  ;;  %v1329_v35 = vor.u32 %v1686_v40, %v1328_v32 }
  0xb6   :  { %v682_v10 = vpop.f32.mrf.mxu2 }
  0xb7   :  { %v683_v11 = vadd.f32 %v682_v10, %v2398_v23  ;;  %v771_v12 = vpop.f32.mrf.mxu3 }
  0xb8   :  { %v644_v13 = vpop.f32.mrf.mxu0 }
  0xb9   :  { %v2426_v14 = vadd.f32 %v771_v12, %v683_v11  ;;  %v645_v15 = vadd.f32 %v644_v13, %v2398_v23 }
  0xba   :  { %v733_v21 = vpop.f32.mrf.mxu1 }
  0xbb   :  { %v2429_v22 = vadd.f32 %v733_v21, %v645_v15 }
  0xbe   :  { %v684_v43 = vpop.f32.mrf.mxu2 }
  0xbf   :  { %v685_v33 = vadd.f32 %v684_v43, %v2398_v23  ;;  %v773_v34 = vpop.f32.mrf.mxu3 }
  0xc0   :  { %v647_v37 = vpop.f32.mrf.mxu0 }
  0xc1   :  { %v2438_v38 = vadd.f32 %v773_v34, %v685_v33  ;;  %v648_v39 = vadd.f32 %v647_v37, %v2398_v23 }
  0xc2   :  { %v736_v44 = vpop.f32.mrf.mxu1 }
  0xc3   :  { %v2441_v46 = vadd.f32 %v736_v44, %v648_v39  ;;  %824 = vmatmul.bf16.gmra.mxu2 %v1329_v35  ;;  %1002 = vmatmul.bf16.gmra.mxu0 %v2104_v5 }
  0xc4   :  { %913 = vmatmul.bf16.gmra.mxu3 %v2098_v0  ;;  %v1689_v0 = vld [vmem:[%s2878_s0 + $0x58] sm:$0xf0] }
  0xc5   :  { %1091 = vmatmul.bf16.gmra.mxu1 %v1329_v35  ;;  %v1341_v11 = vor.u32 %v1689_v0, %v1340_v55 }
  0xc6   :  { %v687_v47 = vpop.f32.mrf.mxu2 }
  0xc7   :  { %v688_v49 = vadd.f32 %v687_v47, %v2398_v23  ;;  %v776_v3 = vpop.f32.mrf.mxu3  ;;  %v1352_v47 = vld [vmem:[%s2878_s0 + $0x68] sm:$0xf] }
  0xc8   :  { %v649_v9 = vpop.f32.mrf.mxu0 }
  0xc9   :  { %v2446_v50 = vadd.f32 %v776_v3, %v688_v49  ;;  %v650_v51 = vadd.f32 %v649_v9, %v2398_v23 }
  0xca   :  { %v738_v52 = vpop.f32.mrf.mxu1 }
  0xcb   :  { %v2449_v53 = vadd.f32 %v738_v52, %v650_v51 }
  0xce   :  { %v689_v5 = vpop.f32.mrf.mxu2 }
  0xcf   :  { %v690_v6 = vadd.f32 %v689_v5, %v2398_v23  ;;  %v778_v10 = vpop.f32.mrf.mxu3 }
  0xd0   :  { %v652_v12 = vpop.f32.mrf.mxu0 }
  0xd1   :  { %v2458_v13 = vadd.f32 %v778_v10, %v690_v6  ;;  %v653_v15 = vadd.f32 %v652_v12, %v2398_v23 }
  0xd2   :  { %v741_v21 = vpop.f32.mrf.mxu1 }
  0xd3   :  { %v2461_v32 = vadd.f32 %v741_v21, %v653_v15  ;;  %829 = vmatmul.bf16.gmra.mxu2 %v1341_v11  ;;  %1007 = vmatmul.bf16.gmra.mxu0 %v2164_v31 }
  0xd4   :  { %918 = vmatmul.bf16.gmra.mxu3 %v2158_v28  ;;  %v1692_v28 = vld [vmem:[%s2878_s0 + $0x70] sm:$0xf0] }
  0xd5   :  { %1096 = vmatmul.bf16.gmra.mxu1 %v1341_v11  ;;  %v1353_v9 = vor.u32 %v1692_v28, %v1352_v47 }
  0xd6   :  { %v692_v40 = vpop.f32.mrf.mxu2 }
  0xd7   :  { %v693_v43 = vadd.f32 %v692_v40, %v2398_v23  ;;  %v781_v33 = vpop.f32.mrf.mxu3 }
  0xd8   :  { %v654_v34 = vpop.f32.mrf.mxu0 }
  0xd9   :  { %v2466_v35 = vadd.f32 %v781_v33, %v693_v43  ;;  %v655_v37 = vadd.f32 %v654_v34, %v2398_v23  ;;  %v1364_v33 = vld [vmem:[%s2878_s0 + $0x80] sm:$0xf] }
  0xda   :  { %v743_v39 = vpop.f32.mrf.mxu1 }
  0xdb   :  { %v2469_v44 = vadd.f32 %v743_v39, %v655_v37 }
  0xde   :  { %v694_v31 = vpop.f32.mrf.mxu2 }
  0xdf   :  { %v695_v49 = vadd.f32 %v694_v31, %v2398_v23  ;;  %v783_v3 = vpop.f32.mrf.mxu3 }
  0xe0   :  { %v657_v51 = vpop.f32.mrf.mxu0 }
  0xe1   :  { %v2478_v52 = vadd.f32 %v783_v3, %v695_v49  ;;  %v658_v55 = vadd.f32 %v657_v51, %v2398_v23 }
  0xe2   :  { %v746_v0 = vpop.f32.mrf.mxu1 }
  0xe3   :  { %v2481_v5 = vadd.f32 %v746_v0, %v658_v55  ;;  %834 = vmatmul.bf16.gmra.mxu2 %v1353_v9  ;;  %1012 = vmatmul.bf16.gmra.mxu0 %v2224_v59 }
  0xe4   :  { %923 = vmatmul.bf16.gmra.mxu3 %v2218_v56  ;;  %v1695_v56 = vld [vmem:[%s2878_s0 + $0x88] sm:$0xf0] }
  0xe5   :  { %1101 = vmatmul.bf16.gmra.mxu1 %v1353_v9  ;;  %v1365_v39 = vor.u32 %v1695_v56, %v1364_v33 }
  0xe6   :  { %v697_v6 = vpop.f32.mrf.mxu2 }
  0xe7   :  { %v698_v10 = vadd.f32 %v697_v6, %v2398_v23  ;;  %v786_v11 = vpop.f32.mrf.mxu3 }
  0xe8   :  { %v659_v12 = vpop.f32.mrf.mxu0 }
  0xe9   :  { %v2486_v15 = vadd.f32 %v786_v11, %v698_v10  ;;  %v660_v21 = vadd.f32 %v659_v12, %v2398_v23 }
  0xea   :  { %v748_v40 = vpop.f32.mrf.mxu1 }
  0xeb   :  { %v2489_v43 = vadd.f32 %v748_v40, %v660_v21  ;;  %v1376_v21 = vld [vmem:[%s2878_s0 + $0x98] sm:$0xf] }
  0xee   :  { %v699_v59 = vpop.f32.mrf.mxu2 }
  0xef   :  { %v700_v34 = vadd.f32 %v699_v59, %v2398_v23  ;;  %v788_v37 = vpop.f32.mrf.mxu3 }
  0xf0   :  { %v662_v47 = vpop.f32.mrf.mxu0 }
  0xf1   :  { %v2498_v28 = vadd.f32 %v788_v37, %v700_v34  ;;  %v663_v31 = vadd.f32 %v662_v47, %v2398_v23 }
  0xf2   :  { %v751_v49 = vpop.f32.mrf.mxu1 }
  0xf3   :  { %v2501_v3 = vadd.f32 %v751_v49, %v663_v31  ;;  %839 = vmatmul.bf16.gmra.mxu2 %v1365_v39  ;;  %1017 = vmatmul.bf16.gmra.mxu0 %v2284_v27 }
  0xf4   :  { %928 = vmatmul.bf16.gmra.mxu3 %v2278_v24  ;;  %v1698_v24 = vld [vmem:[%s2878_s0 + $0xa0] sm:$0xf0] }
  0xf5   :  { %1106 = vmatmul.bf16.gmra.mxu1 %v1365_v39  ;;  %v1377_v56 = vor.u32 %v1698_v24, %v1376_v21  ;;  %v1388_v21 = vld [vmem:[%s2878_s0 + $0xb0] sm:$0xf] }
  0xf6   :  { %v702_v9 = vpop.f32.mrf.mxu2 }
  0xf7   :  { %v703_v51 = vadd.f32 %v702_v9, %v2398_v23  ;;  %v791_v55 = vpop.f32.mrf.mxu3 }
  0xf8   :  { %v664_v0 = vpop.f32.mrf.mxu0 }
  0xf9   :  { %v2506_v6 = vadd.f32 %v791_v55, %v703_v51  ;;  %v665_v10 = vadd.f32 %v664_v0, %v2398_v23 }
  0xfa   :  { %v753_v11 = vpop.f32.mrf.mxu1 }
  0xfb   :  { %v2509_v12 = vadd.f32 %v753_v11, %v665_v10 }
  0xfe   :  { %v704_v27 = vpop.f32.mrf.mxu2 }
  0xff   :  { %v705_v40 = vadd.f32 %v704_v27, %v2398_v23  ;;  %v793_v33 = vpop.f32.mrf.mxu3 }
 0x100   :  { %v667_v59 = vpop.f32.mrf.mxu0 }
 0x101   :  { %v2518_v34 = vadd.f32 %v793_v33, %v705_v40  ;;  %v668_v37 = vadd.f32 %v667_v59, %v2398_v23 }
 0x102   :  { %v756_v39 = vpop.f32.mrf.mxu1 }
 0x103   :  { %v2521_v47 = vadd.f32 %v756_v39, %v668_v37  ;;  %844 = vmatmul.bf16.gmra.mxu2 %v1377_v56  ;;  %1022 = vmatmul.bf16.gmra.mxu0 %v2344_v63 }
 0x104   :  { %933 = vmatmul.bf16.gmra.mxu3 %v2338_v60  ;;  %v1701_v60 = vld [vmem:[%s2878_s0 + $0xb8] sm:$0xf0] }
 0x105   :  { %1111 = vmatmul.bf16.gmra.mxu1 %v1377_v56  ;;  %v1389_v40 = vor.u32 %v1701_v60, %v1388_v21 }
 0x106   :  { %v707_v31 = vpop.f32.mrf.mxu2 }
 0x107   :  { %v708_v49 = vadd.f32 %v707_v31, %v2398_v23  ;;  %v796_v9 = vpop.f32.mrf.mxu3 }
 0x108   :  { %v669_v51 = vpop.f32.mrf.mxu0 }
 0x109   :  { %v2526_v55 = vadd.f32 %v796_v9, %v708_v49  ;;  %v670_v0 = vadd.f32 %v669_v51, %v2398_v23 }
 0x10a   :  { %v758_v10 = vpop.f32.mrf.mxu1 }
 0x10b   :  { %v2529_v11 = vadd.f32 %v758_v10, %v670_v0 }
 0x10e   :  { %v709_v63 = vpop.f32.mrf.mxu2 }
 0x10f   :  { %v710_v24 = vadd.f32 %v709_v63, %v2398_v23  ;;  %v798_v27 = vpop.f32.mrf.mxu3  ;;  %v1400_v63 = vld [vmem:[%s2878_s0 + $0xc8] sm:$0xf] }
 0x110   :  { %v672_v33 = vpop.f32.mrf.mxu0 }
 0x111   :  { %v2538_v56 = vadd.f32 %v798_v27, %v710_v24  ;;  %v673_v59 = vadd.f32 %v672_v33, %v2398_v23 }
 0x112   :  { %v761_v37 = vpop.f32.mrf.mxu1 }
 0x113   :  { %v2541_v39 = vadd.f32 %v761_v37, %v673_v59  ;;  %849 = vmatmul.bf16.gmra.mxu2 %v1389_v40  ;;  %1027 = vmatmul.bf16.gmra.mxu0 %v2380_v19 }
 0x114   :  { %938 = vmatmul.bf16.gmra.mxu3 %v2374_v16  ;;  %v1704_v16 = vld [vmem:[%s2878_s0 + $0xd0] sm:$0xf0] }
 0x115   :  { %1116 = vmatmul.bf16.gmra.mxu1 %v1389_v40  ;;  %v1401_v40 = vor.u32 %v1704_v16, %v1400_v63 }
 0x116   :  { %v712_v31 = vpop.f32.mrf.mxu2 }
 0x117   :  { %v713_v49 = vadd.f32 %v712_v31, %v2398_v23  ;;  %v801_v9 = vpop.f32.mrf.mxu3  ;;  %v2563_v31 = vperm.slane %v2389_v20, 1  ;;  %v1707_v20 = vld [vmem:[%s2878_s0 + $0xe8] sm:$0xf0] }
 0x118   :  { %v674_v51 = vpop.f32.mrf.mxu0 }
 0x119   :  { %v2546_v0 = vadd.f32 %v801_v9, %v713_v49  ;;  %v675_v10 = vadd.f32 %v674_v51, %v2398_v23 }
 0x11a   :  { %v763_v21 = vpop.f32.mrf.mxu1 }
 0x11b   :  { %v2549_v60 = vadd.f32 %v763_v21, %v675_v10 }
 0x11e   :  { %v714_v19 = vpop.f32.mrf.mxu2 }
 0x11f   :  { %v715_v24 = vadd.f32 %v714_v19, %v2398_v23  ;;  %v803_v27 = vpop.f32.mrf.mxu3 }
 0x120   :  { %v993_v33 = vpop.f32.mrf.mxu0 }
 0x121   :  { %v2558_v59 = vadd.f32 %v803_v27, %v715_v24 }
 0x122   :  { %v1082_v37 = vpop.f32.mrf.mxu1 }
 0x123   :  { %854 = vmatmul.bf16.gmra.mxu2 %v1401_v40  ;;  %1032 = vmatmul.bf16.gmra.mxu0 %v1970_v8 }
 0x124   :  { %943 = vmatmul.bf16.gmra.mxu3 %v1959_v4  ;;  %v1412_v4 = vld [vmem:[%s2878_s0 + $0xe0] sm:$0xf] }
 0x125   :  { %1121 = vmatmul.bf16.gmra.mxu1 %v1401_v40  ;;  %v1413_v40 = vor.u32 %v1707_v20, %v1412_v4 }
 0x126   :  { %v815_v49 = vpop.f32.mrf.mxu2 }
 0x127   :  { %v816_v9 = vadd.f32 %v815_v49, %v2401_v36  ;;  %v904_v51 = vpop.f32.mrf.mxu3 }
 0x128   :  { %v905_v23 = vadd.f32 %v904_v51, %v2563_v31  ;;  %v995_v10 = vpop.f32.mrf.mxu0 }
 0x129   :  { %v1162_v21 = vmax.f32 %v816_v9, 0.0 }
 0x12a   :  { %v1084_v63 = vpop.f32.mrf.mxu1  ;;  %v994_v16 = vadd.f32 %v993_v33, %v905_v23 }
 0x12b   :  { %1226 = vst [vmem:[%s2880_s3] sm:$0xff] %v1162_v21 }
 0x12c   :  { %v1083_v8 = vadd.f32 %v1082_v37, %v994_v16 }
 0x12e   :  { %v1163_v36 = vmax.f32 %v1083_v8, 0.0  ;;  %v817_v19 = vpop.f32.mrf.mxu2 }
 0x12f   :  { %v818_v24 = vadd.f32 %v817_v19, %v2409_v48  ;;  %v906_v27 = vpop.f32.mrf.mxu3 }
 0x130   :  { %1227 = vst [vmem:[%s2880_s3 + $0x8] sm:$0xff] %v1163_v36  ;;  %v907_v33 = vadd.f32 %v906_v27, %v2563_v31  ;;  %v998_v37 = vpop.f32.mrf.mxu0 }
 0x131   :  { %v1164_v49 = vmax.f32 %v818_v24, 0.0 }
 0x132   :  { %v1087_v9 = vpop.f32.mrf.mxu1  ;;  %v996_v51 = vadd.f32 %v995_v10, %v907_v33 }
 0x133   :  { %1228 = vst [vmem:[%s2880_s3 + $0x10] sm:$0xff] %v1164_v49  ;;  %859 = vmatmul.bf16.gmra.mxu2 %v1413_v40  ;;  %1037 = vmatmul.bf16.gmra.mxu0 %v2042_v42  ;;  %v1424_v42 = vld [vmem:[%s2878_s0 + $0xf8] sm:$0xf] }
 0x134   :  { %v1085_v48 = vadd.f32 %v1084_v63, %v996_v51  ;;  %948 = vmatmul.bf16.gmra.mxu3 %v2040_v41 }
 0x135   :  { %1126 = vmatmul.bf16.gmra.mxu1 %v1413_v40 }
 0x136   :  { %v1165_v23 = vmax.f32 %v1085_v48, 0.0  ;;  %v820_v21 = vpop.f32.mrf.mxu2 }
 0x137   :  { %v821_v16 = vadd.f32 %v820_v21, %v2421_v7  ;;  %v909_v8 = vpop.f32.mrf.mxu3  ;;  %v1710_v7 = vld [vmem:[%s2878_s0 + $0x100] sm:$0xf0] }
 0x138   :  { %1229 = vst [vmem:[%s2880_s3 + $0x18] sm:$0xff] %v1165_v23  ;;  %v910_v10 = vadd.f32 %v909_v8, %v2563_v31  ;;  %v1000_v4 = vpop.f32.mrf.mxu0  ;;  %v1425_v33 = vor.u32 %v1710_v7, %v1424_v42 }
 0x139   :  { %v1166_v20 = vmax.f32 %v821_v16, 0.0 }
 0x13a   :  { %v1089_v36 = vpop.f32.mrf.mxu1  ;;  %v999_v19 = vadd.f32 %v998_v37, %v910_v10 }
 0x13b   :  { %1230 = vst [vmem:[%s2880_s3 + $0x20] sm:$0xff] %v1166_v20 }
 0x13c   :  { %v1088_v41 = vadd.f32 %v1087_v9, %v999_v19 }
 0x13e   :  { %v1167_v63 = vmax.f32 %v1088_v41, 0.0  ;;  %v822_v24 = vpop.f32.mrf.mxu2 }
 0x13f   :  { %v823_v27 = vadd.f32 %v822_v24, %v2429_v22  ;;  %v911_v40 = vpop.f32.mrf.mxu3 }
 0x140   :  { %1231 = vst [vmem:[%s2880_s3 + $0x28] sm:$0xff] %v1167_v63  ;;  %v912_v37 = vadd.f32 %v911_v40, %v2563_v31  ;;  %v1003_v49 = vpop.f32.mrf.mxu0 }
 0x141   :  { %v1168_v9 = vmax.f32 %v823_v27, 0.0 }
 0x142   :  { %v1092_v51 = vpop.f32.mrf.mxu1  ;;  %v1001_v48 = vadd.f32 %v1000_v4, %v912_v37 }
 0x143   :  { %1232 = vst [vmem:[%s2880_s3 + $0x30] sm:$0xff] %v1168_v9  ;;  %864 = vmatmul.bf16.gmra.mxu2 %v1425_v33  ;;  %1042 = vmatmul.bf16.gmra.mxu0 %v2102_v2  ;;  %v1436_v2 = vld [vmem:[%s2878_s0 + $0x110] sm:$0xf] }
 0x144   :  { %v1090_v22 = vadd.f32 %v1089_v36, %v1001_v48  ;;  %953 = vmatmul.bf16.gmra.mxu3 %v2100_v1 }
 0x145   :  { %1131 = vmatmul.bf16.gmra.mxu1 %v1425_v33 }
 0x146   :  { %v1169_v23 = vmax.f32 %v1090_v22, 0.0  ;;  %v825_v21 = vpop.f32.mrf.mxu2 }
 0x147   :  { %v826_v16 = vadd.f32 %v825_v21, %v2441_v46  ;;  %v914_v8 = vpop.f32.mrf.mxu3  ;;  %v1713_v46 = vld [vmem:[%s2878_s0 + $0x118] sm:$0xf0] }
 0x148   :  { %1233 = vst [vmem:[%s2880_s3 + $0x38] sm:$0xff] %v1169_v23  ;;  %v915_v10 = vadd.f32 %v914_v8, %v2563_v31  ;;  %v1005_v4 = vpop.f32.mrf.mxu0  ;;  %v1437_v24 = vor.u32 %v1713_v46, %v1436_v2 }
 0x149   :  { %v1170_v20 = vmax.f32 %v826_v16, 0.0 }
 0x14a   :  { %v1094_v19 = vpop.f32.mrf.mxu1  ;;  %v1004_v41 = vadd.f32 %v1003_v49, %v915_v10 }
 0x14b   :  { %1234 = vst [vmem:[%s2880_s3 + $0x40] sm:$0xff] %v1170_v20 }
 0x14c   :  { %v1093_v1 = vadd.f32 %v1092_v51, %v1004_v41 }
 0x14e   :  { %v1171_v36 = vmax.f32 %v1093_v1, 0.0  ;;  %v827_v42 = vpop.f32.mrf.mxu2 }
 0x14f   :  { %v828_v7 = vadd.f32 %v827_v42, %v2449_v53  ;;  %v916_v63 = vpop.f32.mrf.mxu3 }
 0x150   :  { %1235 = vst [vmem:[%s2880_s3 + $0x48] sm:$0xff] %v1171_v36  ;;  %v917_v27 = vadd.f32 %v916_v63, %v2563_v31  ;;  %v1008_v40 = vpop.f32.mrf.mxu0 }
 0x151   :  { %v1172_v33 = vmax.f32 %v828_v7, 0.0 }
 0x152   :  { %v1097_v37 = vpop.f32.mrf.mxu1  ;;  %v1006_v49 = vadd.f32 %v1005_v4, %v917_v27 }
 0x153   :  { %1236 = vst [vmem:[%s2880_s3 + $0x50] sm:$0xff] %v1172_v33  ;;  %869 = vmatmul.bf16.gmra.mxu2 %v1437_v24  ;;  %1047 = vmatmul.bf16.gmra.mxu0 %v2162_v30  ;;  %v1448_v30 = vld [vmem:[%s2878_s0 + $0x128] sm:$0xf] }
 0x154   :  { %v1095_v53 = vadd.f32 %v1094_v19, %v1006_v49  ;;  %958 = vmatmul.bf16.gmra.mxu3 %v2160_v29 }
 0x155   :  { %1136 = vmatmul.bf16.gmra.mxu1 %v1437_v24 }
 0x156   :  { %v1173_v9 = vmax.f32 %v1095_v53, 0.0  ;;  %v830_v51 = vpop.f32.mrf.mxu2 }
 0x157   :  { %v831_v48 = vadd.f32 %v830_v51, %v2461_v32  ;;  %v919_v22 = vpop.f32.mrf.mxu3  ;;  %v1716_v32 = vld [vmem:[%s2878_s0 + $0x130] sm:$0xf0] }
 0x158   :  { %1237 = vst [vmem:[%s2880_s3 + $0x58] sm:$0xff] %v1173_v9  ;;  %v920_v23 = vadd.f32 %v919_v22, %v2563_v31  ;;  %v1010_v21 = vpop.f32.mrf.mxu0  ;;  %v1449_v1 = vor.u32 %v1716_v32, %v1448_v30 }
 0x159   :  { %v1174_v16 = vmax.f32 %v831_v48, 0.0 }
 0x15a   :  { %v1099_v8 = vpop.f32.mrf.mxu1  ;;  %v1009_v10 = vadd.f32 %v1008_v40, %v920_v23 }
 0x15b   :  { %1238 = vst [vmem:[%s2880_s3 + $0x60] sm:$0xff] %v1174_v16 }
 0x15c   :  { %v1098_v29 = vadd.f32 %v1097_v37, %v1009_v10 }
 0x15e   :  { %v1175_v4 = vmax.f32 %v1098_v29, 0.0  ;;  %v832_v20 = vpop.f32.mrf.mxu2 }
 0x15f   :  { %v833_v19 = vadd.f32 %v832_v20, %v2469_v44  ;;  %v921_v41 = vpop.f32.mrf.mxu3 }
 0x160   :  { %1239 = vst [vmem:[%s2880_s3 + $0x68] sm:$0xff] %v1175_v4  ;;  %v922_v2 = vadd.f32 %v921_v41, %v2563_v31  ;;  %v1013_v46 = vpop.f32.mrf.mxu0 }
 0x161   :  { %v1176_v36 = vmax.f32 %v833_v19, 0.0 }
 0x162   :  { %v1102_v42 = vpop.f32.mrf.mxu1  ;;  %v1011_v7 = vadd.f32 %v1010_v21, %v922_v2 }
 0x163   :  { %1240 = vst [vmem:[%s2880_s3 + $0x70] sm:$0xff] %v1176_v36  ;;  %874 = vmatmul.bf16.gmra.mxu2 %v1449_v1  ;;  %1052 = vmatmul.bf16.gmra.mxu0 %v2222_v58  ;;  %v1460_v58 = vld [vmem:[%s2878_s0 + $0x140] sm:$0xf] }
 0x164   :  { %v1100_v44 = vadd.f32 %v1099_v8, %v1011_v7  ;;  %963 = vmatmul.bf16.gmra.mxu3 %v2220_v57 }
 0x165   :  { %1141 = vmatmul.bf16.gmra.mxu1 %v1449_v1 }
 0x166   :  { %v1177_v63 = vmax.f32 %v1100_v44, 0.0  ;;  %v835_v24 = vpop.f32.mrf.mxu2 }
 0x167   :  { %v836_v27 = vadd.f32 %v835_v24, %v2481_v5  ;;  %v924_v40 = vpop.f32.mrf.mxu3  ;;  %v1719_v5 = vld [vmem:[%s2878_s0 + $0x148] sm:$0xf0] }
 0x168   :  { %1241 = vst [vmem:[%s2880_s3 + $0x78] sm:$0xff] %v1177_v63  ;;  %v925_v33 = vadd.f32 %v924_v40, %v2563_v31  ;;  %v1015_v37 = vpop.f32.mrf.mxu0  ;;  %v1461_v21 = vor.u32 %v1719_v5, %v1460_v58 }
 0x169   :  { %v1178_v49 = vmax.f32 %v836_v27, 0.0 }
 0x16a   :  { %v1104_v53 = vpop.f32.mrf.mxu1  ;;  %v1014_v9 = vadd.f32 %v1013_v46, %v925_v33 }
 0x16b   :  { %1242 = vst [vmem:[%s2880_s3 + $0x80] sm:$0xff] %v1178_v49 }
 0x16c   :  { %v1103_v57 = vadd.f32 %v1102_v42, %v1014_v9 }
 0x16e   :  { %v1179_v51 = vmax.f32 %v1103_v57, 0.0  ;;  %v837_v48 = vpop.f32.mrf.mxu2 }
 0x16f   :  { %v838_v22 = vadd.f32 %v837_v48, %v2489_v43  ;;  %v926_v23 = vpop.f32.mrf.mxu3 }
 0x170   :  { %1243 = vst [vmem:[%s2880_s3 + $0x88] sm:$0xff] %v1179_v51  ;;  %v927_v16 = vadd.f32 %v926_v23, %v2563_v31  ;;  %v1018_v8 = vpop.f32.mrf.mxu0 }
 0x171   :  { %v1180_v10 = vmax.f32 %v838_v22, 0.0 }
 0x172   :  { %v1107_v29 = vpop.f32.mrf.mxu1  ;;  %v1016_v30 = vadd.f32 %v1015_v37, %v927_v16 }
 0x173   :  { %1244 = vst [vmem:[%s2880_s3 + $0x90] sm:$0xff] %v1180_v10  ;;  %879 = vmatmul.bf16.gmra.mxu2 %v1461_v21  ;;  %1057 = vmatmul.bf16.gmra.mxu0 %v2282_v26  ;;  %v1472_v26 = vld [vmem:[%s2878_s0 + $0x158] sm:$0xf] }
 0x174   :  { %v1105_v43 = vadd.f32 %v1104_v53, %v1016_v30  ;;  %968 = vmatmul.bf16.gmra.mxu3 %v2280_v25 }
 0x175   :  { %1146 = vmatmul.bf16.gmra.mxu1 %v1461_v21 }
 0x176   :  { %v1181_v32 = vmax.f32 %v1105_v43, 0.0  ;;  %v840_v4 = vpop.f32.mrf.mxu2 }
 0x177   :  { %v841_v20 = vadd.f32 %v840_v4, %v2501_v3  ;;  %v929_v19 = vpop.f32.mrf.mxu3  ;;  %v1722_v3 = vld [vmem:[%s2878_s0 + $0x160] sm:$0xf0] }
 0x178   :  { %1245 = vst [vmem:[%s2880_s3 + $0x98] sm:$0xff] %v1181_v32  ;;  %v930_v41 = vadd.f32 %v929_v19, %v2563_v31  ;;  %v1020_v1 = vpop.f32.mrf.mxu0  ;;  %v1473_v24 = vor.u32 %v1722_v3, %v1472_v26 }
 0x179   :  { %v1182_v2 = vmax.f32 %v841_v20, 0.0 }
 0x17a   :  { %v1109_v46 = vpop.f32.mrf.mxu1  ;;  %v1019_v36 = vadd.f32 %v1018_v8, %v930_v41 }
 0x17b   :  { %1246 = vst [vmem:[%s2880_s3 + $0xa0] sm:$0xff] %v1182_v2 }
 0x17c   :  { %v1108_v25 = vadd.f32 %v1107_v29, %v1019_v36 }
 0x17e   :  { %v1183_v42 = vmax.f32 %v1108_v25, 0.0  ;;  %v842_v7 = vpop.f32.mrf.mxu2 }
 0x17f   :  { %v843_v44 = vadd.f32 %v842_v7, %v2509_v12  ;;  %v931_v63 = vpop.f32.mrf.mxu3 }
 0x180   :  { %1247 = vst [vmem:[%s2880_s3 + $0xa8] sm:$0xff] %v1183_v42  ;;  %v932_v27 = vadd.f32 %v931_v63, %v2563_v31  ;;  %v1023_v40 = vpop.f32.mrf.mxu0 }
 0x181   :  { %v1184_v33 = vmax.f32 %v843_v44, 0.0 }
 0x182   :  { %v1112_v37 = vpop.f32.mrf.mxu1  ;;  %v1021_v49 = vadd.f32 %v1020_v1, %v932_v27 }
 0x183   :  { %1248 = vst [vmem:[%s2880_s3 + $0xb0] sm:$0xff] %v1184_v33  ;;  %884 = vmatmul.bf16.gmra.mxu2 %v1473_v24  ;;  %1062 = vmatmul.bf16.gmra.mxu0 %v2342_v62  ;;  %v1484_v62 = vld [vmem:[%s2878_s0 + $0x170] sm:$0xf] }
 0x184   :  { %v1110_v12 = vadd.f32 %v1109_v46, %v1021_v49  ;;  %973 = vmatmul.bf16.gmra.mxu3 %v2340_v61 }
 0x185   :  { %1151 = vmatmul.bf16.gmra.mxu1 %v1473_v24 }
 0x186   :  { %v1185_v53 = vmax.f32 %v1110_v12, 0.0  ;;  %v845_v9 = vpop.f32.mrf.mxu2 }
 0x187   :  { %v846_v57 = vadd.f32 %v845_v9, %v2521_v47  ;;  %v934_v58 = vpop.f32.mrf.mxu3  ;;  %v1725_v47 = vld [vmem:[%s2878_s0 + $0x178] sm:$0xf0] }
 0x188   :  { %1249 = vst [vmem:[%s2880_s3 + $0xb8] sm:$0xff] %v1185_v53  ;;  %v935_v5 = vadd.f32 %v934_v58, %v2563_v31  ;;  %v1025_v51 = vpop.f32.mrf.mxu0  ;;  %v1485_v29 = vor.u32 %v1725_v47, %v1484_v62 }
 0x189   :  { %v1186_v48 = vmax.f32 %v846_v57, 0.0 }
 0x18a   :  { %v1114_v22 = vpop.f32.mrf.mxu1  ;;  %v1024_v23 = vadd.f32 %v1023_v40, %v935_v5 }
 0x18b   :  { %1250 = vst [vmem:[%s2880_s3 + $0xc0] sm:$0xff] %v1186_v48 }
 0x18c   :  { %v1113_v61 = vadd.f32 %v1112_v37, %v1024_v23 }
 0x18e   :  { %v1187_v21 = vmax.f32 %v1113_v61, 0.0  ;;  %v847_v16 = vpop.f32.mrf.mxu2 }
 0x18f   :  { %v848_v8 = vadd.f32 %v847_v16, %v2529_v11  ;;  %v936_v10 = vpop.f32.mrf.mxu3 }
 0x190   :  { %1251 = vst [vmem:[%s2880_s3 + $0xc8] sm:$0xff] %v1187_v21  ;;  %v937_v30 = vadd.f32 %v936_v10, %v2563_v31  ;;  %v1028_v43 = vpop.f32.mrf.mxu0 }
 0x191   :  { %v1188_v32 = vmax.f32 %v848_v8, 0.0 }
 0x192   :  { %v1117_v4 = vpop.f32.mrf.mxu1  ;;  %v1026_v20 = vadd.f32 %v1025_v51, %v937_v30 }
 0x193   :  { %1252 = vst [vmem:[%s2880_s3 + $0xd0] sm:$0xff] %v1188_v32  ;;  %889 = vmatmul.bf16.gmra.mxu2 %v1485_v29  ;;  %1067 = vmatmul.bf16.gmra.mxu0 %v2378_v18 }
 0x194   :  { %v1115_v11 = vadd.f32 %v1114_v22, %v1026_v20  ;;  %978 = vmatmul.bf16.gmra.mxu3 %v2376_v17 }
 0x195   :  { %1156 = vmatmul.bf16.gmra.mxu1 %v1485_v29 }
 0x196   :  { %v1189_v19 = vmax.f32 %v1115_v11, 0.0  ;;  %v850_v41 = vpop.f32.mrf.mxu2 }
 0x197   :  { %v851_v1 = vadd.f32 %v850_v41, %v2541_v39  ;;  %v939_v2 = vpop.f32.mrf.mxu3 }
 0x198   :  { %1253 = vst [vmem:[%s2880_s3 + $0xd8] sm:$0xff] %v1189_v19  ;;  %v940_v46 = vadd.f32 %v939_v2, %v2563_v31  ;;  %v1030_v36 = vpop.f32.mrf.mxu0 }
 0x199   :  { %v1190_v25 = vmax.f32 %v851_v1, 0.0 }
 0x19a   :  { %v1119_v26 = vpop.f32.mrf.mxu1  ;;  %v1029_v3 = vadd.f32 %v1028_v43, %v940_v46 }
 0x19b   :  { %1254 = vst [vmem:[%s2880_s3 + $0xe0] sm:$0xff] %v1190_v25 }
 0x19c   :  { %v1118_v17 = vadd.f32 %v1117_v4, %v1029_v3 }
 0x19e   :  { %v1191_v18 = vmax.f32 %v1118_v17, 0.0  ;;  %v852_v42 = vpop.f32.mrf.mxu2 }
 0x19f   :  { %v853_v39 = vadd.f32 %v852_v42, %v2549_v60  ;;  %v941_v7 = vpop.f32.mrf.mxu3 }
 0x1a0   :  { %1255 = vst [vmem:[%s2880_s3 + $0xe8] sm:$0xff] %v1191_v18  ;;  %v942_v44 = vadd.f32 %v941_v7, %v2563_v31  ;;  %v1033_v63 = vpop.f32.mrf.mxu0 }
 0x1a1   :  { %v1192_v24 = vmax.f32 %v853_v39, 0.0 }
 0x1a2   :  { %v1122_v27 = vpop.f32.mrf.mxu1  ;;  %v1031_v40 = vadd.f32 %v1030_v36, %v942_v44 }
 0x1a3   :  { %1256 = vst [vmem:[%s2880_s3 + $0xf0] sm:$0xff] %v1192_v24 }
 0x1a4   :  { %v1120_v33 = vadd.f32 %v1119_v26, %v1031_v40 }
 0x1a6   :  { %v1193_v37 = vmax.f32 %v1120_v33, 0.0  ;;  %v855_v49 = vpop.f32.mrf.mxu2 }
 0x1a7   :  { %v856_v60 = vadd.f32 %v855_v49, %v2406_v45  ;;  %v944_v12 = vpop.f32.mrf.mxu3 }
 0x1a8   :  { %1257 = vst [vmem:[%s2880_s3 + $0xf8] sm:$0xff] %v1193_v37  ;;  %v945_v53 = vadd.f32 %v944_v12, %v2563_v31  ;;  %v1035_v9 = vpop.f32.mrf.mxu0 }
 0x1a9   :  { %v1194_v57 = vmax.f32 %v856_v60, 0.0 }
 0x1aa   :  { %v1124_v58 = vpop.f32.mrf.mxu1  ;;  %v1034_v5 = vadd.f32 %v1033_v63, %v945_v53 }
 0x1ab   :  { %1258 = vst [vmem:[%s2880_s3 + $0x100] sm:$0xff] %v1194_v57 }
 0x1ac   :  { %v1123_v51 = vadd.f32 %v1122_v27, %v1034_v5 }
 0x1ae   :  { %v1195_v48 = vmax.f32 %v1123_v51, 0.0  ;;  %v857_v22 = vpop.f32.mrf.mxu2 }
 0x1af   :  { %v858_v45 = vadd.f32 %v857_v22, %v2418_v54  ;;  %v946_v23 = vpop.f32.mrf.mxu3 }
 0x1b0   :  { %1259 = vst [vmem:[%s2880_s3 + $0x108] sm:$0xff] %v1195_v48  ;;  %v947_v61 = vadd.f32 %v946_v23, %v2563_v31  ;;  %v1038_v62 = vpop.f32.mrf.mxu0 }
 0x1b1   :  { %v1196_v47 = vmax.f32 %v858_v45, 0.0 }
 0x1b2   :  { %v1127_v21 = vpop.f32.mrf.mxu1  ;;  %v1036_v16 = vadd.f32 %v1035_v9, %v947_v61 }
 0x1b3   :  { %1260 = vst [vmem:[%s2880_s3 + $0x110] sm:$0xff] %v1196_v47 }
 0x1b4   :  { %v1125_v8 = vadd.f32 %v1124_v58, %v1036_v16 }
 0x1b6   :  { %v1197_v10 = vmax.f32 %v1125_v8, 0.0  ;;  %v860_v29 = vpop.f32.mrf.mxu2 }
 0x1b7   :  { %v861_v54 = vadd.f32 %v860_v29, %v2426_v14  ;;  %v949_v30 = vpop.f32.mrf.mxu3 }
 0x1b8   :  { %1261 = vst [vmem:[%s2880_s3 + $0x118] sm:$0xff] %v1197_v10  ;;  %v950_v43 = vadd.f32 %v949_v30, %v2563_v31  ;;  %v1040_v32 = vpop.f32.mrf.mxu0 }
 0x1b9   :  { %v1198_v4 = vmax.f32 %v861_v54, 0.0 }
 0x1ba   :  { %v1129_v20 = vpop.f32.mrf.mxu1  ;;  %v1039_v11 = vadd.f32 %v1038_v62, %v950_v43 }
 0x1bb   :  { %1262 = vst [vmem:[%s2880_s3 + $0x120] sm:$0xff] %v1198_v4 }
 0x1bc   :  { %v1128_v19 = vadd.f32 %v1127_v21, %v1039_v11 }
 0x1be   :  { %v1199_v41 = vmax.f32 %v1128_v19, 0.0  ;;  %v862_v1 = vpop.f32.mrf.mxu2 }
 0x1bf   :  { %v863_v14 = vadd.f32 %v862_v1, %v2438_v38  ;;  %v951_v2 = vpop.f32.mrf.mxu3 }
 0x1c0   :  { %1263 = vst [vmem:[%s2880_s3 + $0x128] sm:$0xff] %v1199_v41  ;;  %v952_v46 = vadd.f32 %v951_v2, %v2563_v31  ;;  %v1043_v36 = vpop.f32.mrf.mxu0 }
 0x1c1   :  { %v1200_v25 = vmax.f32 %v863_v14, 0.0 }
 0x1c2   :  { %v1132_v26 = vpop.f32.mrf.mxu1  ;;  %v1041_v3 = vadd.f32 %v1040_v32, %v952_v46 }
 0x1c3   :  { %1264 = vst [vmem:[%s2880_s3 + $0x130] sm:$0xff] %v1200_v25 }
 0x1c4   :  { %v1130_v17 = vadd.f32 %v1129_v20, %v1041_v3 }
 0x1c6   :  { %v1201_v18 = vmax.f32 %v1130_v17, 0.0  ;;  %v865_v42 = vpop.f32.mrf.mxu2 }
 0x1c7   :  { %v866_v38 = vadd.f32 %v865_v42, %v2446_v50  ;;  %v954_v39 = vpop.f32.mrf.mxu3 }
 0x1c8   :  { %1265 = vst [vmem:[%s2880_s3 + $0x138] sm:$0xff] %v1201_v18  ;;  %v955_v7 = vadd.f32 %v954_v39, %v2563_v31  ;;  %v1045_v44 = vpop.f32.mrf.mxu0 }
 0x1c9   :  { %v1202_v63 = vmax.f32 %v866_v38, 0.0 }
 0x1ca   :  { %v1134_v24 = vpop.f32.mrf.mxu1  ;;  %v1044_v27 = vadd.f32 %v1043_v36, %v955_v7 }
 0x1cb   :  { %1266 = vst [vmem:[%s2880_s3 + $0x140] sm:$0xff] %v1202_v63 }
 0x1cc   :  { %v1133_v40 = vadd.f32 %v1132_v26, %v1044_v27 }
 0x1ce   :  { %v1203_v33 = vmax.f32 %v1133_v40, 0.0  ;;  %v867_v37 = vpop.f32.mrf.mxu2 }
 0x1cf   :  { %v868_v50 = vadd.f32 %v867_v37, %v2458_v13  ;;  %v956_v49 = vpop.f32.mrf.mxu3 }
 0x1d0   :  { %1267 = vst [vmem:[%s2880_s3 + $0x148] sm:$0xff] %v1203_v33  ;;  %v957_v60 = vadd.f32 %v956_v49, %v2563_v31  ;;  %v1048_v12 = vpop.f32.mrf.mxu0 }
 0x1d1   :  { %v1204_v53 = vmax.f32 %v868_v50, 0.0 }
 0x1d2   :  { %v1137_v9 = vpop.f32.mrf.mxu1  ;;  %v1046_v57 = vadd.f32 %v1045_v44, %v957_v60 }
 0x1d3   :  { %1268 = vst [vmem:[%s2880_s3 + $0x150] sm:$0xff] %v1204_v53 }
 0x1d4   :  { %v1135_v58 = vadd.f32 %v1134_v24, %v1046_v57 }
 0x1d6   :  { %v1205_v5 = vmax.f32 %v1135_v58, 0.0  ;;  %v870_v51 = vpop.f32.mrf.mxu2 }
 0x1d7   :  { %v871_v13 = vadd.f32 %v870_v51, %v2466_v35  ;;  %v959_v48 = vpop.f32.mrf.mxu3 }
 0x1d8   :  { %1269 = vst [vmem:[%s2880_s3 + $0x158] sm:$0xff] %v1205_v5  ;;  %v960_v22 = vadd.f32 %v959_v48, %v2563_v31  ;;  %v1050_v45 = vpop.f32.mrf.mxu0 }
 0x1d9   :  { %v1206_v23 = vmax.f32 %v871_v13, 0.0 }
 0x1da   :  { %v1139_v61 = vpop.f32.mrf.mxu1  ;;  %v1049_v62 = vadd.f32 %v1048_v12, %v960_v22 }
 0x1db   :  { %1270 = vst [vmem:[%s2880_s3 + $0x160] sm:$0xff] %v1206_v23 }
 0x1dc   :  { %v1138_v47 = vadd.f32 %v1137_v9, %v1049_v62 }
 0x1de   :  { %v1207_v21 = vmax.f32 %v1138_v47, 0.0  ;;  %v872_v16 = vpop.f32.mrf.mxu2 }
 0x1df   :  { %v873_v35 = vadd.f32 %v872_v16, %v2478_v52  ;;  %v961_v8 = vpop.f32.mrf.mxu3 }
 0x1e0   :  { %1271 = vst [vmem:[%s2880_s3 + $0x168] sm:$0xff] %v1207_v21  ;;  %v962_v10 = vadd.f32 %v961_v8, %v2563_v31  ;;  %v1053_v29 = vpop.f32.mrf.mxu0 }
 0x1e1   :  { %v1208_v54 = vmax.f32 %v873_v35, 0.0 }
 0x1e2   :  { %v1142_v30 = vpop.f32.mrf.mxu1  ;;  %v1051_v43 = vadd.f32 %v1050_v45, %v962_v10 }
 0x1e3   :  { %1272 = vst [vmem:[%s2880_s3 + $0x170] sm:$0xff] %v1208_v54 }
 0x1e4   :  { %v1140_v32 = vadd.f32 %v1139_v61, %v1051_v43 }
 0x1e6   :  { %v1209_v4 = vmax.f32 %v1140_v32, 0.0  ;;  %v875_v20 = vpop.f32.mrf.mxu2 }
 0x1e7   :  { %v876_v52 = vadd.f32 %v875_v20, %v2486_v15  ;;  %v964_v11 = vpop.f32.mrf.mxu3 }
 0x1e8   :  { %1273 = vst [vmem:[%s2880_s3 + $0x178] sm:$0xff] %v1209_v4  ;;  %v965_v19 = vadd.f32 %v964_v11, %v2563_v31  ;;  %v1055_v41 = vpop.f32.mrf.mxu0 }
 0x1e9   :  { %v1210_v1 = vmax.f32 %v876_v52, 0.0 }
 0x1ea   :  { %v1144_v14 = vpop.f32.mrf.mxu1  ;;  %v1054_v2 = vadd.f32 %v1053_v29, %v965_v19 }
 0x1eb   :  { %1274 = vst [vmem:[%s2880_s3 + $0x180] sm:$0xff] %v1210_v1 }
 0x1ec   :  { %v1143_v46 = vadd.f32 %v1142_v30, %v1054_v2 }
 0x1ee   :  { %v1211_v36 = vmax.f32 %v1143_v46, 0.0  ;;  %v877_v25 = vpop.f32.mrf.mxu2 }
 0x1ef   :  { %v878_v15 = vadd.f32 %v877_v25, %v2498_v28  ;;  %v966_v26 = vpop.f32.mrf.mxu3 }
 0x1f0   :  { %1275 = vst [vmem:[%s2880_s3 + $0x188] sm:$0xff] %v1211_v36  ;;  %v967_v3 = vadd.f32 %v966_v26, %v2563_v31  ;;  %v1058_v17 = vpop.f32.mrf.mxu0 }
 0x1f1   :  { %v1212_v18 = vmax.f32 %v878_v15, 0.0 }
 0x1f2   :  { %v1147_v42 = vpop.f32.mrf.mxu1  ;;  %v1056_v38 = vadd.f32 %v1055_v41, %v967_v3 }
 0x1f3   :  { %1276 = vst [vmem:[%s2880_s3 + $0x190] sm:$0xff] %v1212_v18 }
 0x1f4   :  { %v1145_v39 = vadd.f32 %v1144_v14, %v1056_v38 }
 0x1f6   :  { %v1213_v7 = vmax.f32 %v1145_v39, 0.0  ;;  %v880_v44 = vpop.f32.mrf.mxu2 }
 0x1f7   :  { %v881_v28 = vadd.f32 %v880_v44, %v2506_v6  ;;  %v969_v63 = vpop.f32.mrf.mxu3 }
 0x1f8   :  { %1277 = vst [vmem:[%s2880_s3 + $0x198] sm:$0xff] %v1213_v7  ;;  %v970_v24 = vadd.f32 %v969_v63, %v2563_v31  ;;  %v1060_v40 = vpop.f32.mrf.mxu0 }
 0x1f9   :  { %v1214_v27 = vmax.f32 %v881_v28, 0.0 }
 0x1fa   :  { %v1059_v33 = vadd.f32 %v1058_v17, %v970_v24  ;;  %v1149_v37 = vpop.f32.mrf.mxu1 }
 0x1fb   :  { %1278 = vst [vmem:[%s2880_s3 + $0x1a0] sm:$0xff] %v1214_v27 }
 0x1fc   :  { %v1148_v50 = vadd.f32 %v1147_v42, %v1059_v33 }
 0x1fe   :  { %v1215_v49 = vmax.f32 %v1148_v50, 0.0  ;;  %v882_v60 = vpop.f32.mrf.mxu2 }
 0x1ff   :  { %v883_v6 = vadd.f32 %v882_v60, %v2518_v34  ;;  %v971_v12 = vpop.f32.mrf.mxu3 }
 0x200   :  { %1279 = vst [vmem:[%s2880_s3 + $0x1a8] sm:$0xff] %v1215_v49  ;;  %v972_v53 = vadd.f32 %v971_v12, %v2563_v31  ;;  %v1063_v58 = vpop.f32.mrf.mxu0 }
 0x201   :  { %v1216_v9 = vmax.f32 %v883_v6, 0.0 }
 0x202   :  { %v1061_v57 = vadd.f32 %v1060_v40, %v972_v53  ;;  %v1152_v51 = vpop.f32.mrf.mxu1 }
 0x203   :  { %1280 = vst [vmem:[%s2880_s3 + $0x1b0] sm:$0xff] %v1216_v9 }
 0x204   :  { %v1150_v5 = vadd.f32 %v1149_v37, %v1061_v57 }
 0x206   :  { %v1217_v13 = vmax.f32 %v1150_v5, 0.0  ;;  %v885_v48 = vpop.f32.mrf.mxu2 }
 0x207   :  { %v886_v34 = vadd.f32 %v885_v48, %v2526_v55  ;;  %v974_v22 = vpop.f32.mrf.mxu3 }
 0x208   :  { %1281 = vst [vmem:[%s2880_s3 + $0x1b8] sm:$0xff] %v1217_v13  ;;  %v975_v45 = vadd.f32 %v974_v22, %v2563_v31  ;;  %v1065_v47 = vpop.f32.mrf.mxu0 }
 0x209   :  { %v1218_v23 = vmax.f32 %v886_v34, 0.0 }
 0x20a   :  { %v1064_v61 = vadd.f32 %v1063_v58, %v975_v45  ;;  %v1154_v35 = vpop.f32.mrf.mxu1 }
 0x20b   :  { %1282 = vst [vmem:[%s2880_s3 + $0x1c0] sm:$0xff] %v1218_v23 }
 0x20c   :  { %v1153_v62 = vadd.f32 %v1152_v51, %v1064_v61 }
 0x20e   :  { %v1219_v21 = vmax.f32 %v1153_v62, 0.0  ;;  %v887_v16 = vpop.f32.mrf.mxu2 }
 0x20f   :  { %v888_v55 = vadd.f32 %v887_v16, %v2538_v56  ;;  %v976_v8 = vpop.f32.mrf.mxu3 }
 0x210   :  { %1283 = vst [vmem:[%s2880_s3 + $0x1c8] sm:$0xff] %v1219_v21  ;;  %v977_v10 = vadd.f32 %v976_v8, %v2563_v31  ;;  %v1068_v4 = vpop.f32.mrf.mxu0 }
 0x211   :  { %v1220_v29 = vmax.f32 %v888_v55, 0.0 }
 0x212   :  { %v1066_v54 = vadd.f32 %v1065_v47, %v977_v10  ;;  %v1157_v11 = vpop.f32.mrf.mxu1 }
 0x213   :  { %1284 = vst [vmem:[%s2880_s3 + $0x1d0] sm:$0xff] %v1220_v29 }
 0x214   :  { %v1155_v30 = vadd.f32 %v1154_v35, %v1066_v54 }
 0x216   :  { %v1221_v43 = vmax.f32 %v1155_v30, 0.0  ;;  %v890_v32 = vpop.f32.mrf.mxu2 }
 0x217   :  { %v891_v20 = vadd.f32 %v890_v32, %v2546_v0  ;;  %v979_v56 = vpop.f32.mrf.mxu3 }
 0x218   :  { %1285 = vst [vmem:[%s2880_s3 + $0x1d8] sm:$0xff] %v1221_v43  ;;  %v980_v52 = vadd.f32 %v979_v56, %v2563_v31  ;;  %v1070_v25 = vpop.f32.mrf.mxu0 }
 0x219   :  { %v1222_v19 = vmax.f32 %v891_v20, 0.0 }
 0x21a   :  { %v1069_v41 = vadd.f32 %v1068_v4, %v980_v52  ;;  %v1159_v3 = vpop.f32.mrf.mxu1 }
 0x21b   :  { %1286 = vst [vmem:[%s2880_s3 + $0x1e0] sm:$0xff] %v1222_v19 }
 0x21c   :  { %v1158_v1 = vadd.f32 %v1157_v11, %v1069_v41 }
 0x21e   :  { %v1223_v14 = vmax.f32 %v1158_v1, 0.0  ;;  %v892_v2 = vpop.f32.mrf.mxu2 }
 0x21f   :  { %v893_v46 = vadd.f32 %v892_v2, %v2558_v59  ;;  %v981_v0 = vpop.f32.mrf.mxu3 }
 0x220   :  { %1287 = vst [vmem:[%s2880_s3 + $0x1e8] sm:$0xff] %v1223_v14  ;;  %v982_v36 = vadd.f32 %v981_v0, %v2563_v31 }
 0x221   :  { %v1224_v15 = vmax.f32 %v893_v46, 0.0 }
 0x222   :  { %v1071_v26 = vadd.f32 %v1070_v25, %v982_v36 }
 0x223   :  { %1288 = vst [vmem:[%s2880_s3 + $0x1f0] sm:$0xff] %v1224_v15 }
 0x224   :  { %v1160_v17 = vadd.f32 %v1159_v3, %v1071_v26 }
 0x226   :  { %v1225_v18 = vmax.f32 %v1160_v17, 0.0 }
 0x228   :  { %1289 = vst [vmem:[%s2880_s3 + $0x1f8] sm:$0xff] %v1225_v18 }

// kernel: feetnet_forward.8
= control target key start
LH: loop header
LB: loop body
LE: loop exit
PB: predicated region body
PF: predicated region fallthrough
CT: control target
= control target key end

     0   :  { %s2161_s13 = smov 0   ;;  %s2934_s0 = inlined_call_operand.vmem [shape: bf16[2,64,256], index: 0, kind: input, shape index: {}]   ;;  %s2935_s1 = inlined_call_operand.vmem [shape: bf16[1,2,64,256], index: 1, kind: input, shape index: {}]   ;;  %s2936_s2 = inlined_call_operand.vmem [shape: bf16[256,128], index: 2, kind: input, shape index: {}]   ;;  %s2937_s3 = inlined_call_operand.vmem [shape: f32[1,128], index: 3, kind: input, shape index: {}]   ;;  %s2938_s4 = inlined_call_operand.vmem [shape: bf16[256,256], index: 4, kind: input, shape index: {}]   ;;  %s2939_s5 = inlined_call_operand.vmem [shape: f32[1,256], index: 5, kind: input, shape index: {}]   ;;  %s2940_s6 = inlined_call_operand.vmem [shape: bf16[128,256], index: 6, kind: input, shape index: {}]   ;;  %s2941_s7 = inlined_call_operand.vmem [shape: f32[1,256], index: 7, kind: input, shape index: {}]   ;;  %s2942_s8 = inlined_call_operand.vmem [shape: f32[256,256], index: 8, kind: input, shape index: {}]   ;;  %s2943_s9 = inlined_call_operand.vmem [shape: f32[1,256], index: 9, kind: input, shape index: {}]   ;;  %s2944_s10 = inlined_call_operand.vmem [shape: f32[2,1,256], index: 10, kind: output, shape index: {}]  }
   0x1 LB: > { %s1635_s14 = sadd.s32 4294967295, %s2103_s13   ;;  %p1639_p0 = scmp.ge.s32.totalorder %s2103_s13, 1  ;;  %s2103_s13 = sphi %s2161_s13, %s20_s13  }
   0x2   : > { %p322_p1 = scmp.lt.s32.totalorder %s2103_s13, 3 }
   0x4   : > { %p323_p2 = pnand %p1639_p0, %p322_p1 }
   0x5   : > { %p364_p3 = scmp.lt.s32.totalorder (!%p323_p2), %s1635_s14, 1 }
   0x6   : > { %326 = sbr.rel (%p323_p2) target bundleno = 1162 (0x48a), region = 60 }
   0xb   : > { %v1831_v0 = vld [vmem:[%s2938_s4 + $0x70] sm:$0xf]  ;;  %v2020_v1 = vld [vmem:[%s2938_s4 + $0x74] sm:$0xf0]  ;;  %v1823_v5 = vld [vmem:[%s2938_s4 + $0x60] sm:$0xf] }
   0xc   : > { %v1895_v2 = vld [vmem:[%s2938_s4 + $0xf0] sm:$0xf]  ;;  %v1832_v3 = vor.u32 %v2020_v1, %v1831_v0  ;;  %v2036_v4 = vld [vmem:[%s2938_s4 + $0xf4] sm:$0xf0]  ;;  %v2018_v6 = vld [vmem:[%s2938_s4 + $0x64] sm:$0xf0] }
   0xd   : > { %v1896_v7 = vor.u32 %v2036_v4, %v1895_v2  ;;  %v1887_v8 = vld [vmem:[%s2938_s4 + $0xe0] sm:$0xf]  ;;  %v2034_v9 = vld [vmem:[%s2938_s4 + $0xe4] sm:$0xf0]  ;;  %v1824_v10 = vor.u32 %v2018_v6, %v1823_v5  ;;  %v1815_v12 = vld [vmem:[%s2938_s4 + $0x50] sm:$0xf] }
   0xe   : > { %879 = vmatpush.bf16.msra.mxu2 %v1832_v3  ;;  %v1888_v11 = vor.u32 %v2034_v9, %v1887_v8  ;;  %v2016_v13 = vld [vmem:[%s2938_s4 + $0x54] sm:$0xf0]  ;;  %v1879_v14 = vld [vmem:[%s2938_s4 + $0xd0] sm:$0xf]  ;;  %v1807_v18 = vld [vmem:[%s2938_s4 + $0x40] sm:$0xf] }
   0xf   : > { %908 = vmatpush.bf16.msra.mxu3 %v1896_v7  ;;  %v2032_v15 = vld [vmem:[%s2938_s4 + $0xd4] sm:$0xf0]  ;;  %v1816_v16 = vor.u32 %v2016_v13, %v1815_v12  ;;  %v2014_v19 = vld [vmem:[%s2938_s4 + $0x44] sm:$0xf0]  ;;  %v1871_v20 = vld [vmem:[%s2938_s4 + $0xc0] sm:$0xf] }
  0x10   : > { %v1880_v17 = vor.u32 %v2032_v15, %v1879_v14  ;;  %v2030_v21 = vld [vmem:[%s2938_s4 + $0xc4] sm:$0xf0]  ;;  %v1808_v22 = vor.u32 %v2014_v19, %v1807_v18  ;;  %v1799_v24 = vld [vmem:[%s2938_s4 + $0x30] sm:$0xf]  ;;  %v2012_v25 = vld [vmem:[%s2938_s4 + $0x34] sm:$0xf0] }
  0x11   : > { %v1872_v23 = vor.u32 %v2030_v21, %v1871_v20  ;;  %v1863_v26 = vld [vmem:[%s2938_s4 + $0xb0] sm:$0xf]  ;;  %v2028_v27 = vld [vmem:[%s2938_s4 + $0xb4] sm:$0xf0]  ;;  %v1800_v28 = vor.u32 %v2012_v25, %v1799_v24  ;;  %v1791_v30 = vld [vmem:[%s2938_s4 + $0x20] sm:$0xf] }
  0x12   : > { %880 = vmatpush.bf16.msra.mxu2 %v1824_v10  ;;  %v1864_v29 = vor.u32 %v2028_v27, %v1863_v26  ;;  %v2010_v31 = vld [vmem:[%s2938_s4 + $0x24] sm:$0xf0]  ;;  %v1855_v32 = vld [vmem:[%s2938_s4 + $0xa0] sm:$0xf]  ;;  %s2946_s14 = smov (!%p364_p3, %s1635_s14), 1  ;;  %v1988_v60 = vld [vmem:[%s2936_s2 + $0x38] sm:$0xff] }
  0x13   : > { %909 = vmatpush.bf16.msra.mxu3 %v1888_v11  ;;  %v2026_v33 = vld [vmem:[%s2938_s4 + $0xa4] sm:$0xf0]  ;;  %v1792_v34 = vor.u32 %v2010_v31, %v1791_v30  ;;  %v1783_v36 = vld [vmem:[%s2938_s4 + $0x10] sm:$0xf]  ;;  %v2008_v37 = vld [vmem:[%s2938_s4 + $0x14] sm:$0xf0]  ;;  %559 = vmatpush.bf16.msra.mxu0 %v1988_v60 }
  0x14   : > { %v1856_v35 = vor.u32 %v2026_v33, %v1855_v32  ;;  %v1847_v38 = vld [vmem:[%s2938_s4 + $0x90] sm:$0xf]  ;;  %v2024_v39 = vld [vmem:[%s2938_s4 + $0x94] sm:$0xf0]  ;;  %s1971_s17 = sshll.u32 %s2946_s14, 6  ;;  %v1784_v40 = vor.u32 %v2008_v37, %v1783_v36  ;;  %v1986_v0 = vld [vmem:[%s2936_s2 + $0x28] sm:$0xff] }
  0x15   : > { %v1848_v41 = vor.u32 %v2024_v39, %v1847_v38  ;;  %v1775_v42 = vld [vmem:[%s2938_s4] sm:$0xf]  ;;  %v2006_v43 = vld [vmem:[%s2938_s4 + $0x4] sm:$0xf0]  ;;  %s2271_s24 = scalar_lea.vmem %s2935_s1, %s1971_s17  ;;  %v1996_v61 = vld [vmem:[%s2936_s2 + $0x78] sm:$0xff]  ;;  %s2353_s25 = scalar_lea.vmem %s2934_s0, %s1971_s17  ;;  %vm1040_vm0 = vcmask 523264  }
  0x16   : > { %881 = vmatpush.bf16.msra.mxu2 %v1816_v16  ;;  %v1839_v44 = vld [vmem:[%s2938_s4 + $0x80] sm:$0xf]  ;;  %v2022_v45 = vld [vmem:[%s2938_s4 + $0x84] sm:$0xf0]  ;;  %v1776_v46 = vor.u32 %v2006_v43, %v1775_v42  ;;  %v1997_v50 = vld [vmem:[%s2271_s24 + $0x4] sm:$0xf]  ;;  %588 = vmatpush.bf16.msra.mxu1 %v1996_v61 }
  0x17   : > { %910 = vmatpush.bf16.msra.mxu3 %v1880_v17  ;;  %v1743_v47 = vld [vmem:[%s2271_s24] sm:$0xf]  ;;  %v1998_v48 = vld [vmem:[%s2271_s24 + $0x4] sm:$0xf0]  ;;  %v1840_v49 = vor.u32 %v2022_v45, %v1839_v44  ;;  %v1745_v51 = vld [vmem:[%s2271_s24 + $0x8] sm:$0xf0] }
  0x18   : > { %v2283_v52 = vor.u32 %v1998_v48, %v1743_v47  ;;  %v2285_v53 = vor.u32 %v1997_v50, %v1745_v51  ;;  %v1751_v54 = vld [vmem:[%s2271_s24 + $0x10] sm:$0xf]  ;;  %v2000_v55 = vld [vmem:[%s2271_s24 + $0x14] sm:$0xf0]  ;;  %v1999_v56 = vld [vmem:[%s2271_s24 + $0x14] sm:$0xf] }
  0x19   : > { %v1753_v57 = vld [vmem:[%s2271_s24 + $0x18] sm:$0xf0]  ;;  %v2293_v58 = vor.u32 %v2000_v55, %v1751_v54  ;;  %v1987_v62 = vld [vmem:[%s2936_s2 + $0x30] sm:$0xff]  ;;  %v1994_v1 = vld [vmem:[%s2936_s2 + $0x68] sm:$0xff]  ;;  %s1644_s21 = sshll.u32 %s2946_s14, 1  ;;  %vm1562_vm2 = vcmask 1040384  }
  0x1a   : > { %882 = vmatpush.bf16.msra.mxu2 %v1808_v22  ;;  %v2295_v59 = vor.u32 %v1999_v56, %v1753_v57  ;;  %v1995_v63 = vld [vmem:[%s2936_s2 + $0x70] sm:$0xff]  ;;  %560 = vmatpush.bf16.msra.mxu0 %v1987_v62  ;;  %v1985_v2 = vld [vmem:[%s2936_s2 + $0x20] sm:$0xff]  ;;  %v2002_v4 = vld [vmem:[%s2271_s24 + $0x24] sm:$0xf0]  ;;  %s377_s26 = scalar_lea.vmem %s2944_s10, %s1644_s21 }
  0x1b   : > { %911 = vmatpush.bf16.msra.mxu3 %v1872_v23  ;;  %589 = vmatpush.bf16.msra.mxu1 %v1995_v63  ;;  %v1759_v3 = vld [vmem:[%s2271_s24 + $0x20] sm:$0xf]  ;;  %v2001_v6 = vld [vmem:[%s2271_s24 + $0x24] sm:$0xf]  ;;  %v1761_v7 = vld [vmem:[%s2271_s24 + $0x28] sm:$0xf0] }
  0x1c   : > { %v1993_v5 = vld [vmem:[%s2936_s2 + $0x60] sm:$0xff]  ;;  %v1984_v8 = vld [vmem:[%s2936_s2 + $0x18] sm:$0xff]  ;;  %v2330_v9 = vor.u32 %v2002_v4, %v1759_v3  ;;  %v2332_v10 = vor.u32 %v2001_v6, %v1761_v7  ;;  %v1983_v12 = vld [vmem:[%s2936_s2 + $0x10] sm:$0xff] }
  0x1d   : > { %v1992_v11 = vld [vmem:[%s2936_s2 + $0x58] sm:$0xff]  ;;  %v1991_v13 = vld [vmem:[%s2936_s2 + $0x50] sm:$0xff]  ;;  %v1982_v14 = vld [vmem:[%s2936_s2 + $0x8] sm:$0xff] }
  0x1e   : > { %883 = vmatpush.bf16.msra.mxu2 %v1800_v28  ;;  %561 = vmatpush.bf16.msra.mxu0 %v1986_v0  ;;  %v1990_v15 = vld [vmem:[%s2936_s2 + $0x48] sm:$0xff]  ;;  %v1981_v16 = vld [vmem:[%s2936_s2] sm:$0xff]  ;;  %v1767_v19 = vld [vmem:[%s2271_s24 + $0x30] sm:$0xf] }
  0x1f   : > { %912 = vmatpush.bf16.msra.mxu3 %v1864_v29  ;;  %590 = vmatpush.bf16.msra.mxu1 %v1994_v1  ;;  %v1647_v17 = vld [vmem:[%s2353_s25] sm:$0xf]  ;;  %v1974_v18 = vld [vmem:[%s2353_s25 + $0x4] sm:$0xf0]  ;;  %v2004_v20 = vld [vmem:[%s2271_s24 + $0x34] sm:$0xf0] }
  0x20   : > { %v1989_v21 = vld [vmem:[%s2936_s2 + $0x40] sm:$0xff]  ;;  %v1649_v23 = vld [vmem:[%s2353_s25 + $0x8] sm:$0xf0]  ;;  %v2003_v24 = vld [vmem:[%s2271_s24 + $0x34] sm:$0xf]  ;;  %v1648_v26 = vor.u32 %v1974_v18, %v1647_v17  ;;  %v2372_v27 = vor.u32 %v2004_v20, %v1767_v19 }
  0x21   : > { %v1973_v22 = vld [vmem:[%s2353_s25 + $0x4] sm:$0xf]  ;;  %v1769_v25 = vld [vmem:[%s2271_s24 + $0x38] sm:$0xf0]  ;;  %v1655_v30 = vld [vmem:[%s2353_s25 + $0x10] sm:$0xf] }
  0x22   : > { %884 = vmatpush.bf16.msra.mxu2 %v1792_v34  ;;  %562 = vmatpush.bf16.msra.mxu0 %v1985_v2  ;;  %v1652_v28 = vor.u32 %v1973_v22, %v1649_v23  ;;  %v2374_v29 = vor.u32 %v2003_v24, %v1769_v25  ;;  %v1976_v31 = vld [vmem:[%s2353_s25 + $0x14] sm:$0xf0]  ;;  %v1975_v32 = vld [vmem:[%s2353_s25 + $0x14] sm:$0xf]  ;;  %v1657_v33 = vld [vmem:[%s2353_s25 + $0x18] sm:$0xf0] }
  0x23   : > { %913 = vmatpush.bf16.msra.mxu3 %v1856_v35  ;;  %591 = vmatpush.bf16.msra.mxu1 %v1993_v5  ;;  %v1656_v34 = vor.u32 %v1976_v31, %v1655_v30  ;;  %v1660_v35 = vor.u32 %v1975_v32, %v1657_v33  ;;  %v1663_v36 = vld [vmem:[%s2353_s25 + $0x20] sm:$0xf]  ;;  %v1978_v37 = vld [vmem:[%s2353_s25 + $0x24] sm:$0xf0]  ;;  %v1977_v38 = vld [vmem:[%s2353_s25 + $0x24] sm:$0xf] }
  0x24   : > { %v1665_v39 = vld [vmem:[%s2353_s25 + $0x28] sm:$0xf0]  ;;  %v1671_v42 = vld [vmem:[%s2353_s25 + $0x30] sm:$0xf]  ;;  %v1980_v43 = vld [vmem:[%s2353_s25 + $0x34] sm:$0xf0] }
  0x25   : > { %v1672_v44 = vor.u32 %v1980_v43, %v1671_v42  ;;  %v1979_v45 = vld [vmem:[%s2353_s25 + $0x34] sm:$0xf]  ;;  %v2393_v48 = vld [vmem:[%s2939_s5] sm:$0x3] }
  0x26   : > { %885 = vmatpush.bf16.msra.mxu2 %v1784_v40  ;;  %563 = vmatpush.bf16.msra.mxu0 %v1984_v8  ;;  %v1664_v40 = vor.u32 %v1978_v37, %v1663_v36 }
  0x27   : > { %914 = vmatpush.bf16.msra.mxu3 %v1848_v41  ;;  %592 = vmatpush.bf16.msra.mxu1 %v1992_v11  ;;  %v1668_v41 = vor.u32 %v1977_v38, %v1665_v39 }
  0x2a   : > { %886 = vmatpush.bf16.msra.mxu2 %v1776_v46  ;;  %564 = vmatpush.bf16.msra.mxu0 %v1983_v12  ;;  %v1673_v46 = vld [vmem:[%s2353_s25 + $0x38] sm:$0xf0] }
  0x2b   : > { %915 = vmatpush.bf16.msra.mxu3 %v1840_v49  ;;  %593 = vmatpush.bf16.msra.mxu1 %v1991_v13  ;;  %v1676_v47 = vor.u32 %v1979_v45, %v1673_v46  ;;  %v675_v49 = vperm.slane %v2393_v48, 0 }
  0x2d   : > { %887 = vmatmul.bf16.vlgmr.msra.gmra.mxu2 %v2283_v52 }
  0x2e   : > { %916 = vmatmul.bf16.vlgmr.msra.gmra.mxu3 %v2285_v53  ;;  %565 = vmatpush.bf16.msra.mxu0 %v1982_v14 }
  0x2f   : > { %594 = vmatpush.bf16.msra.mxu1 %v1990_v15 }
  0x32   : > { %566 = vmatpush.bf16.msra.mxu0 %v1981_v16 }
  0x33   : > { %595 = vmatpush.bf16.msra.mxu1 %v1989_v21 }
  0x35   : > { %567 = vmatmul.bf16.vlgmr.msra.gmra.mxu0 %v1648_v26 }
  0x36   : > { %596 = vmatmul.bf16.vlgmr.msra.gmra.mxu1 %v1652_v28 }
  0x3d   : > { %892 = vmatmul.bf16.gmra.mxu2 %v2293_v58 }
  0x3e   : > { %921 = vmatmul.bf16.gmra.mxu3 %v2295_v59 }
  0x45   : > { %572 = vmatmul.bf16.gmra.mxu0 %v1656_v34 }
  0x46   : > { %601 = vmatmul.bf16.gmra.mxu1 %v1660_v35  ;;  %v2399_v35 = vld [vmem:[%s2937_s3] ss:$0 sm:$0xff] }
  0x4d   : > { %897 = vmatmul.bf16.gmra.mxu2 %v2330_v9 }
  0x4e   : > { %926 = vmatmul.bf16.gmra.mxu3 %v2332_v10 }
  0x55   : > { %577 = vmatmul.bf16.gmra.mxu0 %v1664_v40 }
  0x56   : > { %606 = vmatmul.bf16.gmra.mxu1 %v1668_v41 }
  0x5d   : > { %902 = vmatmul.bf16.gmra.mxu2 %v2372_v27 }
  0x5e   : > { %931 = vmatmul.bf16.gmra.mxu3 %v2374_v29 }
  0x65   : > { %582 = vmatmul.bf16.gmra.mxu0 %v1672_v44 }
  0x66   : > { %611 = vmatmul.bf16.gmra.mxu1 %v1676_v47 }
  0xb0   : > { %v888_v50 = vpop.f32.mrf.mxu2 }
  0xb1   : > { %v889_v51 = vadd.f32 %v888_v50, %v675_v49  ;;  %v917_v54 = vpop.f32.mrf.mxu3 }
  0xb2   : > { %v568_v17 = vpop.f32.mrf.mxu0 }
  0xb3   : > { %v918_v55 = vadd.f32 %v917_v54, %v889_v51  ;;  %v597_v21 = vpop.f32.mrf.mxu1  ;;  %v569_v37 = vadd.f32 %v2399_v35, %v568_v17  ;;  %v1809_v17 = vld [vmem:[%s2938_s4 + $0x48] sm:$0xf0] }
  0xb5   : > { %v598_v39 = vadd.f32 %v597_v21, %v569_v37  ;;  %v1793_v37 = vld [vmem:[%s2938_s4 + $0x28] sm:$0xf0] }
  0xb8   : > { %v890_v56 = vpop.f32.mrf.mxu2 }
  0xb9   : > { %v891_v57 = vadd.f32 %v890_v56, %v675_v49  ;;  %v919_v60 = vpop.f32.mrf.mxu3  ;;  %v1833_v56 = vld [vmem:[%s2938_s4 + $0x78] sm:$0xf0] }
  0xba   : > { %v570_v26 = vpop.f32.mrf.mxu0 }
  0xbb   : > { %v920_v61 = vadd.f32 %v919_v60, %v891_v57  ;;  %v599_v31 = vpop.f32.mrf.mxu1  ;;  %v571_v38 = vadd.f32 %v2399_v35, %v570_v26  ;;  %v2035_v57 = vld [vmem:[%s2938_s4 + $0xf4] sm:$0xf]  ;;  %v1801_v26 = vld [vmem:[%s2938_s4 + $0x38] sm:$0xf0] }
  0xbd   : > { %v999_v62 = vpack.c.bf16 %v920_v61, %v918_v55  ;;  %v600_v40 = vadd.f32 %v599_v31, %v571_v38  ;;  %v2019_v55 = vld [vmem:[%s2938_s4 + $0x74] sm:$0xf]  ;;  %v1897_v61 = vld [vmem:[%s2938_s4 + $0xf8] sm:$0xf0]  ;;  %v2025_v38 = vld [vmem:[%s2938_s4 + $0xa4] sm:$0xf] }
  0xbe   : > { %v1836_v60 = vor.u32 %v2019_v55, %v1833_v56  ;;  %v1865_v31 = vld [vmem:[%s2938_s4 + $0xb8] sm:$0xf0]  ;;  %v2005_v55 = vld [vmem:[%s2938_s4 + $0x4] sm:$0xf]  ;;  %v1777_v56 = vld [vmem:[%s2938_s4 + $0x8] sm:$0xf0] }
  0xbf   : > { %v995_v42 = vpack.c.bf16 %v600_v40, %v598_v39  ;;  %v1857_v39 = vld [vmem:[%s2938_s4 + $0xa8] sm:$0xf0] }
  0xc0   : > { %v893_v63 = vpop.f32.mrf.mxu2  ;;  %937 = vmatpush.bf16.msrb.mxu0 %v1836_v60 }
  0xc1   : > { %v922_v0 = vpop.f32.mrf.mxu3  ;;  %v894_v28 = vadd.f32 %v893_v63, %v675_v49  ;;  %v1825_v63 = vld [vmem:[%s2938_s4 + $0x68] sm:$0xf0] }
  0xc2   : > { %v573_v34 = vpop.f32.mrf.mxu0 }
  0xc3   : > { %v923_v32 = vadd.f32 %v922_v0, %v894_v28  ;;  %v602_v36 = vpop.f32.mrf.mxu1  ;;  %v574_v45 = vadd.f32 %v2399_v35, %v573_v34  ;;  %v1900_v0 = vor.u32 %v2035_v57, %v1897_v61  ;;  %v2021_v57 = vld [vmem:[%s2938_s4 + $0x84] sm:$0xf] }
  0xc5   : > { %966 = vmatpush.bf16.msrb.mxu1 %v1900_v0 }
  0xc8   : > { %v895_v1 = vpop.f32.mrf.mxu2 }
  0xc9   : > { %v924_v2 = vpop.f32.mrf.mxu3  ;;  %v896_v24 = vadd.f32 %v895_v1, %v675_v49  ;;  %v2033_v1 = vld [vmem:[%s2938_s4 + $0xe4] sm:$0xf] }
  0xca   : > { %v575_v41 = vpop.f32.mrf.mxu0 }
  0xcb   : > { %v925_v30 = vadd.f32 %v924_v2, %v896_v24  ;;  %v604_v43 = vpop.f32.mrf.mxu1  ;;  %v576_v46 = vadd.f32 %v2399_v35, %v575_v41  ;;  %v1889_v2 = vld [vmem:[%s2938_s4 + $0xe8] sm:$0xf0] }
  0xcd   : > { %v1000_v33 = vpack.c.bf16 %v925_v30, %v923_v32  ;;  %v605_v50 = vadd.f32 %v604_v43, %v576_v46  ;;  %v2027_v30 = vld [vmem:[%s2938_s4 + $0xb4] sm:$0xf]  ;;  %v1849_v46 = vld [vmem:[%s2938_s4 + $0x98] sm:$0xf0] }
  0xce   : > { %v1868_v34 = vor.u32 %v2027_v30, %v1865_v31  ;;  %v2007_v43 = vld [vmem:[%s2938_s4 + $0x14] sm:$0xf] }
  0xd0   : > { %v898_v3 = vpop.f32.mrf.mxu2 }
  0xd1   : > { %v927_v4 = vpop.f32.mrf.mxu3  ;;  %v899_v20 = vadd.f32 %v898_v3, %v675_v49 }
  0xd2   : > { %v578_v44 = vpop.f32.mrf.mxu0 }
  0xd3   : > { %v928_v23 = vadd.f32 %v927_v4, %v899_v20  ;;  %v607_v47 = vpop.f32.mrf.mxu1  ;;  %v1873_v20 = vld [vmem:[%s2938_s4 + $0xc8] sm:$0xf0] }
  0xd8   : > { %v900_v5 = vpop.f32.mrf.mxu2 }
  0xd9   : > { %v929_v6 = vpop.f32.mrf.mxu3  ;;  %v901_v18 = vadd.f32 %v900_v5, %v675_v49  ;;  %v1892_v5 = vor.u32 %v2033_v1, %v1889_v2 }
  0xda   : > { %v580_v54 = vpop.f32.mrf.mxu0 }
  0xdb   : > { %v930_v22 = vadd.f32 %v929_v6, %v901_v18  ;;  %v609_v3 = vpop.f32.mrf.mxu1  ;;  %v2015_v6 = vld [vmem:[%s2938_s4 + $0x54] sm:$0xf]  ;;  %967 = vmatpush.bf16.msrb.mxu1 %v1892_v5 }
  0xdd   : > { %v1001_v25 = vpack.c.bf16 %v930_v22, %v928_v23 }
  0xe0   : > { %v903_v7 = vpop.f32.mrf.mxu2 }
  0xe1   : > { %v932_v8 = vpop.f32.mrf.mxu3  ;;  %v904_v11 = vadd.f32 %v903_v7, %v675_v49  ;;  %v1817_v7 = vld [vmem:[%s2938_s4 + $0x58] sm:$0xf0] }
  0xe2   : > { %v583_v18 = vpop.f32.mrf.mxu0 }
  0xe3   : > { %v933_v15 = vadd.f32 %v932_v8, %v904_v11  ;;  %v2031_v8 = vld [vmem:[%s2938_s4 + $0xd4] sm:$0xf]  ;;  %v1881_v11 = vld [vmem:[%s2938_s4 + $0xd8] sm:$0xf0]  ;;  %v612_v28 = vpop.f32.mrf.mxu1 }
  0xe8   : > { %v905_v12 = vpop.f32.mrf.mxu2 }
  0xe9   : > { %v906_v13 = vadd.f32 %v905_v12, %v675_v49  ;;  %v934_v14 = vpop.f32.mrf.mxu3  ;;  %v603_v49 = vadd.f32 %v602_v36, %v574_v45  ;;  %v579_v12 = vadd.f32 %v2399_v35, %v578_v44  ;;  %v2009_v36 = vld [vmem:[%s2938_s4 + $0x24] sm:$0xf]  ;;  %v1785_v44 = vld [vmem:[%s2938_s4 + $0x18] sm:$0xf0]  ;;  %v2023_v45 = vld [vmem:[%s2938_s4 + $0x94] sm:$0xf] }
  0xea   : > { %v585_v40 = vpop.f32.mrf.mxu0  ;;  %v1796_v41 = vor.u32 %v2009_v36, %v1793_v37 }
  0xeb   : > { %v935_v16 = vadd.f32 %v934_v14, %v906_v13  ;;  %v996_v51 = vpack.c.bf16 %v605_v50, %v603_v49  ;;  %v581_v13 = vadd.f32 %v2399_v35, %v580_v54  ;;  %v1820_v14 = vor.u32 %v2015_v6, %v1817_v7  ;;  %v614_v50 = vpop.f32.mrf.mxu1 }
  0xec   : > { %v608_v21 = vadd.f32 %v607_v47, %v579_v12  ;;  %v584_v47 = vadd.f32 %v2399_v35, %v583_v18  ;;  %v586_v49 = vadd.f32 %v2399_v35, %v585_v40  ;;  %v1852_v54 = vor.u32 %v2023_v45, %v1849_v46  ;;  %v1841_v35 = vld [vmem:[%s2938_s4 + $0x88] sm:$0xf0] }
  0xed   : > { %v1002_v19 = vpack.c.bf16 %v935_v16, %v933_v15  ;;  %v1884_v15 = vor.u32 %v2031_v8, %v1881_v11  ;;  %v2013_v16 = vld [vmem:[%s2938_s4 + $0x44] sm:$0xf]  ;;  %v610_v22 = vadd.f32 %v609_v3, %v581_v13  ;;  %v676_v13 = vperm.slane %v2393_v48, 1 }
  0xee   : > { %v1812_v23 = vor.u32 %v2013_v16, %v1809_v17  ;;  %v613_v60 = vadd.f32 %v612_v28, %v584_v47  ;;  %v615_v61 = vadd.f32 %v614_v50, %v586_v49 }
  0xef   : > { %1007 = vmatpush.bf16.xpose.msrb.mxu2 %v1002_v19  ;;  %v2029_v19 = vld [vmem:[%s2938_s4 + $0xc4] sm:$0xf]  ;;  %968 = vmatpush.bf16.msrb.mxu1 %v1884_v15  ;;  %v997_v32 = vpack.c.bf16 %v610_v22, %v608_v21 }
  0xf0   : > { %v1876_v24 = vor.u32 %v2029_v19, %v1873_v20  ;;  %v998_v0 = vpack.c.bf16 %v615_v61, %v613_v60 }
  0xf3   : > { %969 = vmatpush.bf16.msrb.mxu1 %v1876_v24 }
  0xf7   : > { %1008 = vmatpush.bf16.xpose.msrb.mxu2 %v1001_v25  ;;  %v2011_v25 = vld [vmem:[%s2938_s4 + $0x34] sm:$0xf]  ;;  %970 = vmatpush.bf16.msrb.mxu1 %v1868_v34 }
  0xff   : > { %1009 = vmatpush.bf16.xpose.msrb.mxu2 %v1000_v33  ;;  %v1804_v33 = vor.u32 %v2011_v25, %v1801_v26 }
 0x107   : > { %1010 = vmatpush.bf16.xpose.msrb.mxu2 %v999_v62  ;;  %v2017_v62 = vld [vmem:[%s2938_s4 + $0x64] sm:$0xf] }
 0x108   : > { %v1828_v4 = vor.u32 %v2017_v62, %v1825_v63  ;;  %v1780_v62 = vor.u32 %v2005_v55, %v1777_v56  ;;  %v1844_v63 = vor.u32 %v2021_v57, %v1841_v35 }
 0x10a   : > { %938 = vmatpush.bf16.msrb.mxu0 %v1828_v4 }
 0x10e   : > { %1011 = vmatmul.bf16.vlgmr.msrb.gmra.mxu2 %v995_v42  ;;  %939 = vmatpush.bf16.msrb.mxu0 %v1820_v14  ;;  %v1860_v42 = vor.u32 %v2025_v38, %v1857_v39 }
 0x110   : > { %971 = vmatpush.bf16.msrb.mxu1 %v1860_v42 }
 0x112   : > { %940 = vmatpush.bf16.msrb.mxu0 %v1812_v23 }
 0x114   : > { %972 = vmatpush.bf16.msrb.mxu1 %v1852_v54 }
 0x116   : > { %941 = vmatpush.bf16.msrb.mxu0 %v1804_v33 }
 0x118   : > { %973 = vmatpush.bf16.msrb.mxu1 %v1844_v63 }
 0x11a   : > { %942 = vmatpush.bf16.msrb.mxu0 %v1796_v41 }
 0x11b   : > { %974 = vmatmul.bf16.vlgmr.msrb.gmra.mxu1 %v2285_v53 }
 0x11e   : > { %1016 = vmatmul.bf16.gmra.mxu2 %v996_v51  ;;  %v1788_v51 = vor.u32 %v2007_v43, %v1785_v44 }
 0x120   : > { %943 = vmatpush.bf16.msrb.mxu0 %v1788_v51 }
 0x124   : > { %944 = vmatpush.bf16.msrb.mxu0 %v1780_v62 }
 0x127   : > { %945 = vmatmul.bf16.vlgmr.msrb.gmra.mxu0 %v2283_v52 }
 0x12b   : > { %979 = vmatmul.bf16.gmra.mxu1 %v2295_v59 }
 0x12e   : > { %1021 = vmatmul.bf16.gmra.mxu2 %v997_v32 }
 0x137   : > { %950 = vmatmul.bf16.gmra.mxu0 %v2293_v58 }
 0x13b   : > { %984 = vmatmul.bf16.gmra.mxu1 %v2332_v10 }
 0x13e   : > { %1026 = vmatmul.bf16.gmra.mxu2 %v998_v0 }
 0x147   : > { %955 = vmatmul.bf16.gmra.mxu0 %v2330_v9 }
 0x14b   : > { %989 = vmatmul.bf16.gmra.mxu1 %v2374_v29 }
 0x157   : > { %960 = vmatmul.bf16.gmra.mxu0 %v2372_v27 }
 0x191   : > { %v1012_v1 = vpop.f32.mrf.mxu2 }
 0x192   : > { %v1032_v2 = vmul.f32 0.088388346, %v1012_v1 }
 0x194   : > { %v1041_v3 = vsel %vm1040_vm0, %v1032_v2, -inf }
 0x195   : > { %1042 = vmax.xlane.f32.xlu0 %v1041_v3 }
 0x198   : > { %v975_v16 = vpop.f32.mrf.mxu1 }
 0x199   : > { %v1014_v52 = vpop.f32.mrf.mxu2 }
 0x19a   : > { %v1033_v53 = vmul.f32 0.088388346, %v1014_v52 }
 0x19c   : > { %v1044_v58 = vsel %vm1040_vm0, %v1033_v53, -inf }
 0x19d   : > { %1045 = vmax.xlane.f32.xlu0 %v1044_v58 }
 0x1a0   : > { %v977_v24 = vpop.f32.mrf.mxu1 }
 0x1a1   : > { %v1017_v59 = vpop.f32.mrf.mxu2 }
 0x1a2   : > { %v1034_v4 = vmul.f32 0.088388346, %v1017_v59 }
 0x1a4   : > { %v1047_v9 = vsel %vm1040_vm0, %v1034_v4, -inf  ;;  %v946_v14 = vpop.f32.mrf.mxu0 }
 0x1a5   : > { %1048 = vmax.xlane.f32.xlu1 %v1047_v9  ;;  %v947_v15 = vadd.f32 %v946_v14, %v676_v13 }
 0x1a7   : > { %v2529_v17 = vadd.f32 %v975_v16, %v947_v15 }
 0x1a8   : > { %v980_v26 = vpop.f32.mrf.mxu1 }
 0x1a9   : > { %v1019_v10 = vpop.f32.mrf.mxu2 }
 0x1aa   : > { %v2516_v27 = vmul.f32 0.088388346, %v1019_v10 }
 0x1ac   : > { %v1050_v29 = vsel %vm1040_vm0, %v2516_v27, -inf  ;;  %v948_v48 = vpop.f32.mrf.mxu0 }
 0x1ad   : > { %1051 = vmax.xlane.f32.xlu1 %v1050_v29  ;;  %v949_v52 = vadd.f32 %v948_v48, %v676_v13 }
 0x1af   : > { %v978_v29 = vadd.f32 %v977_v24, %v949_v52  ;;  %v2047_v52 = vld [vmem:[%s2940_s6 + $0x54] sm:$0xf] }
 0x1b0   : > { %v982_v30 = vpop.f32.mrf.mxu1 }
 0x1b1   : > { %v1022_v5 = vpop.f32.mrf.mxu2 }
 0x1b2   : > { %v2520_v6 = vmul.f32 0.088388346, %v1022_v5 }
 0x1b4   : > { %v1053_v7 = vsel %vm1040_vm0, %v2520_v6, -inf  ;;  %v951_v25 = vpop.f32.mrf.mxu0 }
 0x1b5   : > { %1054 = vmax.xlane.f32.xlu2 %v1053_v7  ;;  %v952_v1 = vadd.f32 %v951_v25, %v676_v13 }
 0x1b7   : > { %v981_v59 = vadd.f32 %v980_v26, %v952_v1 }
 0x1b8   : > { %v985_v32 = vpop.f32.mrf.mxu1 }
 0x1b9   : > { %v1024_v8 = vpop.f32.mrf.mxu2 }
 0x1ba   : > { %v2524_v11 = vmul.f32 0.088388346, %v1024_v8 }
 0x1bc   : > { %v1056_v12 = vsel %vm1040_vm0, %v2524_v11, -inf  ;;  %v953_v28 = vpop.f32.mrf.mxu0 }
 0x1bd   : > { %1057 = vmax.xlane.f32.xlu2 %v1056_v12  ;;  %v1133_v12 = vpack.c.bf16 %v978_v29, %v2529_v17  ;;  %v2045_v29 = vld [vmem:[%s2940_s6 + $0x44] sm:$0xf] }
 0x1c0   : > { %v987_v34 = vpop.f32.mrf.mxu1 }
 0x1c1   : > { %v1027_v18 = vpop.f32.mrf.mxu2 }
 0x1c2   : > { %v2531_v19 = vmul.f32 0.088388346, %v1027_v18 }
 0x1c4   : > { %v1059_v20 = vsel %vm1040_vm0, %v2531_v19, -inf  ;;  %v956_v31 = vpop.f32.mrf.mxu0 }
 0x1c5   : > { %1060 = vmax.xlane.f32.xlu0 %v1059_v20  ;;  %v957_v51 = vadd.f32 %v956_v31, %v676_v13 }
 0x1c7   : > { %v986_v62 = vadd.f32 %v985_v32, %v957_v51  ;;  %v2052_v51 = vld [vmem:[%s2940_s6 + $0x74] sm:$0xf0] }
 0x1c8   : > { %v990_v40 = vpop.f32.mrf.mxu1 }
 0x1c9   : > { %v1029_v21 = vpop.f32.mrf.mxu2 }
 0x1ca   : > { %v2535_v22 = vmul.f32 0.088388346, %v1029_v21 }
 0x1cc   : > { %v1062_v23 = vsel %vm1040_vm0, %v2535_v22, -inf  ;;  %v958_v33 = vpop.f32.mrf.mxu0 }
 0x1cd   : > { %1063 = vmax.xlane.f32.xlu1 %v1062_v23  ;;  %v959_v54 = vadd.f32 %v958_v33, %v676_v13 }
 0x1cf   : > { %v988_v63 = vadd.f32 %v987_v34, %v959_v54  ;;  %v2051_v54 = vld [vmem:[%s2940_s6 + $0x74] sm:$0xf] }
 0x1d0   : > { %v992_v50 = vpop.f32.mrf.mxu1 }
 0x1d4   : > { %v961_v39 = vpop.f32.mrf.mxu0 }
 0x1d5   : > { %v962_v46 = vadd.f32 %v961_v39, %v676_v13 }
 0x1d7   : > { %v991_v57 = vadd.f32 %v990_v40, %v962_v46 }
 0x1dc   : > { %v963_v47 = vpop.f32.mrf.mxu0 }
 0x1dd   : > { %v964_v49 = vadd.f32 %v963_v47, %v676_v13 }
 0x1df   : > { %v993_v35 = vadd.f32 %v992_v50, %v964_v49 }
 0x1e1   : > { %v1136_v3 = vpack.c.bf16 %v993_v35, %v991_v57  ;;  %v1955_v57 = vld [vmem:[%s2940_s6 + $0x60] sm:$0xf]  ;;  %v2050_v35 = vld [vmem:[%s2940_s6 + $0x64] sm:$0xf0] }
 0x1e3   : > { %1153 = vmatpush.bf16.msrb.mxu3 %v1136_v3  ;;  %v2048_v3 = vld [vmem:[%s2940_s6 + $0x54] sm:$0xf0] }
 0x208   : > { %v1043_v36 = vpop.xlane.xlu0 %1042 }
 0x209   : > { %v1065_v37 = vsub.f32 %v1032_v2, %v1043_v36  ;;  %v954_v2 = vadd.f32 %v953_v28, %v676_v13 }
 0x20b   : > { %v1073_v38 = vmul.f32 1.442695, %v1065_v37 }
 0x20d   : > { %2063 = vpow2.f32 %v1073_v38 }
 0x210   : > { %v1046_v41 = vpop.xlane.xlu0 %1045 }
 0x211   : > { %v1066_v42 = vsub.f32 %v1033_v53, %v1046_v41  ;;  %v1135_v53 = vpack.c.bf16 %v988_v63, %v986_v62  ;;  %v1957_v62 = vld [vmem:[%s2940_s6 + $0x68] sm:$0xf0]  ;;  %v1956_v63 = vor.u32 %v2050_v35, %v1955_v57 }
 0x213   : > { %v2539_v43 = vpop.eup %2063  ;;  %v1075_v44 = vmul.f32 1.442695, %v1066_v42  ;;  %1154 = vmatpush.bf16.msrb.mxu3 %v1135_v53  ;;  %v1949_v53 = vld [vmem:[%s2940_s6 + $0x58] sm:$0xf0] }
 0x214   : > { %v1089_v45 = vsel %vm1040_vm0, %v2539_v43, 0.0 }
 0x215   : > { %2065 = vpow2.f32 %v1075_v44  ;;  %1090 = vadd.xlane.f32.xlu2 %v1089_v45 }
 0x218   : > { %v1049_v55 = vpop.xlane.xlu1 %1048 }
 0x219   : > { %v1067_v56 = vsub.f32 %v1034_v4, %v1049_v55  ;;  %v983_v4 = vadd.f32 %v982_v30, %v954_v2  ;;  %v1947_v2 = vld [vmem:[%s2940_s6 + $0x50] sm:$0xf] }
 0x21b   : > { %v2543_v60 = vpop.eup %2065  ;;  %v1077_v61 = vmul.f32 1.442695, %v1067_v56  ;;  %v1134_v8 = vpack.c.bf16 %v983_v4, %v981_v59  ;;  %v1965_v56 = vld [vmem:[%s2940_s6 + $0x78] sm:$0xf0]  ;;  %v1952_v59 = vor.u32 %v2047_v52, %v1949_v53  ;;  %v1939_v4 = vld [vmem:[%s2940_s6 + $0x40] sm:$0xf] }
 0x21c   : > { %v1092_v0 = vsel %vm1040_vm0, %v2543_v60, 0.0  ;;  %v1433_v52 = vld [vmem:[%s2942_s8 + $0xc0] sm:$0xff] }
 0x21d   : > { %2067 = vpow2.f32 %v1077_v61  ;;  %1093 = vadd.xlane.f32.xlu0 %v1092_v0  ;;  %1155 = vmatpush.bf16.msrb.mxu3 %v1134_v8  ;;  %v2049_v61 = vld [vmem:[%s2940_s6 + $0x64] sm:$0xf] }
 0x21e   : > { %v1960_v1 = vor.u32 %v2049_v61, %v1957_v62  ;;  %v1439_v62 = vld [vmem:[%s2942_s8 + $0xf0] sm:$0xff]  ;;  %v1465_v53 = vld [vmem:[%s2942_s8 + $0x1c0] sm:$0xff] }
 0x21f   : > { %1479 = vmatpush.msra.mxu2 %v1439_v62 }
 0x220   : > { %v1052_v58 = vpop.xlane.xlu1 %1051 }
 0x221   : > { %v1068_v9 = vsub.f32 %v2516_v27, %v1052_v58  ;;  %1156 = vmatpush.bf16.msrb.mxu3 %v1133_v12  ;;  %v1948_v58 = vor.u32 %v2048_v3, %v1947_v2  ;;  %v1435_v2 = vld [vmem:[%s2942_s8 + $0xd0] sm:$0xff] }
 0x222   : > { %v1467_v3 = vld [vmem:[%s2942_s8 + $0x1d0] sm:$0xff] }
 0x223   : > { %v2068_v10 = vpop.eup %2067  ;;  %v1079_v5 = vmul.f32 1.442695, %v1068_v9  ;;  %v2046_v9 = vld [vmem:[%s2940_s6 + $0x44] sm:$0xf0] }
 0x224   : > { %v1095_v7 = vsel %vm1040_vm0, %v2068_v10, 0.0  ;;  %v1940_v8 = vor.u32 %v2046_v9, %v1939_v4  ;;  %v1431_v4 = vld [vmem:[%s2942_s8 + $0xb0] sm:$0xff] }
 0x225   : > { %2069 = vpow2.f32 %v1079_v5  ;;  %1096 = vadd.xlane.f32.xlu1 %v1095_v7  ;;  %v1941_v5 = vld [vmem:[%s2940_s6 + $0x48] sm:$0xf0]  ;;  %v1463_v9 = vld [vmem:[%s2942_s8 + $0x1b0] sm:$0xff] }
 0x228   : > { %v1055_v13 = vpop.xlane.xlu2 %1054 }
 0x229   : > { %v1069_v14 = vsub.f32 %v2520_v6, %v1055_v13 }
 0x22b   : > { %v2070_v15 = vpop.eup %2069  ;;  %v1081_v16 = vmul.f32 1.442695, %v1069_v14  ;;  %v1944_v14 = vor.u32 %v2045_v29, %v1941_v5  ;;  %v1461_v29 = vld [vmem:[%s2942_s8 + $0x1a0] sm:$0xff]  ;;  %v1427_v5 = vld [vmem:[%s2942_s8 + $0x90] sm:$0xff] }
 0x22c   : > { %v1098_v27 = vsel %vm1040_vm0, %v2070_v15, 0.0 }
 0x22d   : > { %2071 = vpow2.f32 %v1081_v16  ;;  %1099 = vadd.xlane.f32.xlu2 %v1098_v27  ;;  %v2044_v16 = vld [vmem:[%s2940_s6 + $0x34] sm:$0xf0]  ;;  %v2043_v27 = vld [vmem:[%s2940_s6 + $0x34] sm:$0xf] }
 0x230   : > { %v1058_v18 = vpop.xlane.xlu2 %1057 }
 0x231   : > { %v1070_v20 = vsub.f32 %v2524_v11, %v1058_v18  ;;  %v1933_v18 = vld [vmem:[%s2940_s6 + $0x38] sm:$0xf0] }
 0x233   : > { %v2553_v21 = vpop.eup %2071  ;;  %v1083_v23 = vmul.f32 1.442695, %v1070_v20 }
 0x234   : > { %v1101_v48 = vsel %vm1040_vm0, %v2553_v21, 0.0 }
 0x235   : > { %2073 = vpow2.f32 %v1083_v23  ;;  %1102 = vadd.xlane.f32.xlu0 %v1101_v48  ;;  %v1936_v48 = vor.u32 %v2043_v27, %v1933_v18  ;;  %v1421_v27 = vld [vmem:[%s2942_s8 + $0x60] sm:$0xff] }
 0x236   : > { %v1453_v18 = vld [vmem:[%s2942_s8 + $0x160] sm:$0xff] }
 0x238   : > { %v1061_v17 = vpop.xlane.xlu0 %1060 }
 0x239   : > { %v1071_v6 = vsub.f32 %v2531_v19, %v1061_v17 }
 0x23b   : > { %v2558_v24 = vpop.eup %2073  ;;  %v1085_v25 = vmul.f32 1.442695, %v1071_v6 }
 0x23c   : > { %v1104_v26 = vsel %vm1040_vm0, %v2558_v24, 0.0 }
 0x23d   : > { %2075 = vpow2.f32 %v1085_v25  ;;  %1105 = vadd.xlane.f32.xlu1 %v1104_v26 }
 0x240   : > { %v1064_v11 = vpop.xlane.xlu1 %1063 }
 0x241   : > { %v1072_v28 = vsub.f32 %v2535_v22, %v1064_v11 }
 0x243   : > { %v2563_v30 = vpop.eup %2075  ;;  %v1087_v31 = vmul.f32 1.442695, %v1072_v28  ;;  %v1923_v28 = vld [vmem:[%s2940_s6 + $0x20] sm:$0xf] }
 0x244   : > { %v1107_v32 = vsel %vm1040_vm0, %v2563_v30, 0.0 }
 0x245   : > { %2077 = vpow2.f32 %v1087_v31  ;;  %1108 = vadd.xlane.f32.xlu2 %v1107_v32  ;;  %v2042_v31 = vld [vmem:[%s2940_s6 + $0x24] sm:$0xf0]  ;;  %v2041_v32 = vld [vmem:[%s2940_s6 + $0x24] sm:$0xf] }
 0x24b   : > { %v2567_v19 = vpop.eup %2077 }
 0x24c   : > { %v1110_v33 = vsel %vm1040_vm0, %v2567_v19, 0.0 }
 0x24d   : > { %1111 = vadd.xlane.f32.xlu0 %v1110_v33  ;;  %v1924_v33 = vor.u32 %v2042_v31, %v1923_v28  ;;  %v1411_v28 = vld [vmem:[%s2942_s8 + $0x10] sm:$0xff] }
 0x24e   : > { %v1443_v31 = vld [vmem:[%s2942_s8 + $0x110] sm:$0xff] }
 0x288   : > { %v1091_v34 = vpop.xlane.xlu2 %1090 }
 0x289   : > { %2079 = vrcp.f32 %v1091_v34  ;;  %v1915_v34 = vld [vmem:[%s2940_s6 + $0x10] sm:$0xf] }
 0x28f   : > { %v2080_v37 = vpop.eup %2079 }
 0x290   : > { %v1094_v36 = vpop.xlane.xlu0 %1093  ;;  %v1121_v38 = vmul.f32 %v2080_v37, %v2539_v43  ;;  %v1963_v43 = vld [vmem:[%s2940_s6 + $0x70] sm:$0xf]  ;;  %v2039_v37 = vld [vmem:[%s2940_s6 + $0x14] sm:$0xf] }
 0x291   : > { %2081 = vrcp.f32 %v1094_v36  ;;  %v1964_v55 = vor.u32 %v2052_v51, %v1963_v43  ;;  %v2040_v36 = vld [vmem:[%s2940_s6 + $0x14] sm:$0xf0] }
 0x293   : > { %1284 = vmatpush.bf16.msra.mxu0 %v1964_v55 }
 0x297   : > { %v2082_v22 = vpop.eup %2081  ;;  %1285 = vmatpush.bf16.msra.mxu0 %v1956_v63  ;;  %v1471_v63 = vld [vmem:[%s2942_s8 + $0x1f0] sm:$0xff] }
 0x298   : > { %v1122_v39 = vmul.f32 %v2082_v22, %v2543_v60  ;;  %v1097_v41 = vpop.xlane.xlu1 %1096  ;;  %v1968_v60 = vor.u32 %v2051_v54, %v1965_v56  ;;  %v1916_v22 = vor.u32 %v2040_v36, %v1915_v34  ;;  %1499 = vmatpush.msra.mxu3 %v1471_v63  ;;  %v1440_v34 = vld [vmem:[%s2942_s8 + $0xf8] sm:$0xff] }
 0x299   : > { %2083 = vrcp.f32 %v1097_v41  ;;  %v2038_v41 = vld [vmem:[%s2940_s6 + $0x4] sm:$0xf0]  ;;  %v1472_v36 = vld [vmem:[%s2942_s8 + $0x1f8] sm:$0xff] }
 0x29a   : > { %v1129_v40 = vpack.c.bf16 %v1122_v39, %v1121_v38  ;;  %1313 = vmatpush.bf16.msra.mxu1 %v1968_v60  ;;  %v1917_v38 = vld [vmem:[%s2940_s6 + $0x18] sm:$0xf0] }
 0x29b   : > { %1286 = vmatpush.bf16.msra.mxu0 %v1948_v58  ;;  %v1920_v39 = vor.u32 %v2039_v37, %v1917_v38  ;;  %v1438_v37 = vld [vmem:[%s2942_s8 + $0xe8] sm:$0xff]  ;;  %v1436_v38 = vld [vmem:[%s2942_s8 + $0xd8] sm:$0xff] }
 0x29c   : > { %1901 = vmatmul.msk.bf16.vlgmr.msrb.gmra.mxu3 %vm1040_vm0, %v1129_v40  ;;  %v1907_v40 = vld [vmem:[%s2940_s6] sm:$0xf] }
 0x29e   : > { %1314 = vmatpush.bf16.msra.mxu1 %v1960_v1  ;;  %v1469_v1 = vld [vmem:[%s2942_s8 + $0x1e0] sm:$0xff] }
 0x29f   : > { %v2084_v44 = vpop.eup %2083  ;;  %1287 = vmatpush.bf16.msra.mxu0 %v1940_v8  ;;  %1500 = vmatpush.msra.mxu3 %v1469_v1  ;;  %v1425_v8 = vld [vmem:[%s2942_s8 + $0x80] sm:$0xff]  ;;  %v381_v1 = vld [vmem:[%s2353_s25 + $0x10] sm:$0xff] }
 0x2a0   : > { %v1100_v42 = vpop.xlane.xlu2 %1099  ;;  %v1123_v46 = vmul.f32 %v2084_v44, %v2068_v10  ;;  %v1908_v44 = vor.u32 %v2038_v41, %v1907_v40  ;;  %v1198_v40 = vld [vmem:[%s2941_s7] sm:$0x3]  ;;  %v1434_v41 = vld [vmem:[%s2942_s8 + $0xc8] sm:$0xff] }
 0x2a1   : > { %2085 = vrcp.f32 %v1100_v42  ;;  %v2037_v42 = vld [vmem:[%s2940_s6 + $0x4] sm:$0xf]  ;;  %1501 = vmatpush.msra.mxu3 %v1467_v3 }
 0x2a2   : > { %1315 = vmatpush.bf16.msra.mxu1 %v1952_v59 }
 0x2a3   : > { %1502 = vmatpush.msra.mxu3 %v1465_v53  ;;  %v1426_v53 = vld [vmem:[%s2942_s8 + $0x88] sm:$0xff] }
 0x2a5   : > { %1503 = vmatpush.msra.mxu3 %v1463_v9  ;;  %v622_v9 = vunpack.c.h.bf16 %v381_v1 }
 0x2a6   : > { %1316 = vmatpush.bf16.msra.mxu1 %v1944_v14 }
 0x2a7   : > { %v2086_v45 = vpop.eup %2085  ;;  %1504 = vmatpush.msra.mxu3 %v1461_v29  ;;  %v383_v29 = vld [vmem:[%s2353_s25 + $0x20] sm:$0xff] }
 0x2a8   : > { %v1124_v47 = vmul.f32 %v2086_v45, %v2070_v15  ;;  %v1103_v50 = vpop.xlane.xlu0 %1102  ;;  %v1931_v15 = vld [vmem:[%s2940_s6 + $0x30] sm:$0xf]  ;;  %v1909_v45 = vld [vmem:[%s2940_s6 + $0x8] sm:$0xf0] }
 0x2a9   : > { %2087 = vrcp.f32 %v1103_v50 }
 0x2aa   : > { %v1130_v49 = vpack.c.bf16 %v1124_v47, %v1123_v46  ;;  %1317 = vmatpush.bf16.msra.mxu1 %v1936_v48  ;;  %v1912_v46 = vor.u32 %v2037_v42, %v1909_v45  ;;  %v1449_v48 = vld [vmem:[%s2942_s8 + $0x140] sm:$0xff]  ;;  %v1466_v42 = vld [vmem:[%s2942_s8 + $0x1c8] sm:$0xff] }
 0x2ac   : > { %1902 = vmatmul.msk.bf16.gmra.mxu3 %vm1040_vm0, %v1130_v49 }
 0x2af   : > { %v2088_v10 = vpop.eup %2087 }
 0x2b0   : > { %v1106_v0 = vpop.xlane.xlu1 %1105  ;;  %v1125_v12 = vmul.f32 %v2088_v10, %v2553_v21  ;;  %v1932_v21 = vor.u32 %v2044_v16, %v1931_v15  ;;  %v1429_v10 = vld [vmem:[%s2942_s8 + $0xa0] sm:$0xff]  ;;  %v1423_v15 = vld [vmem:[%s2942_s8 + $0x70] sm:$0xff] }
 0x2b1   : > { %2089 = vrcp.f32 %v1106_v0  ;;  %v1437_v0 = vld [vmem:[%s2942_s8 + $0xe0] sm:$0xff]  ;;  %v1455_v16 = vld [vmem:[%s2942_s8 + $0x170] sm:$0xff] }
 0x2b2   : > { %1288 = vmatpush.bf16.msra.mxu0 %v1932_v21  ;;  %1480 = vmatpush.msra.mxu2 %v1437_v0  ;;  %v1451_v21 = vld [vmem:[%s2942_s8 + $0x150] sm:$0xff] }
 0x2b4   : > { %1481 = vmatpush.msra.mxu2 %v1435_v2 }
 0x2b6   : > { %1289 = vmatpush.bf16.msra.mxu0 %v1924_v33  ;;  %1482 = vmatpush.msra.mxu2 %v1433_v52  ;;  %v1441_v33 = vld [vmem:[%s2942_s8 + $0x100] sm:$0xff]  ;;  %v382_v52 = vld [vmem:[%s2353_s25 + $0x18] sm:$0xff] }
 0x2b7   : > { %v2090_v7 = vpop.eup %2089 }
 0x2b8   : > { %v1126_v13 = vmul.f32 %v2090_v7, %v2558_v24  ;;  %v1109_v23 = vpop.xlane.xlu2 %1108  ;;  %1483 = vmatpush.msra.mxu2 %v1431_v4  ;;  %v1459_v7 = vld [vmem:[%s2942_s8 + $0x190] sm:$0xff] }
 0x2b9   : > { %2091 = vrcp.f32 %v1109_v23  ;;  %1505 = vmatpush.msra.mxu3 %v1459_v7  ;;  %v1417_v23 = vld [vmem:[%s2942_s8 + $0x40] sm:$0xff] }
 0x2ba   : > { %v1131_v20 = vpack.c.bf16 %v1126_v13, %v1125_v12  ;;  %1290 = vmatpush.bf16.msra.mxu0 %v1916_v22  ;;  %1484 = vmatpush.msra.mxu2 %v1429_v10  ;;  %v1457_v12 = vld [vmem:[%s2942_s8 + $0x180] sm:$0xff]  ;;  %v1470_v22 = vld [vmem:[%s2942_s8 + $0x1e8] sm:$0xff] }
 0x2bb   : > { %1506 = vmatpush.msra.mxu3 %v1457_v12  ;;  %v1456_v12 = vld [vmem:[%s2942_s8 + $0x178] sm:$0xff] }
 0x2bc   : > { %1903 = vmatmul.msk.bf16.gmra.mxu3 %vm1040_vm0, %v1131_v20  ;;  %1485 = vmatpush.msra.mxu2 %v1427_v5  ;;  %v1419_v20 = vld [vmem:[%s2942_s8 + $0x50] sm:$0xff] }
 0x2bd   : > { %1507 = vmatpush.msra.mxu3 %v1455_v16  ;;  %v623_v16 = vunpack.c.l.bf16 %v382_v52 }
 0x2be   : > { %1291 = vmatpush.bf16.msra.mxu0 %v1908_v44  ;;  %1486 = vmatpush.msra.mxu2 %v1425_v8  ;;  %v1424_v8 = vld [vmem:[%s2942_s8 + $0x78] sm:$0xff] }
 0x2bf   : > { %v2092_v6 = vpop.eup %2091  ;;  %1508 = vmatpush.msra.mxu3 %v1453_v18  ;;  %v1454_v18 = vld [vmem:[%s2942_s8 + $0x168] sm:$0xff] }
 0x2c0   : > { %v1112_v17 = vpop.xlane.xlu0 %1111  ;;  %v1127_v25 = vmul.f32 %v2092_v6, %v2563_v30  ;;  %v1925_v30 = vld [vmem:[%s2940_s6 + $0x28] sm:$0xf0]  ;;  %1487 = vmatpush.msra.mxu2 %v1423_v15 }
 0x2c1   : > { %2093 = vrcp.f32 %v1112_v17  ;;  %1509 = vmatpush.msra.mxu3 %v1451_v21 }
 0x2c2   : > { %1488 = vmatpush.msra.mxu2 %v1421_v27  ;;  %v1422_v27 = vld [vmem:[%s2942_s8 + $0x68] sm:$0xff] }
 0x2c3   : > { %1510 = vmatpush.msra.mxu3 %v1449_v48 }
 0x2c4   : > { %1489 = vmatpush.msra.mxu2 %v1419_v20 }
 0x2c6   : > { %1490 = vmatpush.msra.mxu2 %v1417_v23  ;;  %v624_v23 = vunpack.c.h.bf16 %v382_v52 }
 0x2c7   : > { %v2094_v24 = vpop.eup %2093 }
 0x2c8   : > { %v1128_v26 = vmul.f32 %v2094_v24, %v2567_v19  ;;  %v1928_v19 = vor.u32 %v2041_v32, %v1925_v30  ;;  %v1415_v24 = vld [vmem:[%s2942_s8 + $0x30] sm:$0xff]  ;;  %v1409_v32 = vld [vmem:[%s2942_s8] sm:$0xff] }
 0x2c9   : > { %1491 = vmatpush.msra.mxu2 %v1415_v24  ;;  %v1452_v24 = vld [vmem:[%s2942_s8 + $0x158] sm:$0xff] }
 0x2ca   : > { %v1132_v11 = vpack.c.bf16 %v1128_v26, %v1127_v25  ;;  %1318 = vmatpush.bf16.msra.mxu1 %v1928_v19  ;;  %v1447_v25 = vld [vmem:[%s2942_s8 + $0x130] sm:$0xff]  ;;  %v1413_v26 = vld [vmem:[%s2942_s8 + $0x20] sm:$0xff] }
 0x2cb   : > { %1511 = vmatpush.msra.mxu3 %v1447_v25  ;;  %1492 = vmatpush.msra.mxu2 %v1413_v26  ;;  %v625_v25 = vunpack.c.l.bf16 %v383_v29  ;;  %v626_v26 = vunpack.c.h.bf16 %v383_v29 }
 0x2cc   : > { %1904 = vmatmul.msk.bf16.gmra.mxu3 %vm1040_vm0, %v1132_v11  ;;  %v1445_v11 = vld [vmem:[%s2942_s8 + $0x120] sm:$0xff] }
 0x2cd   : > { %1512 = vmatpush.msra.mxu3 %v1445_v11  ;;  %1493 = vmatpush.msra.mxu2 %v1411_v28 }
 0x2ce   : > { %1319 = vmatpush.bf16.msra.mxu1 %v1920_v39  ;;  %v1468_v39 = vld [vmem:[%s2942_s8 + $0x1d8] sm:$0xff] }
 0x2cf   : > { %1513 = vmatpush.msra.mxu3 %v1443_v31  ;;  %1494 = vmatpush.msra.mxu2 %v1409_v32 }
 0x2d1   : > { %1514 = vmatpush.msra.mxu3 %v1441_v33  ;;  %1519 = vmatpush.msrb.mxu2 %v1440_v34  ;;  %v385_v33 = vld [vmem:[%s2353_s25 + $0x30] sm:$0xff] }
 0x2d2   : > { %1320 = vmatpush.bf16.msra.mxu1 %v1912_v46  ;;  %v1432_v46 = vld [vmem:[%s2942_s8 + $0xb8] sm:$0xff] }
 0x2d3   : > { %1539 = vmatpush.msrb.mxu3 %v1472_v36  ;;  %1520 = vmatpush.msrb.mxu2 %v1438_v37 }
 0x2d5   : > { %1540 = vmatpush.msrb.mxu3 %v1470_v22  ;;  %1521 = vmatpush.msrb.mxu2 %v1436_v38 }
 0x2d7   : > { %1541 = vmatpush.msrb.mxu3 %v1468_v39  ;;  %1522 = vmatpush.msrb.mxu2 %v1434_v41 }
 0x2d9   : > { %1542 = vmatpush.msrb.mxu3 %v1466_v42  ;;  %1523 = vmatpush.msrb.mxu2 %v1432_v46  ;;  %v1416_v46 = vld [vmem:[%s2942_s8 + $0x38] sm:$0xff] }
 0x31f   : > { %v1158_v47 = vpop.f32.mrf.mxu3 }
 0x327   : > { %v1160_v49 = vpop.f32.mrf.mxu3 }
 0x328   : > { %v1178_v50 = vpack.c.bf16 %v1160_v49, %v1158_v47  ;;  %v1464_v47 = vld [vmem:[%s2942_s8 + $0x1b8] sm:$0xff]  ;;  %v379_v49 = vld [vmem:[%s2353_s25] sm:$0xff] }
 0x329   : > { %1543 = vmatpush.msrb.mxu3 %v1464_v47  ;;  %v1448_v47 = vld [vmem:[%s2942_s8 + $0x138] sm:$0xff] }
 0x32a   : > { %1292 = vmatmul.bf16.vlgmr.msra.gmra.mxu0 %v1178_v50  ;;  %1321 = vmatmul.bf16.vlgmr.msra.gmra.mxu1 %v1178_v50  ;;  %v2823_v50 = vperm.slane %v1198_v40, 0 }
 0x32f   : > { %v1163_v43 = vpop.f32.mrf.mxu3 }
 0x337   : > { %v1165_v51 = vpop.f32.mrf.mxu3 }
 0x338   : > { %v1179_v54 = vpack.c.bf16 %v1165_v51, %v1163_v43  ;;  %v2825_v43 = vperm.slane %v1198_v40, 1  ;;  %v380_v51 = vld [vmem:[%s2353_s25 + $0x8] sm:$0xff] }
 0x339   : > { %v619_v63 = vunpack.c.l.bf16 %v380_v51  ;;  %v620_v2 = vunpack.c.h.bf16 %v380_v51 }
 0x33a   : > { %1297 = vmatmul.bf16.gmra.mxu0 %v1179_v54  ;;  %1326 = vmatmul.bf16.gmra.mxu1 %v1179_v54  ;;  %v1430_v54 = vld [vmem:[%s2942_s8 + $0xa8] sm:$0xff] }
 0x33b   : > { %1524 = vmatpush.msrb.mxu2 %v1430_v54 }
 0x33f   : > { %v1168_v55 = vpop.f32.mrf.mxu3 }
 0x347   : > { %v1170_v56 = vpop.f32.mrf.mxu3 }
 0x348   : > { %v1180_v57 = vpack.c.bf16 %v1170_v56, %v1168_v55  ;;  %v1462_v55 = vld [vmem:[%s2942_s8 + $0x1a8] sm:$0xff]  ;;  %v617_v56 = vunpack.c.l.bf16 %v379_v49 }
 0x349   : > { %1544 = vmatpush.msrb.mxu3 %v1462_v55 }
 0x34a   : > { %1302 = vmatmul.bf16.gmra.mxu0 %v1180_v57  ;;  %1331 = vmatmul.bf16.gmra.mxu1 %v1180_v57  ;;  %v618_v57 = vunpack.c.h.bf16 %v379_v49 }
 0x34f   : > { %v1173_v35 = vpop.f32.mrf.mxu3 }
 0x357   : > { %v1175_v60 = vpop.f32.mrf.mxu3 }
 0x358   : > { %v1181_v61 = vpack.c.bf16 %v1175_v60, %v1173_v35  ;;  %v1428_v35 = vld [vmem:[%s2942_s8 + $0x98] sm:$0xff] }
 0x359   : > { %v1460_v60 = vld [vmem:[%s2942_s8 + $0x198] sm:$0xff]  ;;  %1525 = vmatpush.msrb.mxu2 %v1428_v35  ;;  %v1414_v35 = vld [vmem:[%s2942_s8 + $0x28] sm:$0xff] }
 0x35a   : > { %1307 = vmatmul.bf16.gmra.mxu0 %v1181_v61  ;;  %1336 = vmatmul.bf16.gmra.mxu1 %v1181_v61 }
 0x35b   : > { %1545 = vmatpush.msrb.mxu3 %v1460_v60  ;;  %1526 = vmatpush.msrb.mxu2 %v1426_v53  ;;  %v1446_v60 = vld [vmem:[%s2942_s8 + $0x128] sm:$0xff]  ;;  %v1412_v53 = vld [vmem:[%s2942_s8 + $0x18] sm:$0xff] }
 0x35d   : > { %1527 = vmatpush.msrb.mxu2 %v1424_v8  ;;  %v1410_v8 = vld [vmem:[%s2942_s8 + $0x8] sm:$0xff] }
 0x35f   : > { %1528 = vmatpush.msrb.mxu2 %v1422_v27 }
 0x3a7   : > { %v2701_v58 = vpop.f32.mrf.mxu0  ;;  %v2703_v59 = vpop.f32.mrf.mxu1 }
 0x3a8   : > { %v1294_v61 = vadd.f32 %v2701_v58, %v2823_v50  ;;  %v1323_v62 = vadd.f32 %v2703_v59, %v2825_v43  ;;  %v1458_v58 = vld [vmem:[%s2942_s8 + $0x188] sm:$0xff]  ;;  %v621_v59 = vunpack.c.l.bf16 %v381_v1 }
 0x3a9   : > { %1546 = vmatpush.msrb.mxu3 %v1458_v58  ;;  %v1444_v58 = vld [vmem:[%s2942_s8 + $0x118] sm:$0xff] }
 0x3ab   : > { %1547 = vmatpush.msrb.mxu3 %v1456_v12  ;;  %v1442_v12 = vld [vmem:[%s2942_s8 + $0x108] sm:$0xff] }
 0x3ad   : > { %1548 = vmatpush.msrb.mxu3 %v1454_v18 }
 0x3af   : > { %v2729_v13 = vpop.f32.mrf.mxu0  ;;  %v2731_v14 = vpop.f32.mrf.mxu1  ;;  %1549 = vmatpush.msrb.mxu3 %v1452_v24 }
 0x3b0   : > { %v1296_v0 = vadd.f32 %v2729_v13, %v2823_v50  ;;  %v1325_v3 = vadd.f32 %v2731_v14, %v2825_v43  ;;  %v1342_v13 = vadd.f32 %v1294_v61, %v617_v56  ;;  %v1343_v14 = vadd.f32 %v1323_v62, %v618_v57 }
 0x3b1   : > { %v630_v62 = vunpack.c.h.bf16 %v385_v33 }
 0x3b2   : > { %v1344_v15 = vadd.f32 %v1296_v0, %v619_v63  ;;  %v1345_v20 = vadd.f32 %v1325_v3, %v620_v2  ;;  %v1358_v34 = vmul.f32 0.5, %v1342_v13  ;;  %v1359_v36 = vmul.f32 0.5, %v1343_v14 }
 0x3b3   : > { %v2105_v0 = vmov 64.0  }
 0x3b4   : > { %v1360_v37 = vmul.f32 0.5, %v1344_v15  ;;  %v1361_v38 = vmul.f32 0.5, %v1345_v20  ;;  %2095 = vrcp.f32 %v2105_v0  ;;  %v1473_v0 = vld [vmem:[%s2943_s9] sm:$0x3] }
 0x3b6   : > { %v1374_v1 = vadd.f32 %v1360_v37, %v1358_v34  ;;  %v1387_v2 = vadd.f32 %v1361_v38, %v1359_v36 }
 0x3b7   : > { %v2757_v17 = vpop.f32.mrf.mxu0  ;;  %v2759_v6 = vpop.f32.mrf.mxu1 }
 0x3b8   : > { %v1299_v4 = vadd.f32 %v2757_v17, %v2823_v50  ;;  %v1328_v10 = vadd.f32 %v2759_v6, %v2825_v43  ;;  %v384_v17 = vld [vmem:[%s2353_s25 + $0x28] sm:$0xff]  ;;  %v1420_v6 = vld [vmem:[%s2942_s8 + $0x58] sm:$0xff] }
 0x3b9   : > { %v627_v22 = vunpack.c.l.bf16 %v384_v17  ;;  %1529 = vmatpush.msrb.mxu2 %v1420_v6  ;;  %v628_v42 = vunpack.c.h.bf16 %v384_v17 }
 0x3ba   : > { %v1346_v11 = vadd.f32 %v1299_v4, %v621_v59  ;;  %v1347_v28 = vadd.f32 %v1328_v10, %v622_v9  ;;  %v2096_v27 = vpop.eup %2095 }
 0x3bb   : > { %vm1405_vm1 = vweird.f32 %v2096_v27 }
 0x3bc   : > { %v1362_v49 = vmul.f32 0.5, %v1346_v11  ;;  %v1363_v51 = vmul.f32 0.5, %v1347_v28 }
 0x3be   : > { %v1375_v9 = vadd.f32 %v1374_v1, %v1362_v49  ;;  %v1388_v10 = vadd.f32 %v1387_v2, %v1363_v51  ;;  %v1475_v1 = vperm.slane %v1473_v0, 0  ;;  %v1476_v2 = vperm.slane %v1473_v0, 1 }
 0x3bf   : > { %v2785_v30 = vpop.f32.mrf.mxu0  ;;  %v2787_v19 = vpop.f32.mrf.mxu1 }
 0x3c0   : > { %v1301_v21 = vadd.f32 %v2785_v30, %v2823_v50  ;;  %v1330_v48 = vadd.f32 %v2787_v19, %v2825_v43  ;;  %v1418_v30 = vld [vmem:[%s2942_s8 + $0x48] sm:$0xff] }
 0x3c1   : > { %v1450_v19 = vld [vmem:[%s2942_s8 + $0x148] sm:$0xff]  ;;  %1530 = vmatpush.msrb.mxu2 %v1418_v30 }
 0x3c2   : > { %v1348_v39 = vadd.f32 %v1301_v21, %v623_v16  ;;  %v1349_v40 = vadd.f32 %v1330_v48, %v624_v23  ;;  %1550 = vmatpush.msrb.mxu3 %v1450_v19 }
 0x3c3   : > { %1531 = vmatpush.msrb.mxu2 %v1416_v46 }
 0x3c4   : > { %1551 = vmatpush.msrb.mxu3 %v1448_v47  ;;  %v1364_v3 = vmul.f32 0.5, %v1348_v39  ;;  %v1365_v52 = vmul.f32 0.5, %v1349_v40 }
 0x3c5   : > { %1532 = vmatpush.msrb.mxu2 %v1414_v35 }
 0x3c6   : > { %1552 = vmatpush.msrb.mxu3 %v1446_v60  ;;  %v1376_v15 = vadd.f32 %v1375_v9, %v1364_v3  ;;  %v1389_v16 = vadd.f32 %v1388_v10, %v1365_v52 }
 0x3c7   : > { %v1303_v44 = vpop.f32.mrf.mxu0  ;;  %v1332_v45 = vpop.f32.mrf.mxu1  ;;  %1533 = vmatpush.msrb.mxu2 %v1412_v53 }
 0x3c8   : > { %v1304_v31 = vadd.f32 %v1303_v44, %v2823_v50  ;;  %v1333_v32 = vadd.f32 %v1332_v45, %v2825_v43  ;;  %v629_v45 = vunpack.c.l.bf16 %v385_v33  ;;  %1553 = vmatpush.msrb.mxu3 %v1444_v58  ;;  %v1565_v58 = vlaneseq }
 0x3c9   : > { %1534 = vmatpush.msrb.mxu2 %v1410_v8 }
 0x3ca   : > { %v1350_v54 = vadd.f32 %v1304_v31, %v625_v25  ;;  %v1351_v55 = vadd.f32 %v1333_v32, %v626_v26  ;;  %1554 = vmatpush.msrb.mxu3 %v1442_v12  ;;  %v1401_v31 = vmul.f32 64.0, %v2096_v27  ;;  %vm1567_vm3 = vcmp.lt.s32.totalorder %v1565_v58, 256 }
 0x3cc   : > { %v1366_v29 = vmul.f32 0.5, %v1350_v54  ;;  %v1402_v38 = vsub.f32 1.0, %v1401_v31 }
 0x3ce   : > { %v1377_v48 = vadd.f32 %v1376_v15, %v1366_v29 }
 0x3cf   : > { %v1305_v5 = vpop.f32.mrf.mxu0  ;;  %v1334_v7 = vpop.f32.mrf.mxu1 }
 0x3d0   : > { %v1306_v41 = vadd.f32 %v1305_v5, %v2823_v50  ;;  %v1335_v44 = vadd.f32 %v1334_v7, %v2825_v43  ;;  %v1367_v5 = vmul.f32 0.5, %v1351_v55  ;;  %v386_v7 = vld [vmem:[%s2353_s25 + $0x38] sm:$0xff] }
 0x3d1   : > { %v631_v21 = vunpack.c.l.bf16 %v386_v7  ;;  %v632_v23 = vunpack.c.h.bf16 %v386_v7 }
 0x3d2   : > { %v1352_v59 = vadd.f32 %v1306_v41, %v627_v22  ;;  %v1353_v4 = vadd.f32 %v1335_v44, %v628_v42  ;;  %v1390_v17 = vadd.f32 %v1389_v16, %v1367_v5  ;;  %v1403_v44 = vmul.f32 %v2096_v27, %v1402_v38 }
 0x3d4   : > { %v1368_v18 = vmul.f32 0.5, %v1352_v59  ;;  %v1369_v20 = vmul.f32 0.5, %v1353_v4 }
 0x3d6   : > { %v1378_v32 = vadd.f32 %v1377_v48, %v1368_v18  ;;  %v1391_v33 = vadd.f32 %v1390_v17, %v1369_v20 }
 0x3d7   : > { %v1308_v56 = vpop.f32.mrf.mxu0  ;;  %v1337_v57 = vpop.f32.mrf.mxu1 }
 0x3d8   : > { %v1309_v61 = vadd.f32 %v1308_v56, %v2823_v50  ;;  %v1338_v63 = vadd.f32 %v1337_v57, %v2825_v43 }
 0x3da   : > { %v1354_v13 = vadd.f32 %v1309_v61, %v629_v45  ;;  %v1355_v14 = vadd.f32 %v1338_v63, %v630_v62 }
 0x3dc   : > { %v1370_v25 = vmul.f32 0.5, %v1354_v13  ;;  %v1371_v26 = vmul.f32 0.5, %v1355_v14 }
 0x3de   : > { %v1379_v34 = vadd.f32 %v1378_v32, %v1370_v25  ;;  %v1392_v36 = vadd.f32 %v1391_v33, %v1371_v26 }
 0x3df   : > { %v1310_v6 = vpop.f32.mrf.mxu0  ;;  %v1339_v24 = vpop.f32.mrf.mxu1 }
 0x3e0   : > { %v1311_v11 = vadd.f32 %v1310_v6, %v2823_v50  ;;  %v1340_v28 = vadd.f32 %v1339_v24, %v2825_v43  ;;  %v1404_v43 = vadd.f32 %v2096_v27, %v1403_v44 }
 0x3e2   : > { %v1356_v30 = vadd.f32 %v1311_v11, %v631_v21  ;;  %v1357_v19 = vadd.f32 %v1340_v28, %v632_v23  ;;  %v1406_v56 = vsel %vm1405_vm1, %v2096_v27, %v1404_v43 }
 0x3e4   : > { %v1372_v37 = vmul.f32 0.5, %v1356_v30  ;;  %v1373_v22 = vmul.f32 0.5, %v1357_v19 }
 0x3e6   : > { %v1380_v39 = vadd.f32 %v1379_v34, %v1372_v37  ;;  %v1393_v40 = vadd.f32 %v1392_v36, %v1373_v22 }
 0x3e8   : > { %v1381_v41 = vrot.slane %v1380_v39, 4  ;;  %v1394_v42 = vrot.slane %v1393_v40, 4 }
 0x3ea   : > { %v1382_v45 = vadd.f32 %v1381_v41, %v1380_v39  ;;  %v1395_v46 = vadd.f32 %v1394_v42, %v1393_v40 }
 0x3ec   : > { %v1383_v50 = vrot.slane %v1382_v45, 2  ;;  %v1396_v47 = vrot.slane %v1395_v46, 2 }
 0x3ee   : > { %v1384_v49 = vadd.f32 %v1383_v50, %v1382_v45  ;;  %v1397_v51 = vadd.f32 %v1396_v47, %v1395_v46 }
 0x3f0   : > { %v1385_v54 = vrot.slane %v1384_v49, 1  ;;  %v1398_v55 = vrot.slane %v1397_v51, 1 }
 0x3f2   : > { %v1386_v57 = vadd.f32 %v1385_v54, %v1384_v49  ;;  %v1399_v35 = vadd.f32 %v1398_v55, %v1397_v51 }
 0x3f4   : > { %v1407_v60 = vmul.f32 %v1406_v56, %v1386_v57  ;;  %v1408_v61 = vmul.f32 %v1406_v56, %v1399_v35 }
 0x3f6   : > { %1495 = vmatmul.f32.vlgmr.msra.gmra.mxu2 %v1407_v60  ;;  %1515 = vmatmul.f32.vlgmr.msra.gmra.mxu3 %v1408_v61 }
 0x3fe   : > { %1535 = vmatmul.f32.vlgmr.msrb.gmra.mxu2 %v1407_v60  ;;  %1555 = vmatmul.f32.vlgmr.msrb.gmra.mxu3 %v1408_v61 }
 0x479   : > { %v1496_v62 = vpop.f32.mrf.mxu2  ;;  %v1516_v63 = vpop.f32.mrf.mxu3 }
 0x47a   : > { %v1497_v52 = vadd.f32 %v1496_v62, %v1475_v1 }
 0x47c   : > { %v1517_v9 = vadd.f32 %v1516_v63, %v1497_v52 }
 0x481   : > { %v1536_v3 = vpop.f32.mrf.mxu2  ;;  %v1556_v59 = vpop.f32.mrf.mxu3 }
 0x482   : > { %v1537_v53 = vadd.f32 %v1536_v3, %v1476_v2 }
 0x484   : > { %v1557_v4 = vadd.f32 %v1556_v59, %v1537_v53 }
 0x486   : > { %v1561_v10 = vrot.slane %v1557_v4, 7 }
 0x488   : > { %v1563_v29 = vsel %vm1562_vm2, %v1517_v9, %v1561_v10 }
 0x489   : > { %1569 = vst.msk [vmem:[%s377_s26] sm:$0x3] %vm1567_vm3, %v1563_v29 }
 0x48a PF: > { %s20_s13 = sadd.s32 1, %s2103_s13  }
 0x48b   : > { %p17_p4 = scmp.ge.s32.totalorder %s20_s13, 4  }
 0x48d   :  { %19 = sbr.rel (!%p17_p4) target bundleno = 1 (0x1), region = 93 }

// kernel: feetnet_forward.9
= control target key start
LH: loop header
LB: loop body
LE: loop exit
PB: predicated region body
PF: predicated region fallthrough
CT: control target
= control target key end

     0   :  { %21 = vsyncpa [#allocation3], 0  ;;  %s1113_s0 = inlined_call_operand.vmem [shape: f32[2,256], index: 0, kind: input, shape index: {}]   ;;  %s1114_s1 = inlined_call_operand.vmem [shape: f32[2,256], index: 1, kind: input, shape index: {}]   ;;  %s1115_s2 = inlined_call_operand.vmem [shape: f32[256,256], index: 2, kind: input, shape index: {}]   ;;  %s1116_s3 = inlined_call_operand.vmem [shape: f32[1,256], index: 3, kind: input, shape index: {}]   ;;  %s1117_s4 = inlined_call_operand.vmem [shape: f32[256,128], index: 4, kind: input, shape index: {}]   ;;  %s1118_s5 = inlined_call_operand.vmem [shape: f32[1,128], index: 5, kind: input, shape index: {}]   ;;  %s1119_s6 = inlined_call_operand.vmem [shape: f32[128,32], index: 6, kind: input, shape index: {}]   ;;  %s1120_s7 = inlined_call_operand.vmem [shape: f32[1,32], index: 7, kind: input, shape index: {}]   ;;  %s1121_s8 = inlined_call_operand.vmem [shape: f32[32,5], index: 8, kind: input, shape index: {}]   ;;  %s1122_s9 = inlined_call_operand.vmem [shape: f32[1,5], index: 9, kind: input, shape index: {}]   ;;  %s1123_s10 = inlined_call_operand.vmem [shape: f32[128,32], index: 10, kind: input, shape index: {}]   ;;  %s1124_s11 = inlined_call_operand.vmem [shape: f32[1,32], index: 11, kind: input, shape index: {}]   ;;  %s1125_s12 = inlined_call_operand.vmem [shape: f32[32,5], index: 12, kind: input, shape index: {}]   ;;  %s1126_s13 = inlined_call_operand.vmem [shape: f32[1,5], index: 13, kind: input, shape index: {}]   ;;  %s1127_s14 = inlined_call_operand.hbm [shape: f32[2,5], index: 14, kind: output, shape index: {0}]   ;;  %s1128_s15 = inlined_call_operand.hbm [shape: f32[2,5], index: 15, kind: output, shape index: {1}]  }
   0x1   :  { %v86_v0 = vld [vmem:[%s1115_s2 + $0xf8] sm:$0xff]  ;;  %v84_v1 = vld [vmem:[%s1115_s2 + $0xe8] sm:$0xff]  ;;  %v85_v3 = vld [vmem:[%s1115_s2 + $0xf0] sm:$0xff] }
   0x2   :  { %v118_v2 = vld [vmem:[%s1115_s2 + $0x1f8] sm:$0xff]  ;;  %171 = vmatpush.msra.mxu2 %v86_v0  ;;  %v116_v4 = vld [vmem:[%s1115_s2 + $0x1e8] sm:$0xff]  ;;  %131 = vmatpush.msra.mxu0 %v85_v3  ;;  %v83_v6 = vld [vmem:[%s1115_s2 + $0xe0] sm:$0xff] }
   0x3   :  { %191 = vmatpush.msra.mxu3 %v118_v2  ;;  %v82_v5 = vld [vmem:[%s1115_s2 + $0xd8] sm:$0xff]  ;;  %v117_v7 = vld [vmem:[%s1115_s2 + $0x1f0] sm:$0xff]  ;;  %v115_v10 = vld [vmem:[%s1115_s2 + $0x1e0] sm:$0xff] }
   0x4   :  { %172 = vmatpush.msra.mxu2 %v84_v1  ;;  %v114_v8 = vld [vmem:[%s1115_s2 + $0x1d8] sm:$0xff]  ;;  %v81_v9 = vld [vmem:[%s1115_s2 + $0xd0] sm:$0xff]  ;;  %132 = vmatpush.msra.mxu0 %v83_v6  ;;  %v80_v11 = vld [vmem:[%s1115_s2 + $0xc8] sm:$0xff] }
   0x5   :  { %192 = vmatpush.msra.mxu3 %v116_v4  ;;  %151 = vmatpush.msra.mxu1 %v117_v7  ;;  %v112_v12 = vld [vmem:[%s1115_s2 + $0x1c8] sm:$0xff]  ;;  %v79_v13 = vld [vmem:[%s1115_s2 + $0xc0] sm:$0xff]  ;;  %v113_v14 = vld [vmem:[%s1115_s2 + $0x1d0] sm:$0xff] }
   0x6   :  { %173 = vmatpush.msra.mxu2 %v82_v5  ;;  %133 = vmatpush.msra.mxu0 %v81_v9  ;;  %v78_v15 = vld [vmem:[%s1115_s2 + $0xb8] sm:$0xff]  ;;  %v77_v17 = vld [vmem:[%s1115_s2 + $0xb0] sm:$0xff]  ;;  %v111_v18 = vld [vmem:[%s1115_s2 + $0x1c0] sm:$0xff] }
   0x7   :  { %193 = vmatpush.msra.mxu3 %v114_v8  ;;  %152 = vmatpush.msra.mxu1 %v115_v10  ;;  %v110_v16 = vld [vmem:[%s1115_s2 + $0x1b8] sm:$0xff]  ;;  %v76_v19 = vld [vmem:[%s1115_s2 + $0xa8] sm:$0xff]  ;;  %v75_v21 = vld [vmem:[%s1115_s2 + $0xa0] sm:$0xff] }
   0x8   :  { %174 = vmatpush.msra.mxu2 %v80_v11  ;;  %134 = vmatpush.msra.mxu0 %v79_v13  ;;  %v108_v20 = vld [vmem:[%s1115_s2 + $0x1a8] sm:$0xff]  ;;  %v109_v22 = vld [vmem:[%s1115_s2 + $0x1b0] sm:$0xff]  ;;  %v74_v23 = vld [vmem:[%s1115_s2 + $0x98] sm:$0xff] }
   0x9   :  { %194 = vmatpush.msra.mxu3 %v112_v12  ;;  %153 = vmatpush.msra.mxu1 %v113_v14  ;;  %v106_v24 = vld [vmem:[%s1115_s2 + $0x198] sm:$0xff]  ;;  %v73_v25 = vld [vmem:[%s1115_s2 + $0x90] sm:$0xff]  ;;  %v107_v26 = vld [vmem:[%s1115_s2 + $0x1a0] sm:$0xff] }
   0xa   :  { %175 = vmatpush.msra.mxu2 %v78_v15  ;;  %135 = vmatpush.msra.mxu0 %v77_v17  ;;  %v72_v27 = vld [vmem:[%s1115_s2 + $0x88] sm:$0xff]  ;;  %v71_v29 = vld [vmem:[%s1115_s2 + $0x80] sm:$0xff]  ;;  %v105_v30 = vld [vmem:[%s1115_s2 + $0x190] sm:$0xff] }
   0xb   :  { %195 = vmatpush.msra.mxu3 %v110_v16  ;;  %154 = vmatpush.msra.mxu1 %v111_v18  ;;  %v104_v28 = vld [vmem:[%s1115_s2 + $0x188] sm:$0xff]  ;;  %v70_v31 = vld [vmem:[%s1115_s2 + $0x78] sm:$0xff]  ;;  %v69_v33 = vld [vmem:[%s1115_s2 + $0x70] sm:$0xff] }
   0xc   :  { %176 = vmatpush.msra.mxu2 %v76_v19  ;;  %136 = vmatpush.msra.mxu0 %v75_v21  ;;  %v102_v32 = vld [vmem:[%s1115_s2 + $0x178] sm:$0xff]  ;;  %v103_v34 = vld [vmem:[%s1115_s2 + $0x180] sm:$0xff]  ;;  %v68_v35 = vld [vmem:[%s1115_s2 + $0x68] sm:$0xff] }
   0xd   :  { %196 = vmatpush.msra.mxu3 %v108_v20  ;;  %155 = vmatpush.msra.mxu1 %v109_v22  ;;  %v100_v36 = vld [vmem:[%s1115_s2 + $0x168] sm:$0xff]  ;;  %v67_v37 = vld [vmem:[%s1115_s2 + $0x60] sm:$0xff]  ;;  %v101_v38 = vld [vmem:[%s1115_s2 + $0x170] sm:$0xff] }
   0xe   :  { %177 = vmatpush.msra.mxu2 %v74_v23  ;;  %137 = vmatpush.msra.mxu0 %v73_v25  ;;  %v66_v39 = vld [vmem:[%s1115_s2 + $0x58] sm:$0xff]  ;;  %v65_v41 = vld [vmem:[%s1115_s2 + $0x50] sm:$0xff]  ;;  %v99_v42 = vld [vmem:[%s1115_s2 + $0x160] sm:$0xff] }
   0xf   :  { %197 = vmatpush.msra.mxu3 %v106_v24  ;;  %156 = vmatpush.msra.mxu1 %v107_v26  ;;  %v98_v40 = vld [vmem:[%s1115_s2 + $0x158] sm:$0xff]  ;;  %v51_v43 = vld [vmem:[%s1113_s0] sm:$0xf]  ;;  %v64_v45 = vld [vmem:[%s1115_s2 + $0x48] sm:$0xff] }
  0x10   :  { %178 = vmatpush.msra.mxu2 %v72_v27  ;;  %138 = vmatpush.msra.mxu0 %v71_v29  ;;  %v52_v44 = vld [vmem:[%s1114_s1] sm:$0xf]  ;;  %v96_v46 = vld [vmem:[%s1115_s2 + $0x148] sm:$0xff]  ;;  %v97_v49 = vld [vmem:[%s1115_s2 + $0x150] sm:$0xff] }
  0x11   :  { %198 = vmatpush.msra.mxu3 %v104_v28  ;;  %157 = vmatpush.msra.mxu1 %v105_v30  ;;  %v53_v47 = vadd.f32 %v52_v44, %v51_v43  ;;  %v63_v48 = vld [vmem:[%s1115_s2 + $0x40] sm:$0xff]  ;;  %v62_v50 = vld [vmem:[%s1115_s2 + $0x38] sm:$0xff]  ;;  %v61_v53 = vld [vmem:[%s1115_s2 + $0x30] sm:$0xff] }
  0x12   :  { %179 = vmatpush.msra.mxu2 %v70_v31  ;;  %139 = vmatpush.msra.mxu0 %v69_v33  ;;  %v94_v51 = vld [vmem:[%s1115_s2 + $0x138] sm:$0xff]  ;;  %v95_v54 = vld [vmem:[%s1115_s2 + $0x140] sm:$0xff]  ;;  %v60_v55 = vld [vmem:[%s1115_s2 + $0x28] sm:$0xff] }
  0x13   :  { %199 = vmatpush.msra.mxu3 %v102_v32  ;;  %158 = vmatpush.msra.mxu1 %v103_v34  ;;  %v54_v52 = vmul.f32 0.5, %v53_v47  ;;  %v92_v56 = vld [vmem:[%s1115_s2 + $0x128] sm:$0xff]  ;;  %v59_v57 = vld [vmem:[%s1115_s2 + $0x20] sm:$0xff]  ;;  %v93_v58 = vld [vmem:[%s1115_s2 + $0x130] sm:$0xff] }
  0x14   :  { %180 = vmatpush.msra.mxu2 %v68_v35  ;;  %140 = vmatpush.msra.mxu0 %v67_v37  ;;  %v58_v59 = vld [vmem:[%s1115_s2 + $0x18] sm:$0xff]  ;;  %v57_v61 = vld [vmem:[%s1115_s2 + $0x10] sm:$0xff]  ;;  %v91_v62 = vld [vmem:[%s1115_s2 + $0x120] sm:$0xff] }
  0x15   :  { %200 = vmatpush.msra.mxu3 %v100_v36  ;;  %159 = vmatpush.msra.mxu1 %v101_v38  ;;  %126 = vst [vmem:[#allocation1] ss:$4 sm:$0xff] %v54_v52  ;;  %v90_v60 = vld [vmem:[%s1115_s2 + $0x118] sm:$0xff]  ;;  %v56_v63 = vld [vmem:[%s1115_s2 + $0x8] sm:$0xff]  ;;  %v55_v1 = vld [vmem:[%s1115_s2] sm:$0xff] }
  0x16   :  { %181 = vmatpush.msra.mxu2 %v66_v39  ;;  %141 = vmatpush.msra.mxu0 %v65_v41  ;;  %v88_v0 = vld [vmem:[%s1115_s2 + $0x108] sm:$0xff]  ;;  %v89_v2 = vld [vmem:[%s1115_s2 + $0x110] sm:$0xff]  ;;  %v87_v3 = vld [vmem:[%s1115_s2 + $0x100] sm:$0xff] }
  0x17   :  { %201 = vmatpush.msra.mxu3 %v98_v40  ;;  %160 = vmatpush.msra.mxu1 %v99_v42  ;;  %v228_v4 = vld [vmem:[%s1117_s4 + $0x78] sm:$0xff] }
  0x18   :  { %182 = vmatpush.msra.mxu2 %v64_v45  ;;  %142 = vmatpush.msra.mxu0 %v63_v48 }
  0x19   :  { %202 = vmatpush.msra.mxu3 %v96_v46  ;;  %161 = vmatpush.msra.mxu1 %v97_v49 }
  0x1a   :  { %183 = vmatpush.msra.mxu2 %v62_v50  ;;  %143 = vmatpush.msra.mxu0 %v61_v53 }
  0x1b   :  { %203 = vmatpush.msra.mxu3 %v94_v51  ;;  %162 = vmatpush.msra.mxu1 %v95_v54 }
  0x1c   :  { %184 = vmatpush.msra.mxu2 %v60_v55  ;;  %144 = vmatpush.msra.mxu0 %v59_v57  ;;  %v127_v5 = vld.sshfl [vmem:[#allocation1] sm:$0xff pattern:$0x73625140]  ;;  %v128_v6 = vld.sshfl [vmem:[#allocation1 + $0x8] sm:$0xff pattern:$0x73625140] }
  0x1d   :  { %204 = vmatpush.msra.mxu3 %v92_v56  ;;  %163 = vmatpush.msra.mxu1 %v93_v58 }
  0x1e   :  { %185 = vmatpush.msra.mxu2 %v58_v59  ;;  %145 = vmatpush.msra.mxu0 %v57_v61 }
  0x1f   :  { %205 = vmatpush.msra.mxu3 %v90_v60  ;;  %164 = vmatpush.msra.mxu1 %v91_v62 }
  0x20   :  { %186 = vmatpush.msra.mxu2 %v56_v63  ;;  %146 = vmatpush.msra.mxu0 %v55_v1 }
  0x21   :  { %206 = vmatpush.msra.mxu3 %v88_v0  ;;  %187 = vmatmul.f32.vlgmr.msra.gmra.mxu2 %v127_v5 }
  0x22   :  { %207 = vmatmul.f32.vlgmr.msra.gmra.mxu3 %v128_v6  ;;  %165 = vmatpush.msra.mxu1 %v89_v2 }
  0x23   :  { %22 = vsyncpa [#allocation5], 0  ;;  %147 = vmatmul.f32.vlgmr.msra.gmra.mxu0 %v127_v5  ;;  %v227_v7 = vld [vmem:[%s1117_s4 + $0x70] sm:$0xff]  ;;  %v244_v8 = vld [vmem:[%s1117_s4 + $0xf8] sm:$0xff]  ;;  %vm380_vm0 = vcmask 261120   ;;  %vm404_vm1 = vcmask 33792  }
  0x24   :  { %166 = vmatpush.msra.mxu1 %v87_v3  ;;  %249 = vmatpush.msrb.mxu0 %v228_v4  ;;  %v226_v9 = vld [vmem:[%s1117_s4 + $0x68] sm:$0xff]  ;;  %v243_v10 = vld [vmem:[%s1117_s4 + $0xf0] sm:$0xff]  ;;  %v225_v11 = vld [vmem:[%s1117_s4 + $0x60] sm:$0xff]  ;;  %s504_s27 = sshll.u32 %s1128_s15, 4  ;;  %s505_s27 = int_to_ptr.hbm [resolvable:$true] %s504_s27 }
  0x25   :  { %167 = vmatmul.f32.vlgmr.msra.gmra.mxu1 %v128_v6  ;;  %v242_v12 = vld [vmem:[%s1117_s4 + $0xe8] sm:$0xff]  ;;  %v224_v13 = vld [vmem:[%s1117_s4 + $0x58] sm:$0xff]  ;;  %v241_v14 = vld [vmem:[%s1117_s4 + $0xe0] sm:$0xff] }
  0x26   :  { %250 = vmatpush.msrb.mxu0 %v227_v7  ;;  %269 = vmatpush.msrb.mxu1 %v244_v8  ;;  %v223_v15 = vld [vmem:[%s1117_s4 + $0x50] sm:$0xff]  ;;  %v240_v16 = vld [vmem:[%s1117_s4 + $0xd8] sm:$0xff]  ;;  %v222_v17 = vld [vmem:[%s1117_s4 + $0x48] sm:$0xff] }
  0x27   :  { %v239_v18 = vld [vmem:[%s1117_s4 + $0xd0] sm:$0xff]  ;;  %v221_v19 = vld [vmem:[%s1117_s4 + $0x40] sm:$0xff]  ;;  %v238_v20 = vld [vmem:[%s1117_s4 + $0xc8] sm:$0xff] }
  0x28   :  { %251 = vmatpush.msrb.mxu0 %v226_v9  ;;  %270 = vmatpush.msrb.mxu1 %v243_v10  ;;  %v220_v21 = vld [vmem:[%s1117_s4 + $0x38] sm:$0xff]  ;;  %v237_v22 = vld [vmem:[%s1117_s4 + $0xc0] sm:$0xff]  ;;  %v219_v23 = vld [vmem:[%s1117_s4 + $0x30] sm:$0xff] }
  0x29   :  { %v236_v24 = vld [vmem:[%s1117_s4 + $0xb8] sm:$0xff]  ;;  %v218_v25 = vld [vmem:[%s1117_s4 + $0x28] sm:$0xff]  ;;  %v235_v26 = vld [vmem:[%s1117_s4 + $0xb0] sm:$0xff] }
  0x2a   :  { %252 = vmatpush.msrb.mxu0 %v225_v11  ;;  %271 = vmatpush.msrb.mxu1 %v242_v12  ;;  %v217_v27 = vld [vmem:[%s1117_s4 + $0x20] sm:$0xff]  ;;  %v234_v28 = vld [vmem:[%s1117_s4 + $0xa8] sm:$0xff]  ;;  %v216_v29 = vld [vmem:[%s1117_s4 + $0x18] sm:$0xff] }
  0x2b   :  { %v233_v30 = vld [vmem:[%s1117_s4 + $0xa0] sm:$0xff]  ;;  %v215_v31 = vld [vmem:[%s1117_s4 + $0x10] sm:$0xff]  ;;  %v232_v32 = vld [vmem:[%s1117_s4 + $0x98] sm:$0xff] }
  0x2c   :  { %253 = vmatpush.msrb.mxu0 %v224_v13  ;;  %272 = vmatpush.msrb.mxu1 %v241_v14  ;;  %v214_v33 = vld [vmem:[%s1117_s4 + $0x8] sm:$0xff]  ;;  %v231_v34 = vld [vmem:[%s1117_s4 + $0x90] sm:$0xff]  ;;  %v213_v35 = vld [vmem:[%s1117_s4] sm:$0xff] }
  0x2d   :  { %v230_v36 = vld [vmem:[%s1117_s4 + $0x88] sm:$0xff]  ;;  %v229_v37 = vld [vmem:[%s1117_s4 + $0x80] sm:$0xff]  ;;  %v305_v38 = vld [vmem:[%s1119_s6 + $0x78] sm:$0xff]  ;;  %s493_s4 = sshll.u32 %s1127_s14, 4  ;;  %s588_s14 = smov [#allocation4]   ;;  %s494_s4 = int_to_ptr.hbm [resolvable:$true] %s493_s4 }
  0x2e   :  { %254 = vmatpush.msrb.mxu0 %v223_v15  ;;  %273 = vmatpush.msrb.mxu1 %v240_v16  ;;  %v346_v39 = vld [vmem:[%s1123_s10 + $0x78] sm:$0xff]  ;;  %v304_v40 = vld [vmem:[%s1119_s6 + $0x70] sm:$0xff]  ;;  %v303_v42 = vld [vmem:[%s1119_s6 + $0x68] sm:$0xff]  ;;  %s502_s1 = sshll.u32 %s588_s14, 4  ;;  %s503_s1 = int_to_ptr.vmem [resolvable:$true] %s502_s1 }
  0x2f   :  { %310 = vmatpush.msrb.mxu2 %v305_v38  ;;  %351 = vmatpush.msrb.mxu3 %v346_v39  ;;  %v345_v41 = vld [vmem:[%s1123_s10 + $0x70] sm:$0xff]  ;;  %v344_v43 = vld [vmem:[%s1123_s10 + $0x68] sm:$0xff]  ;;  %v302_v44 = vld [vmem:[%s1119_s6 + $0x60] sm:$0xff] }
  0x30   :  { %255 = vmatpush.msrb.mxu0 %v222_v17  ;;  %274 = vmatpush.msrb.mxu1 %v239_v18  ;;  %v343_v45 = vld [vmem:[%s1123_s10 + $0x60] sm:$0xff]  ;;  %v301_v46 = vld [vmem:[%s1119_s6 + $0x58] sm:$0xff]  ;;  %v300_v48 = vld [vmem:[%s1119_s6 + $0x50] sm:$0xff] }
  0x31   :  { %311 = vmatpush.msrb.mxu2 %v304_v40  ;;  %352 = vmatpush.msrb.mxu3 %v345_v41  ;;  %v342_v47 = vld [vmem:[%s1123_s10 + $0x58] sm:$0xff]  ;;  %v341_v49 = vld [vmem:[%s1123_s10 + $0x50] sm:$0xff]  ;;  %v299_v50 = vld [vmem:[%s1119_s6 + $0x48] sm:$0xff] }
  0x32   :  { %256 = vmatpush.msrb.mxu0 %v221_v19  ;;  %275 = vmatpush.msrb.mxu1 %v238_v20  ;;  %v340_v51 = vld [vmem:[%s1123_s10 + $0x48] sm:$0xff]  ;;  %v298_v52 = vld [vmem:[%s1119_s6 + $0x40] sm:$0xff]  ;;  %v297_v54 = vld [vmem:[%s1119_s6 + $0x38] sm:$0xff] }
  0x33   :  { %312 = vmatpush.msrb.mxu2 %v303_v42  ;;  %353 = vmatpush.msrb.mxu3 %v344_v43  ;;  %v339_v53 = vld [vmem:[%s1123_s10 + $0x40] sm:$0xff]  ;;  %v338_v55 = vld [vmem:[%s1123_s10 + $0x38] sm:$0xff]  ;;  %v296_v57 = vld [vmem:[%s1119_s6 + $0x30] sm:$0xff] }
  0x34   :  { %257 = vmatpush.msrb.mxu0 %v220_v21  ;;  %276 = vmatpush.msrb.mxu1 %v237_v22  ;;  %v119_v56 = vld [vmem:[%s1116_s3] sm:$0x3]  ;;  %v337_v58 = vld [vmem:[%s1123_s10 + $0x30] sm:$0xff]  ;;  %v295_v60 = vld [vmem:[%s1119_s6 + $0x28] sm:$0xff] }
  0x35   :  { %313 = vmatpush.msrb.mxu2 %v302_v44  ;;  %354 = vmatpush.msrb.mxu3 %v343_v45  ;;  %v121_v59 = vperm.slane %v119_v56, 0  ;;  %v336_v61 = vld [vmem:[%s1123_s10 + $0x28] sm:$0xff]  ;;  %v294_v62 = vld [vmem:[%s1119_s6 + $0x20] sm:$0xff]  ;;  %v122_v2 = vperm.slane %v119_v56, 1  ;;  %v293_v11 = vld [vmem:[%s1119_s6 + $0x18] sm:$0xff] }
  0x36   :  { %258 = vmatpush.msrb.mxu0 %v219_v23  ;;  %277 = vmatpush.msrb.mxu1 %v236_v24  ;;  %v335_v63 = vld [vmem:[%s1123_s10 + $0x20] sm:$0xff]  ;;  %v334_v12 = vld [vmem:[%s1123_s10 + $0x18] sm:$0xff]  ;;  %v292_v13 = vld [vmem:[%s1119_s6 + $0x10] sm:$0xff] }
  0x37   :  { %314 = vmatpush.msrb.mxu2 %v301_v46  ;;  %355 = vmatpush.msrb.mxu3 %v342_v47  ;;  %v333_v14 = vld [vmem:[%s1123_s10 + $0x10] sm:$0xff]  ;;  %v291_v15 = vld [vmem:[%s1119_s6 + $0x8] sm:$0xff]  ;;  %v290_v17 = vld [vmem:[%s1119_s6] sm:$0xff] }
  0x38   :  { %259 = vmatpush.msrb.mxu0 %v218_v25  ;;  %278 = vmatpush.msrb.mxu1 %v235_v26  ;;  %v332_v16 = vld [vmem:[%s1123_s10 + $0x8] sm:$0xff]  ;;  %v331_v18 = vld [vmem:[%s1123_s10] sm:$0xff]  ;;  %v375_v19 = vld [vmem:[%s1121_s8 + $0x18] sm:$0xff] }
  0x39   :  { %315 = vmatpush.msrb.mxu2 %v300_v48  ;;  %356 = vmatpush.msrb.mxu3 %v341_v49  ;;  %v433_v20 = vld [vmem:[%s1125_s12 + $0x18] sm:$0xff]  ;;  %v374_v21 = vld [vmem:[%s1121_s8 + $0x10] sm:$0xff]  ;;  %v522_v22 = vld [vmem:[%s1118_s5] ss:$0 sm:$0xff] }
  0x3a   :  { %260 = vmatpush.msrb.mxu0 %v217_v27  ;;  %279 = vmatpush.msrb.mxu1 %v234_v28  ;;  %v432_v28 = vld [vmem:[%s1125_s12 + $0x10] sm:$0xff]  ;;  %v525_v41 = vld [vmem:[%s1122_s9] ss:$0 sm:$0xff]  ;;  %s587_s9 = smov [#allocation2]  }
  0x3b   :  { %316 = vmatpush.msrb.mxu2 %v299_v50  ;;  %357 = vmatpush.msrb.mxu3 %v340_v51  ;;  %v526_v44 = vld [vmem:[%s1126_s13] ss:$0 sm:$0xff] }
  0x3c   :  { %261 = vmatpush.msrb.mxu0 %v216_v29  ;;  %280 = vmatpush.msrb.mxu1 %v233_v30  ;;  %v373_v29 = vld [vmem:[%s1121_s8 + $0x8] sm:$0xff] }
  0x3d   :  { %317 = vmatpush.msrb.mxu2 %v298_v52  ;;  %358 = vmatpush.msrb.mxu3 %v339_v53  ;;  %v431_v30 = vld [vmem:[%s1125_s12 + $0x8] sm:$0xff] }
  0x3e   :  { %262 = vmatpush.msrb.mxu0 %v215_v31  ;;  %281 = vmatpush.msrb.mxu1 %v232_v32  ;;  %v372_v31 = vld [vmem:[%s1121_s8] sm:$0xff] }
  0x3f   :  { %318 = vmatpush.msrb.mxu2 %v297_v54  ;;  %359 = vmatpush.msrb.mxu3 %v338_v55  ;;  %v430_v32 = vld [vmem:[%s1125_s12] sm:$0xff] }
  0x40   :  { %263 = vmatpush.msrb.mxu0 %v214_v33  ;;  %282 = vmatpush.msrb.mxu1 %v231_v34  ;;  %v523_v33 = vld [vmem:[%s1120_s7] ss:$0 sm:$0xff] }
  0x41   :  { %319 = vmatpush.msrb.mxu2 %v296_v57  ;;  %360 = vmatpush.msrb.mxu3 %v337_v58  ;;  %v524_v34 = vld [vmem:[%s1124_s11] ss:$0 sm:$0xff]  ;;  %s491_s11 = sshll.u32 %s587_s9, 4  ;;  %s492_s11 = int_to_ptr.vmem [resolvable:$true] %s491_s11 }
  0x42   :  { %264 = vmatpush.msrb.mxu0 %v213_v35  ;;  %283 = vmatpush.msrb.mxu1 %v230_v36 }
  0x43   :  { %320 = vmatpush.msrb.mxu2 %v295_v60  ;;  %361 = vmatpush.msrb.mxu3 %v336_v61 }
  0x44   :  { %284 = vmatpush.msrb.mxu1 %v229_v37  ;;  %396 = vmatpush.msra.mxu0 %v375_v19 }
  0x45   :  { %321 = vmatpush.msrb.mxu2 %v294_v62  ;;  %362 = vmatpush.msrb.mxu3 %v335_v63 }
  0x46   :  { %453 = vmatpush.msra.mxu1 %v433_v20  ;;  %397 = vmatpush.msra.mxu0 %v374_v21 }
  0x47   :  { %322 = vmatpush.msrb.mxu2 %v293_v11  ;;  %363 = vmatpush.msrb.mxu3 %v334_v12 }
  0x48   :  { %454 = vmatpush.msra.mxu1 %v432_v28  ;;  %398 = vmatpush.msra.mxu0 %v373_v29 }
  0x49   :  { %323 = vmatpush.msrb.mxu2 %v292_v13  ;;  %364 = vmatpush.msrb.mxu3 %v333_v14 }
  0x4a   :  { %455 = vmatpush.msra.mxu1 %v431_v30  ;;  %399 = vmatpush.msra.mxu0 %v372_v31 }
  0x4b   :  { %324 = vmatpush.msrb.mxu2 %v291_v15  ;;  %365 = vmatpush.msrb.mxu3 %v332_v16 }
  0x4c   :  { %456 = vmatpush.msra.mxu1 %v430_v32 }
  0x4d   :  { %325 = vmatpush.msrb.mxu2 %v290_v17  ;;  %366 = vmatpush.msrb.mxu3 %v331_v18 }
  0xa0   :  { %v148_v0 = vpop.f32.mrf.mxu0 }
  0xa1   :  { %v149_v1 = vadd.f32 %v148_v0, %v121_v59 }
  0xa2   :  { %v168_v3 = vpop.f32.mrf.mxu1 }
  0xa3   :  { %v169_v4 = vadd.f32 %v168_v3, %v149_v1 }
  0xa4   :  { %v188_v5 = vpop.f32.mrf.mxu2 }
  0xa5   :  { %v208_v6 = vpop.f32.mrf.mxu3  ;;  %v211_v7 = vmax.f32 %v169_v4, 0.0  ;;  %v189_v8 = vadd.f32 %v188_v5, %v122_v2 }
  0xa7   :  { %v209_v9 = vadd.f32 %v208_v6, %v189_v8  ;;  %265 = vmatmul.f32.vlgmr.msrb.gmra.mxu0 %v211_v7 }
  0xa9   :  { %v212_v10 = vmax.f32 %v209_v9, 0.0 }
  0xab   :  { %285 = vmatmul.f32.vlgmr.msrb.gmra.mxu1 %v212_v10 }
 0x124   :  { %v266_v23 = vpop.f32.mrf.mxu0 }
 0x125   :  { %v267_v24 = vadd.f32 %v522_v22, %v266_v23 }
 0x128   :  { %v286_v25 = vpop.f32.mrf.mxu1 }
 0x129   :  { %v287_v26 = vadd.f32 %v286_v25, %v267_v24 }
 0x12b   :  { %v289_v27 = vmax.f32 %v287_v26, 0.0 }
 0x12d   :  { %326 = vmatmul.f32.vlgmr.msrb.gmra.mxu2 %v289_v27  ;;  %367 = vmatmul.f32.vlgmr.msrb.gmra.mxu3 %v289_v27 }
 0x1b0   :  { %v327_v35 = vpop.f32.mrf.mxu2  ;;  %v368_v36 = vpop.f32.mrf.mxu3 }
 0x1b1   :  { %v328_v37 = vadd.f32 %v523_v33, %v327_v35  ;;  %v369_v38 = vadd.f32 %v524_v34, %v368_v36 }
 0x1b3   :  { %v330_v39 = vmax.f32 %v328_v37, 0.0  ;;  %v371_v40 = vmax.f32 %v369_v38, 0.0 }
 0x1b5   :  { %518 = vmatmul.msk.f32.vlgmr.msra.gmra.mxu0 %vm380_vm0, %v330_v39  ;;  %519 = vmatmul.msk.f32.vlgmr.msra.gmra.mxu1 %vm380_vm0, %v371_v40 }
 0x232   :  { %v401_v42 = vpop.f32.mrf.mxu0  ;;  %v458_v46 = vpop.f32.mrf.mxu1 }
 0x233   :  { %v402_v43 = vadd.f32 %v525_v41, %v401_v42  ;;  %v459_v47 = vadd.f32 %v526_v44, %v458_v46 }
 0x235   :  { %v405_v45 = vsel %vm404_vm1, %v402_v43, -inf  ;;  %v461_v48 = vsel %vm404_vm1, %v459_v47, -inf }
 0x236   :  { %406 = vmax.xlane.f32.xlu0 %v405_v45 }
 0x23e   :  { %462 = vmax.xlane.f32.xlu0 %v461_v48 }
 0x2a9   :  { %v407_v49 = vpop.xlane.xlu0 %406 }
 0x2aa   :  { %v408_v50 = vsub.f32 %v402_v43, %v407_v49 }
 0x2ac   :  { %v409_v51 = vmul.f32 1.442695, %v408_v50 }
 0x2ae   :  { %527 = vpow2.f32 %v409_v51 }
 0x2b1   :  { %v463_v52 = vpop.xlane.xlu0 %462 }
 0x2b2   :  { %v464_v53 = vsub.f32 %v459_v47, %v463_v52 }
 0x2b4   :  { %v528_v54 = vpop.eup %527  ;;  %v465_v55 = vmul.f32 1.442695, %v464_v53 }
 0x2b5   :  { %v411_v56 = vsel %vm404_vm1, %v528_v54, 0.0 }
 0x2b6   :  { %529 = vpow2.f32 %v465_v55  ;;  %412 = vadd.xlane.f32.xlu1 %v411_v56 }
 0x2bc   :  { %v530_v57 = vpop.eup %529 }
 0x2bd   :  { %v467_v58 = vsel %vm404_vm1, %v530_v57, 0.0 }
 0x2be   :  { %468 = vadd.xlane.f32.xlu1 %v467_v58 }
 0x329   :  { %v413_v59 = vpop.xlane.xlu1 %412 }
 0x32a   :  { %531 = vrcp.f32 %v413_v59  ;;  %v425_v0 = vand.u32 2147483648, %v413_v59  ;;  %v423_v2 = vand.u32 2147483647, %v413_v59  ;;  %vm419_vm3 = vweird.f32 %v413_v59 }
 0x32c   :  { %v426_v5 = vor.u32 1.1754944e-38, %v425_v0  ;;  %vm424_vm5 = vcmp.eq.f32.partialorder %v423_v2, 8.507059e+37 }
 0x330   :  { %v532_v60 = vpop.eup %531 }
 0x331   :  { %v415_v61 = vmul.f32 %v532_v60, %v413_v59  ;;  %v469_v62 = vpop.xlane.xlu1 %468  ;;  %vm420_vm2 = vweird.f32 %v532_v60 }
 0x332   :  { %533 = vrcp.f32 %v469_v62  ;;  %vm421_vm4 = vmor %vm419_vm3, %vm420_vm2  ;;  %v481_v11 = vand.u32 2147483648, %v469_v62  ;;  %v479_v13 = vand.u32 2147483647, %v469_v62  ;;  %vm475_vm7 = vweird.f32 %v469_v62 }
 0x333   :  { %v416_v63 = vsub.f32 1.0, %v415_v61 }
 0x334   :  { %v482_v15 = vor.u32 1.1754944e-38, %v481_v11  ;;  %vm480_vm9 = vcmp.eq.f32.partialorder %v479_v13, 8.507059e+37 }
 0x335   :  { %v417_v1 = vmul.f32 %v532_v60, %v416_v63 }
 0x337   :  { %v418_v3 = vadd.f32 %v532_v60, %v417_v1 }
 0x338   :  { %v534_v4 = vpop.eup %533 }
 0x339   :  { %v471_v6 = vmul.f32 %v534_v4, %v469_v62  ;;  %v422_v7 = vsel %vm421_vm4, %v532_v60, %v418_v3  ;;  %vm476_vm6 = vweird.f32 %v534_v4 }
 0x33a   :  { %v427_v8 = vsel %vm424_vm5, %v426_v5, %v422_v7  ;;  %vm477_vm8 = vmor %vm475_vm7, %vm476_vm6 }
 0x33b   :  { %v472_v9 = vsub.f32 1.0, %v471_v6  ;;  %v428_v10 = vmul.f32 %v528_v54, %v427_v8 }
 0x33d   :  { %v473_v12 = vmul.f32 %v534_v4, %v472_v9  ;;  %429 = vst.msk [vmem:[#allocation2] sm:$0x3] %vm404_vm1, %v428_v10 }
 0x33e   :  { %496 = dma.vmem_to_hbm [thread:$0]  %s492_s11, 32, %s494_s4, [#allocation3]  }
 0x33f   :  { %v474_v14 = vadd.f32 %v534_v4, %v473_v12 }
 0x341   :  { %v478_v16 = vsel %vm477_vm8, %v534_v4, %v474_v14 }
 0x342   :  { %v483_v17 = vsel %vm480_vm9, %v482_v15, %v478_v16 }
 0x343   :  { %v484_v18 = vmul.f32 %v530_v57, %v483_v17 }
 0x345   :  { %485 = vst.msk [vmem:[#allocation4] sm:$0x3] %vm404_vm1, %v484_v18 }
 0x346   :  { %507 = dma.vmem_to_hbm [thread:$0]  %s503_s1, 32, %s505_s27, [#allocation5]  }
 0x347   :  { %583 = dma.done.wait [#allocation3], 32  }
 0x348   :  { %584 = vsyncadd [#allocation3], 4294967264 }
 0x349   :  { %585 = dma.done.wait [#allocation5], 32  }
 0x34a   :  { %586 = vsyncadd [#allocation5], 4294967264 }
 0x34b   :  { %516 = vsyncpa [#allocation3], 1 }
 0x34c   :  { %517 = vsyncpa [#allocation5], 1 }

</bundles_post_ra>
